<compile_context>
chip_gen: v5e
topology: v5e:2x2
jax: 0.10.0
libtpu: 0.0.40
codegen_flags: <defaults>
</compile_context>

<pallas_src>
import functools

import jax
import jax.numpy as jnp
import numpy as np
from jax.experimental import pallas as pl
from jax.experimental.pallas import tpu as pltpu


# --------------------------------------------------------------------------
# Fused kernel: init embedding + n_layers message passing + readout for the
# TB graphs of one grid step.
# --------------------------------------------------------------------------
def _mpnn_fused_kernel(nfx_ref, adj_ref, w_init_ref, w_layers_ref,
                       w_pool_ref, w_ro_ref, b_ro_ref, out_ref,
                       *, n_layers, j_tile):
    TB, N, _ = adj_ref.shape
    F = w_pool_ref.shape[0]
    O = b_ro_ref.shape[-1]
    n_obs_in = w_init_ref.shape[0]
    bf16 = jnp.bfloat16

    nfx = nfx_ref[...]                                  # (TB*N, n_obs_in+2) f32
    nf = nfx[:, 0:n_obs_in]
    inv_norm = nfx[:, n_obs_in:n_obs_in + 1]            # (TB*N, 1)  1 / norm
    norm_s = nfx[:, n_obs_in + 1:n_obs_in + 2]          # (TB*N, 1)  norm / max(norm)

    adj3 = adj_ref[...]                                 # (TB, N, N) f32
    mask3 = (adj3 != 0).astype(jnp.float32)

    # ---- initial node embedding: relu(node_features @ W_init^T), M = TB*N ----
    cur2 = jnp.maximum(
        jnp.dot(nf.astype(bf16), w_init_ref[...],
                preferred_element_type=jnp.float32), 0.0)        # (TB*N, F)

    # ---- message passing layers (statically unrolled; fine for L <= 4) ----
    # For larger L switch to lax.fori_loop over w_layers_ref[l] to bound live ranges.
    for l in range(n_layers):
        wl = w_layers_ref[l]                        # (3F+16, 2F) bf16, VMEM-resident
        w_cur = wl[0:F, :]                          # [ W_er(pad) | W_ua ]   (F, 2F)
        w_efa = wl[F:2 * F, F:2 * F]                # (F, F)   (padded row F-1 = 0)
        w_ma_mb = wl[F:3 * F, 0:F]                  # (2F, F)  stacked [W_ma; W_mb]
        w_ub = wl[2 * F:3 * F, F:2 * F]             # (F, F)
        w_e0 = wl[3 * F:3 * F + 1, 0:F].astype(jnp.float32)      # (1, F)
        w_efb = wl[3 * F:3 * F + 1, F:2 * F].astype(jnp.float32)  # (1, F)

        # one wide MXU dot feeds both the edge path (z) and the update path (ua)
        zu = jnp.dot(cur2.astype(bf16), w_cur,
                     preferred_element_type=jnp.float32)          # (TB*N, 2F)
        z2, ua2 = zu[:, 0:F], zu[:, F:2 * F]
        z3 = z2.reshape(TB, N, F)

        # ---- EdgeAndNodeEmbeddingLayer ----
        # relu(edge_features @ W_edge^T) decomposed as
        #   relu(adj[g,i,j]*W_e0 + mask[g,i,j]*(cur[g,j] @ W_er)),  F-1 -> F pad.
        # neighbour (j) axis tiled; f32 accumulation.  (On v6e/v7x this
        # elementwise block could run in bf16; kept f32 so v5e stays native.)
        emb_sum3 = jnp.zeros((TB, N, F), jnp.float32)
        for c in range(N // j_tile):
            j0 = c * j_tile
            adj_c = adj3[:, :, j0:j0 + j_tile]                    # (TB, N, JT)
            mask_c = mask3[:, :, j0:j0 + j_tile]
            z_c = z3[:, j0:j0 + j_tile, :]                        # (TB, JT, F)
            e = jnp.maximum(adj_c[:, :, :, None] * w_e0[None, None]
                            + mask_c[:, :, :, None] * z_c[:, None, :, :], 0.0)
            emb_sum3 = emb_sum3 + jnp.sum(e, axis=2)              # (TB, N, F)
        emb_edges2 = emb_sum3.reshape(TB * N, F) * inv_norm       # (TB*N, F)
        edge_emb2 = jnp.maximum(
            jnp.dot(emb_edges2.astype(bf16), w_efa,
                    preferred_element_type=jnp.float32)
            + norm_s * w_efb, 0.0)                                # (TB*N, F)

        # ---- UpdateNodeEmbeddingLayer + residual ----
        cur3 = cur2.reshape(TB, N, F)
        agg3 = jnp.einsum('gij,gjf->gif',
                          adj3.astype(bf16), cur3.astype(bf16),
                          preferred_element_type=jnp.float32)     # per-graph adj@cur
        agg2 = agg3.reshape(TB * N, F) * inv_norm

        msg_in = jnp.concatenate([agg2, edge_emb2], axis=-1)      # (TB*N, 2F)
        msg2 = jnp.maximum(
            jnp.dot(msg_in.astype(bf16), w_ma_mb,
                    preferred_element_type=jnp.float32), 0.0)     # one K=2F pass
        new2 = jnp.maximum(
            ua2 + jnp.dot(msg2.astype(bf16), w_ub,
                          preferred_element_type=jnp.float32), 0.0)
        cur2 = new2 + cur2

    # ---- ReadoutLayerMultidim (n_hid = [] -> single Linear(3F -> O)) ----
    # pooled path via linearity: mean(f) @ W_pool == mean(f @ W_pool)  (M=TB*N dot)
    gpool2 = jnp.dot(cur2.astype(bf16), w_pool_ref[...],
                     preferred_element_type=jnp.float32)          # (TB*N, F)
    h_pooled = jnp.sum(gpool2.reshape(TB, N, F), axis=1) * (1.0 / N)   # (TB, F)

    w_ro = w_ro_ref[...]                                          # (F, 3O)=[Wb|Wc|Wa]
    f_relu = jnp.maximum(cur2, 0.0)
    bc = jnp.dot(f_relu.astype(bf16), w_ro[:, 0:2 * O],
                 preferred_element_type=jnp.float32)              # (TB*N, 2O)
    a = jnp.dot(jnp.maximum(h_pooled, 0.0).astype(bf16), w_ro[:, 2 * O:3 * O],
                preferred_element_type=jnp.float32)               # (TB, O)
    const = a + b_ro_ref[...]                                     # (TB, O)

    # out[g, i, j, d] = bm[g,i,d] + cm[g,j,d] + const[g,d]  (pure broadcasts)
    bm3 = bc[:, 0:O].reshape(TB, N, O)        # varies with i (f_expanded)
    cm3 = bc[:, O:2 * O].reshape(TB, N, O)    # varies with j (f_expanded_diff)
    out_ref[...] = (bm3[:, :, None, :] + cm3[:, None, :, :]
                    + const[:, None, None, :])


# --------------------------------------------------------------------------
# Weight packing (torch (out_features, in_features) layout -> kernel layout)
# --------------------------------------------------------------------------
def pack_layer_weights(layer_params, n_features):
    """Pack each layer's weights into one (3F+16, 2F) bf16 slab (F-1 widths are
    zero-padded to F, exact). Stacked over layers -> (L, 3F+16, 2F)."""
    F = n_features
    R = 3 * F + 16                       # 16-row pad: bf16 sublane alignment
    slabs = []
    for p in layer_params:
        w_edge, w_ef = p['w_edge'], p['w_ef']      # (F-1, F+1), (F, F)
        w_msg, w_upd = p['w_msg'], p['w_upd']      # (F, 2F),    (F, 2F)
        slab = jnp.zeros((R, 2 * F), jnp.float32)
        slab = slab.at[0:F, 0:F - 1].set(w_edge[:, 1:].T)             # W_er (pad)
        slab = slab.at[0:F, F:2 * F].set(w_upd[:, 0:F].T)             # W_ua
        slab = slab.at[F:2 * F, 0:F].set(w_msg[:, 0:F].T)             # W_ma \ merged
        slab = slab.at[2 * F:3 * F, 0:F].set(w_msg[:, F:2 * F].T)     # W_mb / msg dot
        slab = slab.at[F:2 * F - 1, F:2 * F].set(w_ef[:, 0:F - 1].T)  # W_efa (pad)
        slab = slab.at[2 * F:3 * F, F:2 * F].set(w_upd[:, F:2 * F].T)  # W_ub
        slab = slab.at[3 * F, 0:F - 1].set(w_edge[:, 0])              # W_e0 (pad)
        slab = slab.at[3 * F, F:2 * F].set(w_ef[:, F - 1])            # W_efb
        slabs.append(slab)
    return jnp.stack(slabs, axis=0).astype(jnp.bfloat16)


# --------------------------------------------------------------------------
# Full forward (glue in plain JAX, hot path fully fused in one Pallas kernel)
# --------------------------------------------------------------------------
def mpnn_forward(obs, params, *, n_obs_in, dim_whole_obs, n_layers,
                 graphs_per_step=None):
    # TODO(synk): action-indexed gather (action != None), robot_state_dim > 0
    # slicing and n_hid_readout != [] MLP readouts are not implemented; this is
    # the `action is None`, robot_state_dim=0, n_hid=[] forward path.
    B = obs.shape[0]
    obs3 = obs.reshape(B, -1, dim_whole_obs)
    node_features = obs3[:, :, :n_obs_in]                   # (B, N, n_obs_in)
    adj = obs3[:, :, n_obs_in:].astype(jnp.float32)         # (B, N, N)
    N = adj.shape[1]
    F = params['w_init'].shape[0]
    O = params['b_ro'].shape[0]

    # ---- batch folding: TB graphs per grid step -> MXU M-dim = TB*N ----
    if graphs_per_step is None:
        TB = max(1, min(B, 256 // max(N, 1)))    # target ~256 rows per dot
        if B >= 2:
            TB = min(TB, B // 2)                 # keep >=2 grid steps (v7x: 2 TCs)
        while B % TB:
            TB -= 1
    else:
        TB = graphs_per_step
    assert B % TB == 0, (B, TB)
    G = B // TB

    # j-tile for the O(N^2 F) edge path; caps the live intermediate at
    # TB*N*j_tile*F floats (set vmem_limit_bytes if this is pushed harder).
    j_tile = N if N <= 128 else 128
    assert N % j_tile == 0, (N, j_tile)

    # ---- normalisation (global max over the WHOLE batch, matches torch .max()) --
    norm = jnp.sum((adj != 0).astype(jnp.float32), axis=1)[..., None]   # (B, N, 1)
    norm = jnp.where(norm == 0.0, 1.0, norm)
    inv_norm = 1.0 / norm
    norm_s = norm / jnp.max(norm)

    # pack the two per-node scalars next to the node features: one DMA, no
    # separate lane-sparse (last dim = 1) inputs.
    nfx = jnp.concatenate([node_features, inv_norm, norm_s], axis=-1)
    nfx = nfx.reshape(B * N, n_obs_in + 2).astype(jnp.float32)

    # ---- weights: bf16 MXU operands (f32 accumulation happens in-kernel) ----
    w_init_t = params['w_init'].T.astype(jnp.bfloat16)               # (n_obs_in, F)
    w_layers = pack_layer_weights(params['layers'], F)               # (L, 3F+16, 2F)
    w_pool_t = params['w_pool'].T.astype(jnp.bfloat16)               # (F, F)
    w_ro = params['w_ro']                                            # (O, 3F)
    w_ro_pack = jnp.concatenate(
        [w_ro[:, F:2 * F].T, w_ro[:, 2 * F:].T, w_ro[:, :F].T],
        axis=1).astype(jnp.bfloat16)                                 # (F, 3O)
    bias = params['b_ro'].reshape(1, -1).astype(jnp.float32)         # (1, O)

    kernel = functools.partial(_mpnn_fused_kernel,
                               n_layers=n_layers, j_tile=j_tile)

    def bcast(arr):
        zeros = (0,) * arr.ndim
        return pl.BlockSpec(arr.shape, lambda b: zeros)

    out = pl.pallas_call(
        kernel,
        out_shape=jax.ShapeDtypeStruct((B, N, N, O), jnp.float32),
        grid=(G,),
        in_specs=[
            pl.BlockSpec((TB * N, n_obs_in + 2), lambda b: (b, 0)),   # nf + norms
            pl.BlockSpec((TB, N, N), lambda b: (b, 0, 0)),            # adjacency
            bcast(w_init_t),
            bcast(w_layers),
            bcast(w_pool_t),
            bcast(w_ro_pack),
            bcast(bias),
        ],
        out_specs=pl.BlockSpec((TB, N, N, O), lambda b: (b, 0, 0, 0)),
        compiler_params=pltpu.CompilerParams(
            dimension_semantics=("parallel",)),
    )(nfx, adj, w_init_t, w_layers, w_pool_t, w_ro_pack, bias)
    return out


# --------------------------------------------------------------------------
# Parameter setup (deterministic, torch-layout weights: (out_features, in_features))
# --------------------------------------------------------------------------
def glorot(key, shape):
    fan_out, fan_in = shape
    limit = float(np.sqrt(6.0 / (fan_in + fan_out)))
    return jax.random.uniform(key, shape, jnp.float32, -limit, limit)


def make_params(key, n_obs_in, n_features, n_layers, output_dim):
    keys = jax.random.split(key, 4 + 4 * n_layers)
    F = n_features
    params = {
        'w_init': glorot(keys[0], (F, n_obs_in)),
        'w_pool': glorot(keys[1], (F, F)),
        'w_ro': glorot(keys[2], (output_dim, 3 * F)),
        'b_ro': 0.01 * jax.random.normal(keys[3], (output_dim,), jnp.float32),
        'layers': [],
    }
    for i in range(n_layers):
        k = keys[4 + 4 * i: 8 + 4 * i]
        params['layers'].append({
            'w_edge': glorot(k[0], (F - 1, F + 1)),   # edge_embedding_NN
            'w_ef': glorot(k[1], (F, F)),             # edge_feature_NN
            'w_msg': glorot(k[2], (F, 2 * F)),        # message_layer
            'w_upd': glorot(k[3], (F, 2 * F)),        # update_layer
        })
    return params


# --------------------------------------------------------------------------
# Pure-JAX reference (direct transcription of the torch forward)
# --------------------------------------------------------------------------
def reference_forward(obs, params, *, n_obs_in, dim_whole_obs, n_layers):
    B = obs.shape[0]
    obs = obs.reshape(B, -1, dim_whole_obs)
    node_features = obs[:, :, :n_obs_in]
    adj = obs[:, :, n_obs_in:]
    N = adj.shape[1]
    norm = jnp.sum((adj != 0).astype(jnp.float32), axis=1)[..., None]
    norm = jnp.where(norm == 0.0, 1.0, norm)

    cur = jax.nn.relu(node_features @ params['w_init'].T)
    F = cur.shape[-1]
    for i in range(n_layers):
        p = params['layers'][i]
        prev = cur
        ef = jnp.concatenate(
            [adj[..., None], jnp.broadcast_to(cur[:, None, :, :], (B, N, N, F))], -1)
        ef = ef * (adj[..., None] != 0).astype(jnp.float32)
        ee = jax.nn.relu(ef @ p['w_edge'].T)                        # (B,N,N,F-1)
        emb = ee.sum(axis=2) / norm
        edge_emb = jax.nn.relu(
            jnp.concatenate([emb, norm / jnp.max(norm)], -1) @ p['w_ef'].T)
        agg = jnp.einsum('bij,bjf->bif', adj, cur) / norm
        msg = jax.nn.relu(jnp.concatenate([agg, edge_emb], -1) @ p['w_msg'].T)
        new = jax.nn.relu(jnp.concatenate([cur, msg], -1) @ p['w_upd'].T)
        cur = new + prev

    h_pooled = (cur.sum(axis=1) / N) @ params['w_pool'].T           # (B, F)
    f_i = jnp.broadcast_to(cur[:, :, None, :], (B, N, N, F))
    f_j = jnp.broadcast_to(cur[:, None, :, :], (B, N, N, F))
    fp = jnp.broadcast_to(h_pooled[:, None, None, :], (B, N, N, F))
    feats = jax.nn.relu(jnp.concatenate([fp, f_i, f_j], -1))
    return feats @ params['w_ro'].T + params['b_ro']


# --------------------------------------------------------------------------
if __name__ == "__main__":
    B = 8                 # batch of graphs (folded 4-per-step -> grid=(2,))
    N = 8                 # number of graph nodes
    n_obs_in = 7
    dim_whole_obs = n_obs_in + N   # node features + adjacency row
    n_features = 32
    n_layers = 3
    output_dim = 4        # num_actions_avail

    key = jax.random.PRNGKey(0)
    k_feat, k_adj, k_param = jax.random.split(key, 3)

    node_feats = jax.random.normal(k_feat, (B, N, n_obs_in), jnp.float32)
    adj = (jax.random.uniform(k_adj, (B, N, N)) < 0.5).astype(jnp.float32)
    obs = jnp.concatenate([node_feats, adj], axis=-1).reshape(B, N * dim_whole_obs)

    params = make_params(k_param, n_obs_in, n_features, n_layers, output_dim)

    fwd = jax.jit(functools.partial(mpnn_forward, n_obs_in=n_obs_in,
                                    dim_whole_obs=dim_whole_obs,
                                    n_layers=n_layers))
    out = jax.block_until_ready(fwd(obs, params))

    ref = jax.block_until_ready(
        reference_forward(obs, params, n_obs_in=n_obs_in,
                          dim_whole_obs=dim_whole_obs, n_layers=n_layers))

    assert out.shape == (B, N, N, output_dim), out.shape
    # Tolerance reflects bf16 MXU operands in the kernel and DEFAULT-precision
    # (bf16-pass) f32 dots in the reference.
    np.testing.assert_allclose(np.asarray(out), np.asarray(ref), rtol=3e-2, atol=3e-2)

    print("KERNEL_OK")
</pallas_src>

<mosaic_0001>
module attributes {stable_mosaic.version = 11 : i64} {
  func.func @_mpnn_fused_kernel(%arg0: i32, %arg1: memref<32x9xf32, #tpu.memory_space<vmem>>, %arg2: memref<4x8x8xf32, #tpu.memory_space<vmem>>, %arg3: memref<7x32xbf16, #tpu.memory_space<vmem>>, %arg4: memref<3x112x64xbf16, #tpu.memory_space<vmem>>, %arg5: memref<32x32xbf16, #tpu.memory_space<vmem>>, %arg6: memref<32x12xbf16, #tpu.memory_space<vmem>>, %arg7: memref<1x4xf32, #tpu.memory_space<vmem>>, %arg8: memref<4x8x8x4xf32, #tpu.memory_space<vmem>>) attributes {dimension_semantics = [#tpu.dimension_semantics<parallel>], iteration_bounds = array<i64: 2>, scalar_prefetch = 0 : i64, scratch_operands = 0 : i64, tpu.core_type = #tpu.core_type<tc>, window_params = [{transform_indices = @transform_0, window_bounds = array<i64: 32, 9>}, {transform_indices = @transform_1, window_bounds = array<i64: 4, 8, 8>}, {pipeline_mode = #tpu.pipeline_mode<synchronous>, transform_indices = @transform_2, window_bounds = array<i64: 7, 32>}, {pipeline_mode = #tpu.pipeline_mode<synchronous>, transform_indices = @transform_3, window_bounds = array<i64: 3, 112, 64>}, {pipeline_mode = #tpu.pipeline_mode<synchronous>, transform_indices = @transform_4, window_bounds = array<i64: 32, 32>}, {pipeline_mode = #tpu.pipeline_mode<synchronous>, transform_indices = @transform_5, window_bounds = array<i64: 32, 12>}, {pipeline_mode = #tpu.pipeline_mode<synchronous>, transform_indices = @transform_6, window_bounds = array<i64: 1, 4>}, {transform_indices = @transform_7, window_bounds = array<i64: 4, 8, 8, 4>}]} {
    %c0 = arith.constant 0 : index
    %c0_0 = arith.constant 0 : index
    %0 = vector.load %arg1[%c0, %c0_0] : memref<32x9xf32, #tpu.memory_space<vmem>>, vector<32x9xf32>
    %1 = vector.extract_strided_slice %0 {offsets = [0, 0], sizes = [32, 7], strides = [1, 1]} : vector<32x9xf32> to vector<32x7xf32>
    %2 = vector.extract_strided_slice %0 {offsets = [0, 7], sizes = [32, 1], strides = [1, 1]} : vector<32x9xf32> to vector<32x1xf32>
    %3 = vector.extract_strided_slice %0 {offsets = [0, 8], sizes = [32, 1], strides = [1, 1]} : vector<32x9xf32> to vector<32x1xf32>
    %c0_1 = arith.constant 0 : index
    %c0_2 = arith.constant 0 : index
    %c0_3 = arith.constant 0 : index
    %4 = vector.load %arg2[%c0_1, %c0_2, %c0_3] : memref<4x8x8xf32, #tpu.memory_space<vmem>>, vector<4x8x8xf32>
    %cst = arith.constant 0.000000e+00 : f32
    %5 = vector.broadcast %cst : f32 to vector<4x8x8xf32>
    %6 = arith.cmpf one, %4, %5 : vector<4x8x8xf32>
    %7 = arith.extui %6 : vector<4x8x8xi1> to vector<4x8x8xi32>
    %8 = arith.sitofp %7 : vector<4x8x8xi32> to vector<4x8x8xf32>
    %9 = arith.truncf %1 : vector<32x7xf32> to vector<32x7xbf16>
    %c0_4 = arith.constant 0 : index
    %c0_5 = arith.constant 0 : index
    %10 = vector.load %arg3[%c0_4, %c0_5] : memref<7x32xbf16, #tpu.memory_space<vmem>>, vector<7x32xbf16>
    %cst_6 = arith.constant dense<0.000000e+00> : vector<32x32xf32>
    %11 = tpu.matmul %9, %10, %cst_6 {dimension_numbers = #tpu.dot_dimension_numbers<[1], [0], [0], [1], [0, 0, 1, 1], [], []>} : vector<32x7xbf16>, vector<7x32xbf16>, vector<32x32xf32> -> vector<32x32xf32>
    %cst_7 = arith.constant 0.000000e+00 : f32
    %12 = vector.broadcast %cst_7 : f32 to vector<32x32xf32>
    %13 = arith.maximumf %11, %12 : vector<32x32xf32>
    %c0_8 = arith.constant 0 : index
    %c0_9 = arith.constant 0 : index
    %c0_10 = arith.constant 0 : index
    %14 = vector.load %arg4[%c0_8, %c0_9, %c0_10] : memref<3x112x64xbf16, #tpu.memory_space<vmem>>, vector<1x112x64xbf16>
    %15 = vector.shape_cast %14 : vector<1x112x64xbf16> to vector<112x64xbf16>
    %16 = vector.extract_strided_slice %15 {offsets = [0, 0], sizes = [32, 64], strides = [1, 1]} : vector<112x64xbf16> to vector<32x64xbf16>
    %17 = vector.extract_strided_slice %15 {offsets = [32, 32], sizes = [32, 32], strides = [1, 1]} : vector<112x64xbf16> to vector<32x32xbf16>
    %18 = vector.extract_strided_slice %15 {offsets = [32, 0], sizes = [64, 32], strides = [1, 1]} : vector<112x64xbf16> to vector<64x32xbf16>
    %19 = vector.extract_strided_slice %15 {offsets = [64, 32], sizes = [32, 32], strides = [1, 1]} : vector<112x64xbf16> to vector<32x32xbf16>
    %20 = vector.extract_strided_slice %15 {offsets = [96, 0], sizes = [1, 32], strides = [1, 1]} : vector<112x64xbf16> to vector<1x32xbf16>
    %21 = arith.extf %20 : vector<1x32xbf16> to vector<1x32xf32>
    %22 = vector.extract_strided_slice %15 {offsets = [96, 32], sizes = [1, 32], strides = [1, 1]} : vector<112x64xbf16> to vector<1x32xbf16>
    %23 = arith.extf %22 : vector<1x32xbf16> to vector<1x32xf32>
    %24 = arith.truncf %13 : vector<32x32xf32> to vector<32x32xbf16>
    %cst_11 = arith.constant dense<0.000000e+00> : vector<32x64xf32>
    %25 = tpu.matmul %24, %16, %cst_11 {dimension_numbers = #tpu.dot_dimension_numbers<[1], [0], [0], [1], [0, 0, 1, 1], [], []>} : vector<32x32xbf16>, vector<32x64xbf16>, vector<32x64xf32> -> vector<32x64xf32>
    %26 = vector.extract_strided_slice %25 {offsets = [0, 0], sizes = [32, 32], strides = [1, 1]} : vector<32x64xf32> to vector<32x32xf32>
    %27 = vector.extract_strided_slice %25 {offsets = [0, 32], sizes = [32, 32], strides = [1, 1]} : vector<32x64xf32> to vector<32x32xf32>
    %28 = vector.shape_cast %26 : vector<32x32xf32> to vector<4x8x32xf32>
    %cst_12 = arith.constant 0.000000e+00 : f32
    %29 = vector.broadcast %cst_12 : f32 to vector<4x8x32xf32>
    %30 = vector.shape_cast %4 : vector<4x8x8xf32> to vector<4x8x8x1xf32>
    %31 = vector.shape_cast %21 : vector<1x32xf32> to vector<1x1x1x32xf32>
    %32 = vector.broadcast %30 : vector<4x8x8x1xf32> to vector<4x8x8x32xf32>
    %33 = vector.broadcast %31 : vector<1x1x1x32xf32> to vector<4x8x8x32xf32>
    %34 = arith.mulf %32, %33 : vector<4x8x8x32xf32>
    %35 = vector.shape_cast %8 : vector<4x8x8xf32> to vector<4x8x8x1xf32>
    %36 = vector.shape_cast %28 : vector<4x8x32xf32> to vector<4x1x8x32xf32>
    %37 = vector.broadcast %35 : vector<4x8x8x1xf32> to vector<4x8x8x32xf32>
    %38 = vector.broadcast %36 : vector<4x1x8x32xf32> to vector<4x8x8x32xf32>
    %39 = arith.mulf %37, %38 : vector<4x8x8x32xf32>
    %40 = arith.addf %34, %39 : vector<4x8x8x32xf32>
    %cst_13 = arith.constant 0.000000e+00 : f32
    %41 = vector.broadcast %cst_13 : f32 to vector<4x8x8x32xf32>
    %42 = arith.maximumf %40, %41 : vector<4x8x8x32xf32>
    %cst_14 = arith.constant dense<0.000000e+00> : vector<4x8x32xf32>
    %43 = vector.multi_reduction <add>, %42, %cst_14 [2] : vector<4x8x8x32xf32> to vector<4x8x32xf32>
    %44 = arith.addf %29, %43 : vector<4x8x32xf32>
    %45 = vector.shape_cast %44 : vector<4x8x32xf32> to vector<32x32xf32>
    %46 = vector.broadcast %2 : vector<32x1xf32> to vector<32x32xf32>
    %47 = arith.mulf %45, %46 : vector<32x32xf32>
    %48 = arith.truncf %47 : vector<32x32xf32> to vector<32x32xbf16>
    %cst_15 = arith.constant dense<0.000000e+00> : vector<32x32xf32>
    %49 = tpu.matmul %48, %17, %cst_15 {dimension_numbers = #tpu.dot_dimension_numbers<[1], [0], [0], [1], [0, 0, 1, 1], [], []>} : vector<32x32xbf16>, vector<32x32xbf16>, vector<32x32xf32> -> vector<32x32xf32>
    %50 = vector.broadcast %3 : vector<32x1xf32> to vector<32x32xf32>
    %51 = vector.broadcast %23 : vector<1x32xf32> to vector<32x32xf32>
    %52 = arith.mulf %50, %51 : vector<32x32xf32>
    %53 = arith.addf %49, %52 : vector<32x32xf32>
    %cst_16 = arith.constant 0.000000e+00 : f32
    %54 = vector.broadcast %cst_16 : f32 to vector<32x32xf32>
    %55 = arith.maximumf %53, %54 : vector<32x32xf32>
    %56 = vector.shape_cast %13 : vector<32x32xf32> to vector<4x8x32xf32>
    %57 = arith.truncf %4 : vector<4x8x8xf32> to vector<4x8x8xbf16>
    %58 = arith.truncf %56 : vector<4x8x32xf32> to vector<4x8x32xbf16>
    "tpu.trace_start"() <{level = 10 : i32, message = "gij,gjf->gif"}> : () -> ()
    %cst_17 = arith.constant dense<0.000000e+00> : vector<4x8x32xf32>
    %59 = tpu.matmul %57, %58, %cst_17 {dimension_numbers = #tpu.dot_dimension_numbers<[2], [1], [1], [2], [0, 0, 0, 1, 1, 2], [0], [0]>} : vector<4x8x8xbf16>, vector<4x8x32xbf16>, vector<4x8x32xf32> -> vector<4x8x32xf32>
    "tpu.trace_stop"() : () -> ()
    %60 = vector.shape_cast %59 : vector<4x8x32xf32> to vector<32x32xf32>
    %61 = vector.broadcast %2 : vector<32x1xf32> to vector<32x32xf32>
    %62 = arith.mulf %60, %61 : vector<32x32xf32>
    %63 = tpu.concatenate %62, %55 in 1 : vector<32x32xf32>, vector<32x32xf32> -> vector<32x64xf32>
    %64 = arith.truncf %63 : vector<32x64xf32> to vector<32x64xbf16>
    %cst_18 = arith.constant dense<0.000000e+00> : vector<32x32xf32>
    %65 = tpu.matmul %64, %18, %cst_18 {dimension_numbers = #tpu.dot_dimension_numbers<[1], [0], [0], [1], [0, 0, 1, 1], [], []>} : vector<32x64xbf16>, vector<64x32xbf16>, vector<32x32xf32> -> vector<32x32xf32>
    %cst_19 = arith.constant 0.000000e+00 : f32
    %66 = vector.broadcast %cst_19 : f32 to vector<32x32xf32>
    %67 = arith.maximumf %65, %66 : vector<32x32xf32>
    %68 = arith.truncf %67 : vector<32x32xf32> to vector<32x32xbf16>
    %cst_20 = arith.constant dense<0.000000e+00> : vector<32x32xf32>
    %69 = tpu.matmul %68, %19, %cst_20 {dimension_numbers = #tpu.dot_dimension_numbers<[1], [0], [0], [1], [0, 0, 1, 1], [], []>} : vector<32x32xbf16>, vector<32x32xbf16>, vector<32x32xf32> -> vector<32x32xf32>
    %70 = arith.addf %27, %69 : vector<32x32xf32>
    %cst_21 = arith.constant 0.000000e+00 : f32
    %71 = vector.broadcast %cst_21 : f32 to vector<32x32xf32>
    %72 = arith.maximumf %70, %71 : vector<32x32xf32>
    %73 = arith.addf %72, %13 : vector<32x32xf32>
    %c1 = arith.constant 1 : index
    %c0_22 = arith.constant 0 : index
    %c0_23 = arith.constant 0 : index
    %74 = vector.load %arg4[%c1, %c0_22, %c0_23] : memref<3x112x64xbf16, #tpu.memory_space<vmem>>, vector<1x112x64xbf16>
    %75 = vector.shape_cast %74 : vector<1x112x64xbf16> to vector<112x64xbf16>
    %76 = vector.extract_strided_slice %75 {offsets = [0, 0], sizes = [32, 64], strides = [1, 1]} : vector<112x64xbf16> to vector<32x64xbf16>
    %77 = vector.extract_strided_slice %75 {offsets = [32, 32], sizes = [32, 32], strides = [1, 1]} : vector<112x64xbf16> to vector<32x32xbf16>
    %78 = vector.extract_strided_slice %75 {offsets = [32, 0], sizes = [64, 32], strides = [1, 1]} : vector<112x64xbf16> to vector<64x32xbf16>
    %79 = vector.extract_strided_slice %75 {offsets = [64, 32], sizes = [32, 32], strides = [1, 1]} : vector<112x64xbf16> to vector<32x32xbf16>
    %80 = vector.extract_strided_slice %75 {offsets = [96, 0], sizes = [1, 32], strides = [1, 1]} : vector<112x64xbf16> to vector<1x32xbf16>
    %81 = arith.extf %80 : vector<1x32xbf16> to vector<1x32xf32>
    %82 = vector.extract_strided_slice %75 {offsets = [96, 32], sizes = [1, 32], strides = [1, 1]} : vector<112x64xbf16> to vector<1x32xbf16>
    %83 = arith.extf %82 : vector<1x32xbf16> to vector<1x32xf32>
    %84 = arith.truncf %73 : vector<32x32xf32> to vector<32x32xbf16>
    %cst_24 = arith.constant dense<0.000000e+00> : vector<32x64xf32>
    %85 = tpu.matmul %84, %76, %cst_24 {dimension_numbers = #tpu.dot_dimension_numbers<[1], [0], [0], [1], [0, 0, 1, 1], [], []>} : vector<32x32xbf16>, vector<32x64xbf16>, vector<32x64xf32> -> vector<32x64xf32>
    %86 = vector.extract_strided_slice %85 {offsets = [0, 0], sizes = [32, 32], strides = [1, 1]} : vector<32x64xf32> to vector<32x32xf32>
    %87 = vector.extract_strided_slice %85 {offsets = [0, 32], sizes = [32, 32], strides = [1, 1]} : vector<32x64xf32> to vector<32x32xf32>
    %88 = vector.shape_cast %86 : vector<32x32xf32> to vector<4x8x32xf32>
    %cst_25 = arith.constant 0.000000e+00 : f32
    %89 = vector.broadcast %cst_25 : f32 to vector<4x8x32xf32>
    %90 = vector.shape_cast %4 : vector<4x8x8xf32> to vector<4x8x8x1xf32>
    %91 = vector.shape_cast %81 : vector<1x32xf32> to vector<1x1x1x32xf32>
    %92 = vector.broadcast %90 : vector<4x8x8x1xf32> to vector<4x8x8x32xf32>
    %93 = vector.broadcast %91 : vector<1x1x1x32xf32> to vector<4x8x8x32xf32>
    %94 = arith.mulf %92, %93 : vector<4x8x8x32xf32>
    %95 = vector.shape_cast %8 : vector<4x8x8xf32> to vector<4x8x8x1xf32>
    %96 = vector.shape_cast %88 : vector<4x8x32xf32> to vector<4x1x8x32xf32>
    %97 = vector.broadcast %95 : vector<4x8x8x1xf32> to vector<4x8x8x32xf32>
    %98 = vector.broadcast %96 : vector<4x1x8x32xf32> to vector<4x8x8x32xf32>
    %99 = arith.mulf %97, %98 : vector<4x8x8x32xf32>
    %100 = arith.addf %94, %99 : vector<4x8x8x32xf32>
    %cst_26 = arith.constant 0.000000e+00 : f32
    %101 = vector.broadcast %cst_26 : f32 to vector<4x8x8x32xf32>
    %102 = arith.maximumf %100, %101 : vector<4x8x8x32xf32>
    %cst_27 = arith.constant dense<0.000000e+00> : vector<4x8x32xf32>
    %103 = vector.multi_reduction <add>, %102, %cst_27 [2] : vector<4x8x8x32xf32> to vector<4x8x32xf32>
    %104 = arith.addf %89, %103 : vector<4x8x32xf32>
    %105 = vector.shape_cast %104 : vector<4x8x32xf32> to vector<32x32xf32>
    %106 = vector.broadcast %2 : vector<32x1xf32> to vector<32x32xf32>
    %107 = arith.mulf %105, %106 : vector<32x32xf32>
    %108 = arith.truncf %107 : vector<32x32xf32> to vector<32x32xbf16>
    %cst_28 = arith.constant dense<0.000000e+00> : vector<32x32xf32>
    %109 = tpu.matmul %108, %77, %cst_28 {dimension_numbers = #tpu.dot_dimension_numbers<[1], [0], [0], [1], [0, 0, 1, 1], [], []>} : vector<32x32xbf16>, vector<32x32xbf16>, vector<32x32xf32> -> vector<32x32xf32>
    %110 = vector.broadcast %3 : vector<32x1xf32> to vector<32x32xf32>
    %111 = vector.broadcast %83 : vector<1x32xf32> to vector<32x32xf32>
    %112 = arith.mulf %110, %111 : vector<32x32xf32>
    %113 = arith.addf %109, %112 : vector<32x32xf32>
    %cst_29 = arith.constant 0.000000e+00 : f32
    %114 = vector.broadcast %cst_29 : f32 to vector<32x32xf32>
    %115 = arith.maximumf %113, %114 : vector<32x32xf32>
    %116 = vector.shape_cast %73 : vector<32x32xf32> to vector<4x8x32xf32>
    %117 = arith.truncf %4 : vector<4x8x8xf32> to vector<4x8x8xbf16>
    %118 = arith.truncf %116 : vector<4x8x32xf32> to vector<4x8x32xbf16>
    "tpu.trace_start"() <{level = 10 : i32, message = "gij,gjf->gif"}> : () -> ()
    %cst_30 = arith.constant dense<0.000000e+00> : vector<4x8x32xf32>
    %119 = tpu.matmul %117, %118, %cst_30 {dimension_numbers = #tpu.dot_dimension_numbers<[2], [1], [1], [2], [0, 0, 0, 1, 1, 2], [0], [0]>} : vector<4x8x8xbf16>, vector<4x8x32xbf16>, vector<4x8x32xf32> -> vector<4x8x32xf32>
    "tpu.trace_stop"() : () -> ()
    %120 = vector.shape_cast %119 : vector<4x8x32xf32> to vector<32x32xf32>
    %121 = vector.broadcast %2 : vector<32x1xf32> to vector<32x32xf32>
    %122 = arith.mulf %120, %121 : vector<32x32xf32>
    %123 = tpu.concatenate %122, %115 in 1 : vector<32x32xf32>, vector<32x32xf32> -> vector<32x64xf32>
    %124 = arith.truncf %123 : vector<32x64xf32> to vector<32x64xbf16>
    %cst_31 = arith.constant dense<0.000000e+00> : vector<32x32xf32>
    %125 = tpu.matmul %124, %78, %cst_31 {dimension_numbers = #tpu.dot_dimension_numbers<[1], [0], [0], [1], [0, 0, 1, 1], [], []>} : vector<32x64xbf16>, vector<64x32xbf16>, vector<32x32xf32> -> vector<32x32xf32>
    %cst_32 = arith.constant 0.000000e+00 : f32
    %126 = vector.broadcast %cst_32 : f32 to vector<32x32xf32>
    %127 = arith.maximumf %125, %126 : vector<32x32xf32>
    %128 = arith.truncf %127 : vector<32x32xf32> to vector<32x32xbf16>
    %cst_33 = arith.constant dense<0.000000e+00> : vector<32x32xf32>
    %129 = tpu.matmul %128, %79, %cst_33 {dimension_numbers = #tpu.dot_dimension_numbers<[1], [0], [0], [1], [0, 0, 1, 1], [], []>} : vector<32x32xbf16>, vector<32x32xbf16>, vector<32x32xf32> -> vector<32x32xf32>
    %130 = arith.addf %87, %129 : vector<32x32xf32>
    %cst_34 = arith.constant 0.000000e+00 : f32
    %131 = vector.broadcast %cst_34 : f32 to vector<32x32xf32>
    %132 = arith.maximumf %130, %131 : vector<32x32xf32>
    %133 = arith.addf %132, %73 : vector<32x32xf32>
    %c2 = arith.constant 2 : index
    %c0_35 = arith.constant 0 : index
    %c0_36 = arith.constant 0 : index
    %134 = vector.load %arg4[%c2, %c0_35, %c0_36] : memref<3x112x64xbf16, #tpu.memory_space<vmem>>, vector<1x112x64xbf16>
    %135 = vector.shape_cast %134 : vector<1x112x64xbf16> to vector<112x64xbf16>
    %136 = vector.extract_strided_slice %135 {offsets = [0, 0], sizes = [32, 64], strides = [1, 1]} : vector<112x64xbf16> to vector<32x64xbf16>
    %137 = vector.extract_strided_slice %135 {offsets = [32, 32], sizes = [32, 32], strides = [1, 1]} : vector<112x64xbf16> to vector<32x32xbf16>
    %138 = vector.extract_strided_slice %135 {offsets = [32, 0], sizes = [64, 32], strides = [1, 1]} : vector<112x64xbf16> to vector<64x32xbf16>
    %139 = vector.extract_strided_slice %135 {offsets = [64, 32], sizes = [32, 32], strides = [1, 1]} : vector<112x64xbf16> to vector<32x32xbf16>
    %140 = vector.extract_strided_slice %135 {offsets = [96, 0], sizes = [1, 32], strides = [1, 1]} : vector<112x64xbf16> to vector<1x32xbf16>
    %141 = arith.extf %140 : vector<1x32xbf16> to vector<1x32xf32>
    %142 = vector.extract_strided_slice %135 {offsets = [96, 32], sizes = [1, 32], strides = [1, 1]} : vector<112x64xbf16> to vector<1x32xbf16>
    %143 = arith.extf %142 : vector<1x32xbf16> to vector<1x32xf32>
    %144 = arith.truncf %133 : vector<32x32xf32> to vector<32x32xbf16>
    %cst_37 = arith.constant dense<0.000000e+00> : vector<32x64xf32>
    %145 = tpu.matmul %144, %136, %cst_37 {dimension_numbers = #tpu.dot_dimension_numbers<[1], [0], [0], [1], [0, 0, 1, 1], [], []>} : vector<32x32xbf16>, vector<32x64xbf16>, vector<32x64xf32> -> vector<32x64xf32>
    %146 = vector.extract_strided_slice %145 {offsets = [0, 0], sizes = [32, 32], strides = [1, 1]} : vector<32x64xf32> to vector<32x32xf32>
    %147 = vector.extract_strided_slice %145 {offsets = [0, 32], sizes = [32, 32], strides = [1, 1]} : vector<32x64xf32> to vector<32x32xf32>
    %148 = vector.shape_cast %146 : vector<32x32xf32> to vector<4x8x32xf32>
    %cst_38 = arith.constant 0.000000e+00 : f32
    %149 = vector.broadcast %cst_38 : f32 to vector<4x8x32xf32>
    %150 = vector.shape_cast %4 : vector<4x8x8xf32> to vector<4x8x8x1xf32>
    %151 = vector.shape_cast %141 : vector<1x32xf32> to vector<1x1x1x32xf32>
    %152 = vector.broadcast %150 : vector<4x8x8x1xf32> to vector<4x8x8x32xf32>
    %153 = vector.broadcast %151 : vector<1x1x1x32xf32> to vector<4x8x8x32xf32>
    %154 = arith.mulf %152, %153 : vector<4x8x8x32xf32>
    %155 = vector.shape_cast %8 : vector<4x8x8xf32> to vector<4x8x8x1xf32>
    %156 = vector.shape_cast %148 : vector<4x8x32xf32> to vector<4x1x8x32xf32>
    %157 = vector.broadcast %155 : vector<4x8x8x1xf32> to vector<4x8x8x32xf32>
    %158 = vector.broadcast %156 : vector<4x1x8x32xf32> to vector<4x8x8x32xf32>
    %159 = arith.mulf %157, %158 : vector<4x8x8x32xf32>
    %160 = arith.addf %154, %159 : vector<4x8x8x32xf32>
    %cst_39 = arith.constant 0.000000e+00 : f32
    %161 = vector.broadcast %cst_39 : f32 to vector<4x8x8x32xf32>
    %162 = arith.maximumf %160, %161 : vector<4x8x8x32xf32>
    %cst_40 = arith.constant dense<0.000000e+00> : vector<4x8x32xf32>
    %163 = vector.multi_reduction <add>, %162, %cst_40 [2] : vector<4x8x8x32xf32> to vector<4x8x32xf32>
    %164 = arith.addf %149, %163 : vector<4x8x32xf32>
    %165 = vector.shape_cast %164 : vector<4x8x32xf32> to vector<32x32xf32>
    %166 = vector.broadcast %2 : vector<32x1xf32> to vector<32x32xf32>
    %167 = arith.mulf %165, %166 : vector<32x32xf32>
    %168 = arith.truncf %167 : vector<32x32xf32> to vector<32x32xbf16>
    %cst_41 = arith.constant dense<0.000000e+00> : vector<32x32xf32>
    %169 = tpu.matmul %168, %137, %cst_41 {dimension_numbers = #tpu.dot_dimension_numbers<[1], [0], [0], [1], [0, 0, 1, 1], [], []>} : vector<32x32xbf16>, vector<32x32xbf16>, vector<32x32xf32> -> vector<32x32xf32>
    %170 = vector.broadcast %3 : vector<32x1xf32> to vector<32x32xf32>
    %171 = vector.broadcast %143 : vector<1x32xf32> to vector<32x32xf32>
    %172 = arith.mulf %170, %171 : vector<32x32xf32>
    %173 = arith.addf %169, %172 : vector<32x32xf32>
    %cst_42 = arith.constant 0.000000e+00 : f32
    %174 = vector.broadcast %cst_42 : f32 to vector<32x32xf32>
    %175 = arith.maximumf %173, %174 : vector<32x32xf32>
    %176 = vector.shape_cast %133 : vector<32x32xf32> to vector<4x8x32xf32>
    %177 = arith.truncf %4 : vector<4x8x8xf32> to vector<4x8x8xbf16>
    %178 = arith.truncf %176 : vector<4x8x32xf32> to vector<4x8x32xbf16>
    "tpu.trace_start"() <{level = 10 : i32, message = "gij,gjf->gif"}> : () -> ()
    %cst_43 = arith.constant dense<0.000000e+00> : vector<4x8x32xf32>
    %179 = tpu.matmul %177, %178, %cst_43 {dimension_numbers = #tpu.dot_dimension_numbers<[2], [1], [1], [2], [0, 0, 0, 1, 1, 2], [0], [0]>} : vector<4x8x8xbf16>, vector<4x8x32xbf16>, vector<4x8x32xf32> -> vector<4x8x32xf32>
    "tpu.trace_stop"() : () -> ()
    %180 = vector.shape_cast %179 : vector<4x8x32xf32> to vector<32x32xf32>
    %181 = vector.broadcast %2 : vector<32x1xf32> to vector<32x32xf32>
    %182 = arith.mulf %180, %181 : vector<32x32xf32>
    %183 = tpu.concatenate %182, %175 in 1 : vector<32x32xf32>, vector<32x32xf32> -> vector<32x64xf32>
    %184 = arith.truncf %183 : vector<32x64xf32> to vector<32x64xbf16>
    %cst_44 = arith.constant dense<0.000000e+00> : vector<32x32xf32>
    %185 = tpu.matmul %184, %138, %cst_44 {dimension_numbers = #tpu.dot_dimension_numbers<[1], [0], [0], [1], [0, 0, 1, 1], [], []>} : vector<32x64xbf16>, vector<64x32xbf16>, vector<32x32xf32> -> vector<32x32xf32>
    %cst_45 = arith.constant 0.000000e+00 : f32
    %186 = vector.broadcast %cst_45 : f32 to vector<32x32xf32>
    %187 = arith.maximumf %185, %186 : vector<32x32xf32>
    %188 = arith.truncf %187 : vector<32x32xf32> to vector<32x32xbf16>
    %cst_46 = arith.constant dense<0.000000e+00> : vector<32x32xf32>
    %189 = tpu.matmul %188, %139, %cst_46 {dimension_numbers = #tpu.dot_dimension_numbers<[1], [0], [0], [1], [0, 0, 1, 1], [], []>} : vector<32x32xbf16>, vector<32x32xbf16>, vector<32x32xf32> -> vector<32x32xf32>
    %190 = arith.addf %147, %189 : vector<32x32xf32>
    %cst_47 = arith.constant 0.000000e+00 : f32
    %191 = vector.broadcast %cst_47 : f32 to vector<32x32xf32>
    %192 = arith.maximumf %190, %191 : vector<32x32xf32>
    %193 = arith.addf %192, %133 : vector<32x32xf32>
    %194 = arith.truncf %193 : vector<32x32xf32> to vector<32x32xbf16>
    %c0_48 = arith.constant 0 : index
    %c0_49 = arith.constant 0 : index
    %195 = vector.load %arg5[%c0_48, %c0_49] : memref<32x32xbf16, #tpu.memory_space<vmem>>, vector<32x32xbf16>
    %cst_50 = arith.constant dense<0.000000e+00> : vector<32x32xf32>
    %196 = tpu.matmul %194, %195, %cst_50 {dimension_numbers = #tpu.dot_dimension_numbers<[1], [0], [0], [1], [0, 0, 1, 1], [], []>} : vector<32x32xbf16>, vector<32x32xbf16>, vector<32x32xf32> -> vector<32x32xf32>
    %197 = vector.shape_cast %196 : vector<32x32xf32> to vector<4x8x32xf32>
    %cst_51 = arith.constant dense<0.000000e+00> : vector<4x32xf32>
    %198 = vector.multi_reduction <add>, %197, %cst_51 [1] : vector<4x8x32xf32> to vector<4x32xf32>
    %cst_52 = arith.constant 1.250000e-01 : f32
    %199 = vector.broadcast %cst_52 : f32 to vector<4x32xf32>
    %200 = arith.mulf %198, %199 : vector<4x32xf32>
    %c0_53 = arith.constant 0 : index
    %c0_54 = arith.constant 0 : index
    %201 = vector.load %arg6[%c0_53, %c0_54] : memref<32x12xbf16, #tpu.memory_space<vmem>>, vector<32x12xbf16>
    %cst_55 = arith.constant 0.000000e+00 : f32
    %202 = vector.broadcast %cst_55 : f32 to vector<32x32xf32>
    %203 = arith.maximumf %193, %202 : vector<32x32xf32>
    %204 = arith.truncf %203 : vector<32x32xf32> to vector<32x32xbf16>
    %205 = vector.extract_strided_slice %201 {offsets = [0, 0], sizes = [32, 8], strides = [1, 1]} : vector<32x12xbf16> to vector<32x8xbf16>
    %cst_56 = arith.constant dense<0.000000e+00> : vector<32x8xf32>
    %206 = tpu.matmul %204, %205, %cst_56 {dimension_numbers = #tpu.dot_dimension_numbers<[1], [0], [0], [1], [0, 0, 1, 1], [], []>} : vector<32x32xbf16>, vector<32x8xbf16>, vector<32x8xf32> -> vector<32x8xf32>
    %cst_57 = arith.constant 0.000000e+00 : f32
    %207 = vector.broadcast %cst_57 : f32 to vector<4x32xf32>
    %208 = arith.maximumf %200, %207 : vector<4x32xf32>
    %209 = arith.truncf %208 : vector<4x32xf32> to vector<4x32xbf16>
    %210 = vector.extract_strided_slice %201 {offsets = [0, 8], sizes = [32, 4], strides = [1, 1]} : vector<32x12xbf16> to vector<32x4xbf16>
    %cst_58 = arith.constant dense<0.000000e+00> : vector<4x4xf32>
    %211 = tpu.matmul %209, %210, %cst_58 {dimension_numbers = #tpu.dot_dimension_numbers<[1], [0], [0], [1], [0, 0, 1, 1], [], []>} : vector<4x32xbf16>, vector<32x4xbf16>, vector<4x4xf32> -> vector<4x4xf32>
    %c0_59 = arith.constant 0 : index
    %c0_60 = arith.constant 0 : index
    %212 = vector.load %arg7[%c0_59, %c0_60] : memref<1x4xf32, #tpu.memory_space<vmem>>, vector<1x4xf32>
    %213 = vector.broadcast %212 : vector<1x4xf32> to vector<4x4xf32>
    %214 = arith.addf %211, %213 : vector<4x4xf32>
    %215 = vector.extract_strided_slice %206 {offsets = [0, 0], sizes = [32, 4], strides = [1, 1]} : vector<32x8xf32> to vector<32x4xf32>
    %216 = vector.shape_cast %215 : vector<32x4xf32> to vector<4x8x4xf32>
    %217 = vector.extract_strided_slice %206 {offsets = [0, 4], sizes = [32, 4], strides = [1, 1]} : vector<32x8xf32> to vector<32x4xf32>
    %218 = vector.shape_cast %217 : vector<32x4xf32> to vector<4x8x4xf32>
    %219 = vector.shape_cast %216 : vector<4x8x4xf32> to vector<4x8x1x4xf32>
    %220 = vector.shape_cast %218 : vector<4x8x4xf32> to vector<4x1x8x4xf32>
    %221 = vector.broadcast %219 : vector<4x8x1x4xf32> to vector<4x8x8x4xf32>
    %222 = vector.broadcast %220 : vector<4x1x8x4xf32> to vector<4x8x8x4xf32>
    %223 = arith.addf %221, %222 : vector<4x8x8x4xf32>
    %224 = vector.shape_cast %214 : vector<4x4xf32> to vector<4x1x1x4xf32>
    %225 = vector.broadcast %224 : vector<4x1x1x4xf32> to vector<4x8x8x4xf32>
    %226 = arith.addf %223, %225 : vector<4x8x8x4xf32>
    %c0_61 = arith.constant 0 : index
    %c0_62 = arith.constant 0 : index
    %c0_63 = arith.constant 0 : index
    %c0_64 = arith.constant 0 : index
    %227 = vector.load %arg8[%c0_61, %c0_62, %c0_63, %c0_64] : memref<4x8x8x4xf32, #tpu.memory_space<vmem>>, vector<4x8x8x4xf32>
    tpu.vector_store %arg8[%c0_61, %c0_62, %c0_63, %c0_64], %226 {strides = array<i32>} : memref<4x8x8x4xf32, #tpu.memory_space<vmem>>, vector<4x8x8x4xf32>,
    return
  }
  func.func @transform_0(%arg0: i32) -> (i32, i32) {
    %c0_i32 = arith.constant 0 : i32
    %c0_i32_0 = arith.constant 0 : i32
    return %arg0, %c0_i32 : i32, i32
  }
  func.func @transform_1(%arg0: i32) -> (i32, i32, i32) {
    %c0_i32 = arith.constant 0 : i32
    %c0_i32_0 = arith.constant 0 : i32
    %c0_i32_1 = arith.constant 0 : i32
    return %arg0, %c0_i32, %c0_i32_0 : i32, i32, i32
  }
  func.func @transform_2(%arg0: i32) -> (i32, i32) {
    %c0_i32 = arith.constant 0 : i32
    %c0_i32_0 = arith.constant 0 : i32
    %c0_i32_1 = arith.constant 0 : i32
    return %c0_i32, %c0_i32_0 : i32, i32
  }
  func.func @transform_3(%arg0: i32) -> (i32, i32, i32) {
    %c0_i32 = arith.constant 0 : i32
    %c0_i32_0 = arith.constant 0 : i32
    %c0_i32_1 = arith.constant 0 : i32
    %c0_i32_2 = arith.constant 0 : i32
    return %c0_i32, %c0_i32_0, %c0_i32_1 : i32, i32, i32
  }
  func.func @transform_4(%arg0: i32) -> (i32, i32) {
    %c0_i32 = arith.constant 0 : i32
    %c0_i32_0 = arith.constant 0 : i32
    %c0_i32_1 = arith.constant 0 : i32
    return %c0_i32, %c0_i32_0 : i32, i32
  }
  func.func @transform_5(%arg0: i32) -> (i32, i32) {
    %c0_i32 = arith.constant 0 : i32
    %c0_i32_0 = arith.constant 0 : i32
    %c0_i32_1 = arith.constant 0 : i32
    return %c0_i32, %c0_i32_0 : i32, i32
  }
  func.func @transform_6(%arg0: i32) -> (i32, i32) {
    %c0_i32 = arith.constant 0 : i32
    %c0_i32_0 = arith.constant 0 : i32
    %c0_i32_1 = arith.constant 0 : i32
    return %c0_i32, %c0_i32_0 : i32, i32
  }
  func.func @transform_7(%arg0: i32) -> (i32, i32, i32, i32) {
    %c0_i32 = arith.constant 0 : i32
    %c0_i32_0 = arith.constant 0 : i32
    %c0_i32_1 = arith.constant 0 : i32
    %c0_i32_2 = arith.constant 0 : i32
    return %arg0, %c0_i32, %c0_i32_0, %c0_i32_1 : i32, i32, i32, i32
  }
}

</mosaic_0001>

<bundles_post_ra>
// kernel: mpnn_forward.1
= control target key start
LH: loop header
LB: loop body
LE: loop exit
PB: predicated region body
PF: predicated region fallthrough
CT: control target
= control target key end

     0   :  { %s4529_s24 = smov 0   ;;  %s6567_s0 = inlined_call_operand.vmem [shape: f32[64,9], index: 0, kind: input, shape index: {}]   ;;  %s6568_s1 = inlined_call_operand.vmem [shape: f32[8,8,8], index: 1, kind: input, shape index: {}]   ;;  %s6569_s2 = inlined_call_operand.vmem [shape: bf16[7,32], index: 2, kind: input, shape index: {}]   ;;  %s6570_s3 = inlined_call_operand.vmem [shape: bf16[3,112,64], index: 3, kind: input, shape index: {}]   ;;  %s6571_s4 = inlined_call_operand.vmem [shape: bf16[32,32], index: 4, kind: input, shape index: {}]   ;;  %s6572_s5 = inlined_call_operand.vmem [shape: bf16[32,12], index: 5, kind: input, shape index: {}]   ;;  %s6573_s6 = inlined_call_operand.vmem [shape: f32[1,4], index: 6, kind: input, shape index: {}]   ;;  %s6574_s7 = inlined_call_operand.vmem [shape: f32[8,8,8,4], index: 7, kind: output, shape index: {}]  }
   0x1 LB: > { %s4131_s25 = sadd.s32 4294967295, %s4479_s24   ;;  %p4135_p0 = scmp.ge.s32.totalorder %s4479_s24, 1  ;;  %s4479_s24 = sphi %s4529_s24, %s17_s24  }
   0x2   : > { %p249_p1 = scmp.lt.s32.totalorder %s4479_s24, 3 }
   0x4   : > { %p250_p2 = pnand %p4135_p0, %p249_p1 }
   0x6   : > { %253 = sbr.rel (%p250_p2) target bundleno = 3441 (0xd71), region = 48 }
   0xb   : > { %v422_v0 = vlaneseq  ;;  %vm337_vm0 = vcmask 1042432   ;;  %vm338_vm1 = vcmask 1043456   ;;  %s4136_s26 = sshll.u32 %s4131_s25, 2  ;;  %v4481_v1 = vmov 7   ;;  %v329_v2 = vld [vmem:[%s6569_s2] sm:$0xf] }
   0xc   : > { %4397 = vset.pattern.permute.xlu0 %v4481_v1  ;;  %p288_p3 = scmp.lt.s32.totalorder %s4136_s26, 7  ;;  %v4482_v4 = vmov 65535   ;;  %vm330_vm2 = vcmask 56320   ;;  %v4483_v14 = vmov 0.0   ;;  %vm1612_vm7 = vcmask 64512   ;;  %s4484_s19 = smov 96  }
   0xd   : > { %v4541_v3 = vshrl.u32 %v422_v0, 7  ;;  %v339_v5 = vsel %vm337_vm0, 4294967295, %v4482_v4  ;;  %vm395_vm8 = vcmask 261120   ;;  %vm1479_vm9 = vcmask 1041409   ;;  %s4486_s25 = smov 32   ;;  %s4487_s17 = smov 120  }
   0xe   : > { %v340_v6 = vsel %vm338_vm1, %v339_v5, 0  ;;  %s7193_s26 = smov (!%p288_p3, %s4136_s26), 7  ;;  %vm1482_vm10 = vcmask 1042434   ;;  %vm1485_vm11 = vcmask 1043459   ;;  %vm1488_vm12 = vcmask 1044484   ;;  %s4488_s18 = smov 124  }
   0xf   : > { %4351 = vset.pattern.permute.xlu2 %v4541_v3  ;;  %4345 = vset.pattern.permute.xlu1 %v4541_v3  ;;  %v342_v7 = vand.u32 %v340_v6, %v329_v2  ;;  %s4137_s29 = sshll.u32 %s7193_s26, 3  ;;  %vm1491_vm13 = vcmask 1045509   ;;  %vm1494_vm14 = vcmask 1046534   ;;  %vm1497_vm15 = vcmask 1047559   ;;  %s4306_s21 = sshll.u32 %s7193_s26, 6 }
  0x10   : > { %s291_s9 = scalar_lea.vmem %s6567_s0, %s4137_s29  ;;  %s4555_s12 = scalar_lea.vmem %s6568_s1, %s4137_s29  ;;  %vm1729_vm0 = vcmask 523264  }
  0x11   : > { %351 = vmatpush.bf16.msra.mxu0 %v342_v7  ;;  %v4557_v8 = vld [vmem:[%s291_s9] sm:$0xff]  ;;  %v4563_v10 = vld [vmem:[%s4555_s12 + $0x8] sm:$0xff]  ;;  %v4587_v25 = vld [vmem:[%s291_s9 + $0x10] sm:$0xff]  ;;  %s6475_s23 = scalar_lea.vmem %s6574_s7, %s4306_s21 }
  0x12   : > { %v4560_v9 = vld [vmem:[%s4555_s12] sm:$0xff]  ;;  %1256 = vperm.xlu0 %4397, %v4557_v8   ;;  %v4566_v11 = vld [vmem:[%s291_s9 + $0x8] sm:$0xff]  ;;  %v491_v12 = vperm.slane %v4563_v10, 2  ;;  %vm316_vm4 = vcmp.ne.f32.partialorder %v4563_v10, 0.0  ;;  %v4589_v26 = vld [vmem:[%s291_s9 + $0x18] sm:$0xff]  ;;  %v477_v28 = vperm.slane %v4563_v10, 0 }
  0x13   : > { %vm315_vm3 = vcmp.ne.f32.partialorder %v4560_v9, 0.0  ;;  %v327_v13 = vpack.c.bf16 %v4566_v11, %v4557_v8  ;;  %v4577_v16 = vsel %vm316_vm4, 1.0, %v4483_v14  ;;  %v435_v23 = vperm.slane %v4560_v9, 2  ;;  %v4614_v52 = vld [vmem:[%s4555_s12 + $0x10] sm:$0xff]  ;;  %v4617_v53 = vld [vmem:[%s4555_s12 + $0x18] sm:$0xff] }
  0x14   : > { %v4574_v15 = vsel %vm315_vm3, 1.0, %v4483_v14  ;;  %v741_v18 = vperm.slane %v4577_v16, 1  ;;  %v748_v21 = vperm.slane %v4577_v16, 2  ;;  %v428_v24 = vperm.slane %v4560_v9, 1 }
  0x15   : > { %v685_v17 = vperm.slane %v4574_v15, 1  ;;  %4147 = vmatmul.msk.bf16.vlgmr.msra.gmra.mxu0 %vm330_vm2, %v327_v13  ;;  %v692_v20 = vperm.slane %v4574_v15, 2  ;;  %v328_v27 = vpack.c.bf16 %v4589_v26, %v4587_v25  ;;  %v442_v29 = vperm.slane %v4560_v9, 3 }
  0x16   : > { %v484_v30 = vperm.slane %v4563_v10, 1  ;;  %v734_v31 = vperm.slane %v4577_v16, 0  ;;  %v755_v32 = vperm.slane %v4577_v16, 3  ;;  %v678_v33 = vperm.slane %v4574_v15, 0 }
  0x17   : > { %496 = vperm.xlu2 %4351, %v491_v12   ;;  %v4346_v19 = vpack.i.bf16 %v741_v18, %v685_v17  ;;  %v4352_v22 = vpack.i.bf16 %v748_v21, %v692_v20  ;;  %v699_v34 = vperm.slane %v4574_v15, 3  ;;  %v421_v37 = vperm.slane %v4560_v9, 0 }
  0x18   : > { %v4362_v35 = vpack.i.bf16 %v755_v32, %v734_v31  ;;  %v706_v38 = vperm.slane %v4574_v15, 4  ;;  %v762_v39 = vperm.slane %v4577_v16, 4  ;;  %v505_v41 = vperm.slane %v4563_v10, 4 }
  0x19   : > { %4347 = vperm.xlu1 %4345, %v4346_v19   ;;  %v4357_v36 = vpack.i.bf16 %v699_v34, %v678_v33  ;;  %v498_v42 = vperm.slane %v4563_v10, 3  ;;  %v713_v43 = vperm.slane %v4574_v15, 5  ;;  %v769_v44 = vperm.slane %v4577_v16, 5  ;;  %v4307_v33 = vld [vmem:[%s6570_s3] sm:$0xff] }
  0x1a   : > { %4398 = vset.pattern.permute.xlu0 %v4541_v3  ;;  %v4367_v40 = vpack.i.bf16 %v762_v39, %v706_v38  ;;  %v512_v46 = vperm.slane %v4563_v10, 5  ;;  %v449_v47 = vperm.slane %v4560_v9, 4  ;;  %v720_v48 = vperm.slane %v4574_v15, 6 }
  0x1b   : > { %v4372_v45 = vpack.i.bf16 %v769_v44, %v713_v43  ;;  %v776_v49 = vperm.slane %v4577_v16, 6  ;;  %v519_v51 = vperm.slane %v4563_v10, 6  ;;  %v456_v54 = vperm.slane %v4560_v9, 5 }
  0x1c   : > { %v727_v55 = vperm.slane %v4574_v15, 7  ;;  %v783_v56 = vperm.slane %v4577_v16, 7  ;;  %vm317_vm5 = vcmp.ne.f32.partialorder %v4614_v52, 0.0  ;;  %vm318_vm6 = vcmp.ne.f32.partialorder %v4617_v53, 0.0 }
  0x1d   : > { %v4377_v50 = vpack.i.bf16 %v776_v49, %v720_v48  ;;  %v4625_v58 = vsel %vm317_vm5, 1.0, %v4483_v14  ;;  %v4628_v59 = vsel %vm318_vm6, 1.0, %v4483_v14  ;;  %v526_v60 = vperm.slane %v4563_v10, 7 }
  0x1e   : > { %v4382_v57 = vpack.i.bf16 %v783_v56, %v727_v55  ;;  %v463_v61 = vperm.slane %v4560_v9, 6  ;;  %v797_v62 = vperm.slane %v4625_v58, 1  ;;  %v853_v63 = vperm.slane %v4628_v59, 1 }
  0x1f   : > { %4353 = vperm.xlu2 %4351, %v4352_v22   ;;  %v596_v2 = vperm.slane %v4617_v53, 1  ;;  %v470_v4 = vperm.slane %v4560_v9, 7  ;;  %v804_v5 = vperm.slane %v4625_v58, 2  ;;  %v860_v6 = vperm.slane %v4628_v59, 2 }
  0x20   : > { %v4387_v0 = vpack.i.bf16 %v853_v63, %v797_v62  ;;  %v603_v12 = vperm.slane %v4617_v53, 2  ;;  %v540_v13 = vperm.slane %v4614_v52, 1  ;;  %v533_v14 = vperm.slane %v4614_v52, 0 }
  0x21   : > { %440 = vperm.xlu1 %4345, %v435_v23   ;;  %v4392_v7 = vpack.i.bf16 %v860_v6, %v804_v5  ;;  %v547_v15 = vperm.slane %v4614_v52, 2  ;;  %v589_v16 = vperm.slane %v4617_v53, 0  ;;  %v610_v17 = vperm.slane %v4617_v53, 3 }
  0x22   : > { %433 = vperm.xlu0 %4398, %v428_v24   ;;  %v846_v18 = vperm.slane %v4628_v59, 0  ;;  %v867_v19 = vperm.slane %v4628_v59, 3  ;;  %v818_v21 = vperm.slane %v4625_v58, 4  ;;  %v874_v22 = vperm.slane %v4628_v59, 4 }
  0x23   : > { %v554_v23 = vperm.slane %v4614_v52, 3  ;;  %v825_v31 = vperm.slane %v4625_v58, 5  ;;  %v881_v32 = vperm.slane %v4628_v59, 5  ;;  %v832_v38 = vperm.slane %v4625_v58, 6 }
  0x24   : > { %v4406_v20 = vpack.i.bf16 %v867_v19, %v846_v18  ;;  %v4411_v24 = vpack.i.bf16 %v874_v22, %v818_v21  ;;  %v888_v39 = vperm.slane %v4628_v59, 6  ;;  %v631_v44 = vperm.slane %v4617_v53, 6  ;;  %v4310_v22 = vld [vmem:[%s6570_s3 + $0x18] sm:$0xff] }
  0x25   : > { %4148 = vmatmul.msk.bf16.gmra.mxu0 %vm330_vm2, %v328_v27  ;;  %v4308_v27 = vld [vmem:[%s6570_s3 + $0x8] sm:$0xff]  ;;  %v568_v48 = vperm.slane %v4614_v52, 5  ;;  %v4734_v18 = vpack.c.bf16 %v4614_v52, %v4614_v52 }
  0x26   : > { %408 = vmatpush.bf16.msra.mxu1 %v4308_v27 }
  0x27   : > { %482 = vperm.xlu2 %4351, %v477_v28   ;;  %6799 = vst [vmem:[#allocation15_spill] sm:$0xff] %v4734_v18 }
  0x29   : > { %447 = vperm.xlu1 %4345, %v442_v29   ;;  %v811_v29 = vperm.slane %v4625_v58, 3 }
  0x2a   : > { %489 = vperm.xlu0 %4398, %v484_v30   ;;  %v617_v30 = vperm.slane %v4617_v53, 4  ;;  %409 = vmatpush.bf16.msra.mxu1 %v4307_v33 }
  0x2f   : > { %4363 = vperm.xlu2 %4351, %v4362_v35   ;;  %v4416_v35 = vpack.i.bf16 %v881_v32, %v825_v31  ;;  %v4766_v31 = vpack.c.bf16 %v4617_v53, %v4617_v53 }
  0x31   : > { %4358 = vperm.xlu1 %4345, %v4357_v36   ;;  %6804 = vst [vmem:[#allocation20_spill] sm:$0xff] %v4766_v31 }
  0x32   : > { %426 = vperm.xlu0 %4398, %v421_v37   ;;  %v624_v37 = vperm.slane %v4617_v53, 5 }
  0x37   : > { %4368 = vperm.xlu2 %4351, %v4367_v40   ;;  %v561_v40 = vperm.slane %v4614_v52, 4 }
  0x39   : > { %510 = vperm.xlu1 %4345, %v505_v41   ;;  %v4421_v41 = vpack.i.bf16 %v888_v39, %v832_v38 }
  0x3a   : > { %503 = vperm.xlu0 %4398, %v498_v42  }
  0x3f   : > { %4373 = vperm.xlu2 %4351, %v4372_v45   ;;  %v839_v45 = vperm.slane %v4625_v58, 7 }
  0x41   : > { %517 = vperm.xlu1 %4345, %v512_v46   ;;  %v895_v46 = vperm.slane %v4628_v59, 7  ;;  %v575_v59 = vperm.slane %v4614_v52, 6 }
  0x42   : > { %454 = vperm.xlu0 %4398, %v449_v47  }
  0x43   : > { %v4426_v49 = vpack.i.bf16 %v895_v46, %v839_v45 }
  0x47   : > { %4378 = vperm.xlu2 %4351, %v4377_v50  }
  0x49   : > { %524 = vperm.xlu1 %4345, %v519_v51  }
  0x4a   : > { %461 = vperm.xlu0 %4398, %v456_v54   ;;  %v638_v54 = vperm.slane %v4617_v53, 7  ;;  %v4485_v53 = vmov 8  }
  0x4f   : > { %4383 = vperm.xlu2 %4351, %v4382_v57  }
  0x51   : > { %531 = vperm.xlu1 %4345, %v526_v60  }
  0x52   : > { %468 = vperm.xlu0 %4398, %v463_v61   ;;  %v4696_v61 = vpack.c.bf16 %v4560_v9, %v4560_v9 }
  0x54   : > { %6792 = vst [vmem:[#allocation8_spill] sm:$0xff] %v4696_v61 }
  0x57   : > { %4388 = vperm.xlu2 %4351, %v4387_v0  }
  0x59   : > { %601 = vperm.xlu1 %4345, %v596_v2  }
  0x5a   : > { %475 = vperm.xlu0 %4398, %v470_v4   ;;  %v582_v4 = vperm.slane %v4614_v52, 7 }
  0x5f   : > { %4393 = vperm.xlu2 %4351, %v4392_v7  }
  0x61   : > { %608 = vperm.xlu1 %4345, %v603_v12  }
  0x62   : > { %545 = vperm.xlu0 %4398, %v540_v13  }
  0x67   : > { %538 = vperm.xlu2 %4351, %v533_v14  }
  0x69   : > { %4399 = vset.pattern.permute.xlu1 %v4481_v1 }
  0x6a   : > { %1261 = vperm.xlu1 %4399, %v4566_v11   ;;  %552 = vperm.xlu0 %4398, %v547_v15  }
  0x6f   : > { %594 = vperm.xlu2 %4351, %v589_v16  }
  0x71   : > { %v4655_v28 = vpop.permute.xlu2 %496 }
  0x72   : > { %4400 = vset.pattern.permute.xlu1 %v4541_v3  ;;  %615 = vperm.xlu0 %4398, %v610_v17   ;;  %6786 = vst [vmem:[#allocation2_spill] sm:$0xff] %v4655_v28  ;;  %v790_v3 = vperm.slane %v4625_v58, 0  ;;  %v4730_v17 = vpack.c.bf16 %v4563_v10, %v4563_v10 }
  0x74   : > { %v4401_v34 = vpack.i.bf16 %v811_v29, %v790_v3  ;;  %6798 = vst [vmem:[#allocation14_spill] sm:$0xff] %v4730_v17  ;;  %v4309_v29 = vld [vmem:[%s6570_s3 + $0x10] sm:$0xff] }
  0x77   : > { %4407 = vperm.xlu2 %4351, %v4406_v20  }
  0x79   : > { %v4665_v36 = vpop.permute.xlu2 %4353 }
  0x7a   : > { %559 = vperm.xlu1 %4400, %v554_v23   ;;  %4412 = vperm.xlu0 %4398, %v4411_v24  }
  0x7f   : > { %622 = vperm.xlu2 %4351, %v617_v30  }
  0x81   : > { %v4678_v47 = vpop.permute.xlu2 %482 }
  0x82   : > { %4402 = vperm.xlu1 %4400, %v4401_v34   ;;  %4417 = vperm.xlu0 %4398, %v4416_v35   ;;  %6788 = vst [vmem:[#allocation4_spill] sm:$0xff] %v4678_v47 }
  0x84   : > { %v4673_v43 = vpop.permute.xlu0 %1256 }
  0x85   : > { %6787 = vst [vmem:[#allocation3_spill] sm:$0xff] %v4673_v43 }
  0x87   : > { %629 = vperm.xlu2 %4351, %v624_v37  }
  0x89   : > { %v4688_v57 = vpop.permute.xlu2 %4363 }
  0x8a   : > { %566 = vperm.xlu1 %4400, %v561_v40   ;;  %4422 = vperm.xlu0 %4398, %v4421_v41  }
  0x8b   : > { %v4671_v42 = vpop.permute.xlu1 %4347 }
  0x8f   : > { %636 = vperm.xlu2 %4351, %v631_v44  }
  0x91   : > { %v4714_v6 = vpop.permute.xlu2 %4368 }
  0x92   : > { %573 = vperm.xlu1 %4400, %v568_v48   ;;  %v353_v50 = vpop.f32.mrf.mxu0  ;;  %4427 = vperm.xlu0 %4398, %v4426_v49  }
  0x93   : > { %v4681_v51 = vpop.permute.xlu1 %440  ;;  %v4684_v55 = vmax.f32 %v353_v50, 0.0 }
  0x94   : > { %6789 = vst [vmem:[#allocation5_spill] sm:$0xff] %v4681_v51  ;;  %v4686_v56 = vpop.permute.xlu0 %433 }
  0x95   : > { %6790 = vst [vmem:[#allocation6_spill] sm:$0xff] %v4684_v55  ;;  %v1608_v58 = vpack.c.bf16 %v4684_v55, %v4684_v55 }
  0x96   : > { %6791 = vst [vmem:[#allocation7_spill] sm:$0xff] %v4686_v56 }
  0x97   : > { %643 = vperm.xlu2 %4351, %v638_v54   ;;  %v1617_v60 = vsel %vm338_vm1, %v1608_v58, 0 }
  0x98   : > { %1626 = vmatpush.bf16.msra.mxu3 %v1617_v60 }
  0x99   : > { %v4736_v19 = vpop.permute.xlu2 %4373 }
  0x9a   : > { %580 = vperm.xlu1 %4400, %v575_v59   ;;  %v355_v62 = vpop.f32.mrf.mxu0  ;;  %4432 = vset.pattern.permute.xlu0 %v4481_v1 }
  0x9b   : > { %v4698_v63 = vpop.permute.xlu1 %447  ;;  %v4701_v0 = vmax.f32 %v355_v62, 0.0  ;;  %4169 = vmatmul.msk.bf16.vlgmr.msra.gmra.mxu3 %vm1612_vm7, %v4696_v61  ;;  %1271 = vperm.xlu0 %4432, %v4589_v26   ;;  %v379_v62 = vld [vmem:[%s6570_s3 + $0x30] sm:$0xf] }
  0x9c   : > { %6793 = vst [vmem:[#allocation9_spill] sm:$0xff] %v4698_v63  ;;  %v4706_v2 = vpop.permute.xlu0 %489 }
  0x9d   : > { %6794 = vst [vmem:[#allocation10_spill] sm:$0xff] %v4701_v0  ;;  %v381_v9 = vpack.c.bf16 %v4701_v0, %v4684_v55  ;;  %v1609_v5 = vpack.c.bf16 %v4701_v0, %v4701_v0  ;;  %v4926_v0 = vrot.slane %v4673_v43, 1 }
  0x9e   : > { %6795 = vst [vmem:[#allocation11_spill] sm:$0xff] %v4706_v2 }
  0x9f   : > { %4431 = vset.pattern.permute.xlu2 %v4481_v1  ;;  %4157 = vmatmul.msk.bf16.vlgmr.msra.gmra.mxu1 %vm395_vm8, %v381_v9  ;;  %v1636_v7 = vsel %vm338_vm1, %v1609_v5, 0  ;;  %v380_v5 = vunpack.c.l.bf16 %v379_v62  ;;  %v4856_v62 = vunpack.i.h.bf16 %v4714_v6  ;;  %6845 = vst [vmem:[#allocation61_spill] sm:$0xff] %v4926_v0  ;;  %v4948_v0 = vrot.slane %v4673_v43, 7 }
  0xa0   : > { %1266 = vperm.xlu2 %4431, %v4587_v25   ;;  %1645 = vmatpush.bf16.msrb.mxu3 %v1636_v7 }
  0xa1   : > { %v4379_v30 = vpop.permute.xlu2 %4378  ;;  %v4821_v7 = vperm.slane %v380_v5, 0  ;;  %6831 = vst [vmem:[#allocation47_spill] sm:$0xff] %v4856_v62  ;;  %v4859_v5 = vunpack.i.l.bf16 %v4714_v6 }
  0xa2   : > { %587 = vperm.xlu1 %4400, %v582_v4   ;;  %v358_v12 = vpop.f32.mrf.mxu0  ;;  %6851 = vst [vmem:[#allocation67_spill] sm:$0xff] %v4948_v0 }
  0xa3   : > { %v4719_v13 = vpop.permute.xlu1 %4358  ;;  %v4721_v14 = vmax.f32 %v358_v12, 0.0  ;;  %4435 = vset.pattern.permute.xlu0 %v4485_v53  ;;  %6832 = vst [vmem:[#allocation48_spill] sm:$0xff] %v4859_v5  ;;  %v4881_v6 = vmul.f32 %v4821_v7, %v4706_v2 }
  0xa4   : > { %v4725_v16 = vpop.permute.xlu0 %426  ;;  %1407 = vperm.xlu0 %4435, %v4589_v26  }
  0xa5   : > { %6796 = vst [vmem:[#allocation12_spill] sm:$0xff] %v4721_v14  ;;  %v1610_v15 = vpack.c.bf16 %v4721_v14, %v4721_v14 }
  0xa6   : > { %6797 = vst [vmem:[#allocation13_spill] sm:$0xff] %v4725_v16 }
  0xa7   : > { %v1655_v1 = vsel %vm338_vm1, %v1610_v15, 0  ;;  %v4827_v15 = vmul.f32 %v4821_v7, %v4655_v28  ;;  %v4877_v28 = vmul.f32 %v4821_v7, %v4698_v63 }
  0xa8   : > { %1664 = vmatpush.bf16.msrb.mxu0 %v1655_v1  ;;  %4433 = vset.pattern.permute.xlu2 %v4485_v53  ;;  %v4830_v1 = vunpack.i.h.bf16 %v4665_v36 }
  0xa9   : > { %v4384_v34 = vpop.permute.xlu2 %4383  ;;  %1395 = vperm.xlu2 %4433, %v4557_v8  }
  0xaa   : > { %v360_v20 = vpop.f32.mrf.mxu0  ;;  %1555 = vrot.lane.b32.xlu1 %v4310_v22, %s4484_s19  ;;  %6823 = vst [vmem:[#allocation39_spill] sm:$0xff] %v4830_v1  ;;  %v4837_v22 = vmul.f32 %v4821_v7, %v4678_v47  ;;  %v4870_v47 = vunpack.i.h.bf16 %v4736_v19  ;;  %v4897_v63 = vunpack.i.h.bf16 %v4384_v34  ;;  %v4899_v61 = vunpack.i.l.bf16 %v4384_v34 }
  0xab   : > { %v4738_v21 = vpop.permute.xlu1 %510  ;;  %v4743_v23 = vmax.f32 %v360_v20, 0.0  ;;  %4170 = vmatmul.msk.bf16.vlgmr.msrb.gmra.mxu3 %vm1612_vm7, %v4730_v17  ;;  %4171 = vmatmul.msk.bf16.vlgmr.msrb.gmra.mxu0 %vm1612_vm7, %v4734_v18  ;;  %v4833_v20 = vunpack.i.l.bf16 %v4665_v36  ;;  %v4853_v36 = vunpack.i.l.bf16 %v4671_v42  ;;  %v4885_v18 = vunpack.i.l.bf16 %v4379_v30 }
  0xac   : > { %6800 = vst [vmem:[#allocation16_spill] sm:$0xff] %v4738_v21  ;;  %v4756_v27 = vpop.permute.xlu0 %503  ;;  %4434 = vset.pattern.permute.xlu1 %v4485_v53  ;;  %v4891_v17 = vunpack.i.l.bf16 %v4719_v13  ;;  %v4903_v2 = vmul.f32 %v4821_v7, %v4738_v21 }
  0xad   : > { %6801 = vst [vmem:[#allocation17_spill] sm:$0xff] %v4743_v23  ;;  %v1611_v10 = vpack.c.bf16 %v4743_v23, %v4743_v23  ;;  %v382_v52 = vpack.c.bf16 %v4743_v23, %v4721_v14 }
  0xae   : > { %6802 = vst [vmem:[#allocation18_spill] sm:$0xff] %v4756_v27 }
  0xaf   : > { %v1674_v24 = vsel %vm338_vm1, %v1611_v10, 0  ;;  %4158 = vmatmul.msk.bf16.gmra.mxu1 %vm395_vm8, %v382_v52  ;;  %6824 = vst [vmem:[#allocation40_spill] sm:$0xff] %v4833_v20  ;;  %v4840_v10 = vunpack.i.h.bf16 %v4688_v57  ;;  %v4843_v52 = vunpack.i.l.bf16 %v4688_v57  ;;  %v4863_v57 = vmul.f32 %v4821_v7, %v4681_v51 }
  0xb0   : > { %1683 = vmatpush.bf16.msra.mxu3 %v1674_v24  ;;  %v4846_v24 = vunpack.i.h.bf16 %v4671_v42  ;;  %6830 = vst [vmem:[#allocation46_spill] sm:$0xff] %v4853_v36  ;;  %v4873_v42 = vunpack.i.l.bf16 %v4736_v19  ;;  %v4883_v51 = vunpack.i.h.bf16 %v4379_v30  ;;  %v4895_v19 = vmul.f32 %v4821_v7, %v4725_v16 }
  0xb1   : > { %v4389_v38 = vpop.permute.xlu2 %4388  ;;  %1403 = vperm.xlu2 %4433, %v4587_v25   ;;  %6825 = vst [vmem:[#allocation41_spill] sm:$0xff] %v4840_v10  ;;  %v4907_v30 = vmul.f32 %v4821_v7, %v4756_v27  ;;  %v4929_v27 = vrot.slane %v4673_v43, 2 }
  0xb2   : > { %1553 = vrot.lane.b32.xlu1 %v4309_v29, %s4484_s19  ;;  %6826 = vst [vmem:[#allocation42_spill] sm:$0xff] %v4843_v52  ;;  %v4909_v23 = vunpack.i.h.bf16 %v4389_v38 }
  0xb3   : > { %v4758_v3 = vpop.permute.xlu1 %517  ;;  %6827 = vst [vmem:[#allocation43_spill] sm:$0xff] %v4846_v24 }
  0xb4   : > { %6803 = vst [vmem:[#allocation19_spill] sm:$0xff] %v4758_v3  ;;  %v4768_v32 = vpop.permute.xlu0 %454  ;;  %v4915_v16 = vmul.f32 %v4821_v7, %v4758_v3  ;;  %v4935_v3 = vrot.slane %v4673_v43, 4 }
  0xb5   : > { %6805 = vst [vmem:[#allocation21_spill] sm:$0xff] %v4768_v32  ;;  %v4919_v34 = vmul.f32 %v4821_v7, %v4768_v32 }
  0xb6   : > { %6833 = vst [vmem:[#allocation49_spill] sm:$0xff] %v4870_v47 }
  0xb7   : > { %6834 = vst [vmem:[#allocation50_spill] sm:$0xff] %v4873_v42 }
  0xb8   : > { %6835 = vst [vmem:[#allocation51_spill] sm:$0xff] %v4883_v51 }
  0xb9   : > { %v4394_v41 = vpop.permute.xlu2 %4393  ;;  %6836 = vst [vmem:[#allocation52_spill] sm:$0xff] %v4885_v18 }
  0xba   : > { %1399 = vperm.xlu1 %4434, %v4566_v11   ;;  %6838 = vst [vmem:[#allocation54_spill] sm:$0xff] %v4891_v17  ;;  %v4921_v14 = vunpack.i.h.bf16 %v4394_v41  ;;  %v4923_v21 = vunpack.i.l.bf16 %v4394_v41  ;;  %v4942_v41 = vrot.slane %v4673_v43, 5 }
  0xbb   : > { %v4770_v33 = vpop.permute.xlu1 %524  ;;  %4172 = vmatmul.msk.bf16.vlgmr.msra.gmra.mxu3 %vm1612_vm7, %v4766_v31  ;;  %v4867_v31 = vmul.f32 %v4821_v7, %v4686_v56  ;;  %v4888_v56 = vunpack.i.h.bf16 %v4719_v13  ;;  %6839 = vst [vmem:[#allocation55_spill] sm:$0xff] %v4897_v63  ;;  %v4911_v13 = vunpack.i.l.bf16 %v4389_v38  ;;  %v4932_v38 = vrot.slane %v4673_v43, 3 }
  0xbc   : > { %6806 = vst [vmem:[#allocation22_spill] sm:$0xff] %v4770_v33  ;;  %v4774_v35 = vpop.permute.xlu0 %461  ;;  %v4939_v32 = vmul.f32 %v4821_v7, %v4770_v33 }
  0xbd   : > { %6807 = vst [vmem:[#allocation23_spill] sm:$0xff] %v4774_v35 }
  0xbe   : > { %6837 = vst [vmem:[#allocation53_spill] sm:$0xff] %v4888_v56 }
  0xbf   : > { %6840 = vst [vmem:[#allocation56_spill] sm:$0xff] %v4899_v61 }
  0xc0   : > { %6841 = vst [vmem:[#allocation57_spill] sm:$0xff] %v4909_v23 }
  0xc1   : > { %v4789_v46 = vpop.permute.xlu2 %538  ;;  %6842 = vst [vmem:[#allocation58_spill] sm:$0xff] %v4911_v13 }
  0xc2   : > { %6813 = vst [vmem:[#allocation29_spill] sm:$0xff] %v4789_v46 }
  0xc3   : > { %v4776_v37 = vpop.permute.xlu1 %531  ;;  %6843 = vst [vmem:[#allocation59_spill] sm:$0xff] %v4921_v14  ;;  %v4945_v14 = vrot.slane %v4673_v43, 6 }
  0xc4   : > { %6808 = vst [vmem:[#allocation24_spill] sm:$0xff] %v4776_v37  ;;  %v4778_v39 = vpop.permute.xlu0 %468  ;;  %v4958_v33 = vmul.f32 %v4821_v7, %v4776_v37 }
  0xc5   : > { %6809 = vst [vmem:[#allocation25_spill] sm:$0xff] %v4778_v39 }
  0xc6   : > { %6844 = vst [vmem:[#allocation60_spill] sm:$0xff] %v4923_v21 }
  0xc7   : > { %6846 = vst [vmem:[#allocation62_spill] sm:$0xff] %v4929_v27 }
  0xc8   : > { %6847 = vst [vmem:[#allocation63_spill] sm:$0xff] %v4932_v38  ;;  %v651_v38 = vmul.f32 %v4821_v7, %v4774_v35 }
  0xc9   : > { %v4796_v50 = vpop.permute.xlu2 %594  ;;  %6848 = vst [vmem:[#allocation64_spill] sm:$0xff] %v4935_v3  ;;  %v4954_v3 = vmul.f32 %v4821_v7, %v4789_v46 }
  0xca   : > { %6815 = vst [vmem:[#allocation31_spill] sm:$0xff] %v4796_v50 }
  0xcb   : > { %v4780_v40 = vpop.permute.xlu1 %601  ;;  %6849 = vst [vmem:[#allocation65_spill] sm:$0xff] %v4942_v41  ;;  %v4962_v41 = vmul.f32 %v4821_v7, %v4778_v39 }
  0xcc   : > { %6810 = vst [vmem:[#allocation26_spill] sm:$0xff] %v4780_v40  ;;  %v4784_v44 = vpop.permute.xlu0 %475  ;;  %v4970_v0 = vmul.f32 %v4821_v7, %v4780_v40 }
  0xcd   : > { %6811 = vst [vmem:[#allocation27_spill] sm:$0xff] %v4784_v44  ;;  %v4974_v46 = vmul.f32 %v4821_v7, %v4784_v44 }
  0xce   : > { %6850 = vst [vmem:[#allocation66_spill] sm:$0xff] %v4945_v14  ;;  %v4966_v14 = vmul.f32 %v4821_v7, %v4796_v50 }
  0xcf   : > { %6853 = vst [vmem:[#allocation69_spill] sm:$0xff] %v4970_v0 }
  0xd0   : > { %6852 = vst [vmem:[#allocation68_spill] sm:$0xff] %v4966_v14 }
  0xd1   : > { %v4802_v54 = vpop.permute.xlu2 %4407 }
  0xd2   : > { %v4977_v35 = vunpack.i.h.bf16 %v4802_v54  ;;  %v4984_v39 = vunpack.i.l.bf16 %v4802_v54 }
  0xd3   : > { %v4786_v45 = vpop.permute.xlu1 %608 }
  0xd4   : > { %6812 = vst [vmem:[#allocation28_spill] sm:$0xff] %v4786_v45  ;;  %v4794_v49 = vpop.permute.xlu0 %545  ;;  %v4988_v50 = vmul.f32 %v4821_v7, %v4786_v45 }
  0xd5   : > { %6814 = vst [vmem:[#allocation30_spill] sm:$0xff] %v4794_v49  ;;  %v4992_v40 = vmul.f32 %v4821_v7, %v4794_v49 }
  0xd6   : > { %6854 = vst [vmem:[#allocation70_spill] sm:$0xff] %v4977_v35 }
  0xd7   : > { %6857 = vst [vmem:[#allocation73_spill] sm:$0xff] %v4984_v39 }
  0xd8   : > { %6858 = vst [vmem:[#allocation74_spill] sm:$0xff] %v4988_v50 }
  0xd9   : > { %v4808_v26 = vpop.permute.xlu2 %622 }
  0xda   : > { %6819 = vst [vmem:[#allocation35_spill] sm:$0xff] %v4808_v26  ;;  %v4996_v44 = vmul.f32 %v4821_v7, %v4808_v26 }
  0xdc   : > { %v4792_v48 = vpop.permute.xlu1 %1261  ;;  %v4800_v11 = vpop.permute.xlu0 %552  ;;  %6859 = vst [vmem:[#allocation75_spill] sm:$0xff] %v4996_v44 }
  0xdd   : > { %6817 = vst [vmem:[#allocation33_spill] sm:$0xff] %v4800_v11  ;;  %v5000_v43 = vmul.f32 %v4821_v7, %v4800_v11  ;;  %v5067_v50 = vrot.slane %v4792_v48, 3 }
  0xdf   : > { %6876 = vst [vmem:[#allocation92_spill] sm:$0xff] %v5067_v50 }
  0xe1   : > { %v4817_v9 = vpop.permute.xlu2 %629 }
  0xe2   : > { %6821 = vst [vmem:[#allocation37_spill] sm:$0xff] %v4817_v9  ;;  %v5004_v54 = vmul.f32 %v4821_v7, %v4817_v9 }
  0xe4   : > { %v4806_v59 = vpop.permute.xlu0 %615  ;;  %6860 = vst [vmem:[#allocation76_spill] sm:$0xff] %v5004_v54 }
  0xe5   : > { %6818 = vst [vmem:[#allocation34_spill] sm:$0xff] %v4806_v59  ;;  %v5008_v45 = vmul.f32 %v4821_v7, %v4806_v59 }
  0xe7   : > { %6861 = vst [vmem:[#allocation77_spill] sm:$0xff] %v5008_v45  ;;  %v5051_v45 = vrot.slane %v4792_v48, 1 }
  0xe9   : > { %v4848_v29 = vpop.permute.xlu2 %636  ;;  %6873 = vst [vmem:[#allocation89_spill] sm:$0xff] %v5051_v45  ;;  %v5070_v45 = vrot.slane %v4792_v48, 4 }
  0xea   : > { %6828 = vst [vmem:[#allocation44_spill] sm:$0xff] %v4848_v29  ;;  %v5012_v49 = vmul.f32 %v4821_v7, %v4848_v29 }
  0xeb   : > { %6877 = vst [vmem:[#allocation93_spill] sm:$0xff] %v5070_v45 }
  0xec   : > { %v4798_v8 = vpop.permute.xlu1 %559  ;;  %v4812_v25 = vpop.permute.xlu0 %4412  ;;  %6862 = vst [vmem:[#allocation78_spill] sm:$0xff] %v5012_v49 }
  0xed   : > { %6816 = vst [vmem:[#allocation32_spill] sm:$0xff] %v4798_v8  ;;  %v5016_v26 = vmul.f32 %v4821_v7, %v4798_v8  ;;  %v5019_v44 = vunpack.i.h.bf16 %v4812_v25  ;;  %v5022_v11 = vunpack.i.l.bf16 %v4812_v25 }
  0xef   : > { %6863 = vst [vmem:[#allocation79_spill] sm:$0xff] %v5019_v44 }
  0xf0   : > { %6864 = vst [vmem:[#allocation80_spill] sm:$0xff] %v5022_v11 }
  0xf1   : > { %v4979_v37 = vpop.permute.xlu2 %643 }
  0xf2   : > { %6855 = vst [vmem:[#allocation71_spill] sm:$0xff] %v4979_v37  ;;  %v5026_v9 = vmul.f32 %v4821_v7, %v4979_v37 }
  0xf4   : > { %v4804_v58 = vpop.permute.xlu1 %4402  ;;  %v4823_v12 = vpop.permute.xlu0 %4417  ;;  %6865 = vst [vmem:[#allocation81_spill] sm:$0xff] %v5026_v9 }
  0xf5   : > { %v5029_v59 = vunpack.i.h.bf16 %v4804_v58  ;;  %v5032_v29 = vunpack.i.l.bf16 %v4804_v58  ;;  %v5035_v49 = vunpack.i.h.bf16 %v4823_v12  ;;  %v5038_v8 = vunpack.i.l.bf16 %v4823_v12 }
  0xf7   : > { %6866 = vst [vmem:[#allocation82_spill] sm:$0xff] %v5029_v59 }
  0xf8   : > { %6867 = vst [vmem:[#allocation83_spill] sm:$0xff] %v5032_v29 }
  0xf9   : > { %6868 = vst [vmem:[#allocation84_spill] sm:$0xff] %v5035_v49 }
  0xfa   : > { %6869 = vst [vmem:[#allocation85_spill] sm:$0xff] %v5038_v8 }
  0xfc   : > { %v4810_v60 = vpop.permute.xlu1 %566  ;;  %v4423_v55 = vpop.permute.xlu0 %4422 }
  0xfd   : > { %6820 = vst [vmem:[#allocation36_spill] sm:$0xff] %v4810_v60  ;;  %v5042_v25 = vmul.f32 %v4821_v7, %v4810_v60  ;;  %v5044_v54 = vunpack.i.h.bf16 %v4423_v55  ;;  %v5046_v37 = vunpack.i.l.bf16 %v4423_v55  ;;  %v5064_v55 = vrot.slane %v4792_v48, 2 }
  0xff   : > { %6870 = vst [vmem:[#allocation86_spill] sm:$0xff] %v5044_v54 }
 0x100   : > { %6871 = vst [vmem:[#allocation87_spill] sm:$0xff] %v5046_v37 }
 0x101   : > { %6875 = vst [vmem:[#allocation91_spill] sm:$0xff] %v5064_v55 }
 0x104   : > { %v4819_v4 = vpop.permute.xlu1 %573 }
 0x105   : > { %6822 = vst [vmem:[#allocation38_spill] sm:$0xff] %v4819_v4 }
 0x10c   : > { %v4850_v53 = vpop.permute.xlu1 %580 }
 0x10d   : > { %6829 = vst [vmem:[#allocation45_spill] sm:$0xff] %v4850_v53 }
 0x114   : > { %v4981_v27 = vpop.permute.xlu1 %587 }
 0x115   : > { %6856 = vst [vmem:[#allocation72_spill] sm:$0xff] %v4981_v27 }
 0x11c   : > { %v5048_v9 = vpop.f32.mrf.mxu1  ;;  %v1556_v0 = vpop.permute.xlu1 %1555 }
 0x11d   : > { %6872 = vst [vmem:[#allocation88_spill] sm:$0xff] %v5048_v9  ;;  %v902_v58 = vmul.f32 %v4891_v17, %v5048_v9  ;;  %v903_v12 = vmul.f32 %v4853_v36, %v5048_v9  ;;  %v904_v49 = vmul.f32 %v4833_v20, %v5048_v9  ;;  %v905_v60 = vmul.f32 %v4888_v56, %v5048_v9  ;;  %v4428_v36 = vpop.permute.xlu0 %4427 }
 0x11e   : > { %v5061_v54 = vpop.f32.mrf.mxu3  ;;  %v5073_v17 = vrot.slane %v4792_v48, 5  ;;  %v906_v20 = vmul.f32 %v4859_v5, %v5048_v9  ;;  %v907_v56 = vmul.f32 %v4873_v42, %v5048_v9  ;;  %v908_v50 = vmul.f32 %v4885_v18, %v5048_v9  ;;  %1587 = vmatpush.bf16.msra.mxu2 %v1556_v0 }
 0x11f   : > { %6874 = vst [vmem:[#allocation90_spill] sm:$0xff] %v5061_v54  ;;  %v934_v54 = vadd.f32 %v902_v58, %v4895_v19  ;;  %v935_v55 = vadd.f32 %v903_v12, %v4867_v31  ;;  %v936_v45 = vadd.f32 %v904_v49, %v4863_v57  ;;  %v937_v14 = vadd.f32 %v905_v60, %v4877_v28 }
 0x120   : > { %6878 = vst [vmem:[#allocation94_spill] sm:$0xff] %v5073_v17  ;;  %v5086_v17 = vrot.slane %v4792_v48, 6  ;;  %v5090_v5 = vmul.f32 %v4821_v7, %v4819_v4  ;;  %v5093_v31 = vrot.slane %v4792_v48, 7  ;;  %v5095_v58 = vunpack.i.h.bf16 %v4428_v36 }
 0x121   : > { %v966_v42 = vmax.f32 %v934_v54, 0.0  ;;  %v967_v19 = vmax.f32 %v935_v55, 0.0  ;;  %v5097_v12 = vunpack.i.l.bf16 %v4428_v36  ;;  %v5101_v28 = vmul.f32 %v4821_v7, %v4850_v53 }
 0x122   : > { %6879 = vst [vmem:[#allocation95_spill] sm:$0xff] %v5086_v17  ;;  %v909_v0 = vmul.f32 %v4899_v61, %v5048_v9  ;;  %v5107_v49 = vmul.f32 %v4821_v7, %v4981_v27  ;;  %v5110_v60 = vadd.f32 %v906_v20, %v4919_v34  ;;  %v5113_v54 = vadd.f32 %v907_v56, %v651_v38 }
 0x123   : > { %6880 = vst [vmem:[#allocation96_spill] sm:$0xff] %v5093_v31  ;;  %v1005_v57 = vsel %vm395_vm8, %v967_v19, 0.0  ;;  %v968_v36 = vmax.f32 %v936_v45, 0.0  ;;  %v969_v55 = vmax.f32 %v937_v14, 0.0  ;;  %v998_v4 = vsel %vm395_vm8, %v966_v42, 0.0 }
 0x124   : > { %6881 = vst [vmem:[#allocation97_spill] sm:$0xff] %v5095_v58  ;;  %v5116_v53 = vpop.f32.mrf.mxu1  ;;  %v5119_v18 = vadd.f32 %v908_v50, %v4962_v41  ;;  %v1006_v14 = vrot.slane %v1005_v57, 4  ;;  %v5134_v38 = vadd.f32 %v909_v0, %v4974_v46 }
 0x125   : > { %6882 = vst [vmem:[#allocation98_spill] sm:$0xff] %v5097_v12  ;;  %v910_v27 = vmul.f32 %v4843_v52, %v5116_v53  ;;  %v911_v20 = vmul.f32 %v4846_v24, %v5116_v53  ;;  %v912_v34 = vmul.f32 %v4830_v1, %v5116_v53  ;;  %v913_v56 = vmul.f32 %v4840_v10, %v5116_v53  ;;  %v1554_v24 = vpop.permute.xlu1 %1553 }
 0x126   : > { %6883 = vst [vmem:[#allocation99_spill] sm:$0xff] %v5116_v53  ;;  %v914_v45 = vmul.f32 %v4856_v62, %v5116_v53  ;;  %v915_v50 = vmul.f32 %v4870_v47, %v5116_v53  ;;  %v1630_v42 = vpop.f32.mrf.mxu3  ;;  %v916_v41 = vmul.f32 %v4883_v51, %v5116_v53  ;;  %v999_v52 = vrot.slane %v998_v4, 4  ;;  %1588 = vmatpush.bf16.msra.mxu2 %v1554_v24 }
 0x127   : > { %v942_v19 = vadd.f32 %v910_v27, %v4837_v22  ;;  %v943_v1 = vadd.f32 %v911_v20, %v4881_v6  ;;  %v944_v10 = vadd.f32 %v912_v34, %v4827_v15  ;;  %v1012_v62 = vsel %vm395_vm8, %v968_v36, 0.0 }
 0x128   : > { %v5143_v61 = vadd.f32 %v913_v56, %v4907_v30  ;;  %v5145_v42 = vpop.f32.mrf.mxu0  ;;  %v917_v46 = vmul.f32 %v4897_v63, %v5116_v53  ;;  %v5150_v0 = vadd.f32 %v914_v45, %v4903_v2  ;;  %v5153_v15 = vadd.f32 %v915_v50, %v4915_v16  ;;  %v6889_v63 = vld [vmem:[#allocation69_spill] sm:$0xff]  ;;  %v6890_v30 = vld [vmem:[#allocation74_spill] sm:$0xff] }
 0x129   : > { %6884 = vst [vmem:[#allocation100_spill] sm:$0xff] %v5145_v42  ;;  %v974_v27 = vmax.f32 %v942_v19, 0.0  ;;  %v975_v22 = vmax.f32 %v943_v1, 0.0  ;;  %v976_v6 = vmax.f32 %v944_v10, 0.0  ;;  %v1007_v34 = vadd.f32 %v1006_v14, %v1005_v57 }
 0x12a   : > { %v1013_v24 = vrot.slane %v1012_v62, 4  ;;  %v5159_v56 = vadd.f32 %v916_v41, %v4939_v32  ;;  %v1019_v2 = vsel %vm395_vm8, %v969_v55, 0.0  ;;  %v5165_v16 = vadd.f32 %v917_v46, %v4958_v33 }
 0x12b   : > { %v1061_v1 = vsel %vm395_vm8, %v975_v22, 0.0  ;;  %v5169_v50 = vsel %vm395_vm8, %v974_v27, 0.0  ;;  %v1000_v14 = vadd.f32 %v999_v52, %v998_v4  ;;  %v5176_v55 = vsel %vm395_vm8, %v976_v6, 0.0 }
 0x12c   : > { %v5171_v19 = vpop.f32.mrf.mxu1  ;;  %v1062_v22 = vrot.slane %v1061_v1, 4  ;;  %v1008_v52 = vrot.slane %v1007_v34, 2  ;;  %v6906_v53 = vmax.f32 %v5143_v61, 0.0 }
 0x12d   : > { %v918_v41 = vmul.f32 %v5032_v29, %v5171_v19  ;;  %v919_v33 = vmul.f32 %v4911_v13, %v5171_v19  ;;  %v920_v46 = vmul.f32 %v4923_v21, %v5171_v19  ;;  %v921_v57 = vmul.f32 %v5029_v59, %v5171_v19 }
 0x12e   : > { %v5184_v27 = vpop.f32.mrf.mxu3  ;;  %v922_v6 = vmul.f32 %v5022_v11, %v5171_v19  ;;  %v1001_v21 = vrot.slane %v1000_v14, 2  ;;  %v1014_v13 = vadd.f32 %v1013_v24, %v1012_v62  ;;  %v5197_v51 = vadd.f32 %v1062_v22, %v1061_v1 }
 0x12f   : > { %6885 = vst [vmem:[#allocation101_spill] sm:$0xff] %v5184_v27  ;;  %v950_v32 = vadd.f32 %v918_v41, %v4954_v3  ;;  %v951_v45 = vadd.f32 %v919_v33, %v4992_v40  ;;  %v952_v10 = vadd.f32 %v920_v46, %v5000_v43  ;;  %v5200_v3 = vadd.f32 %v921_v57, %v5016_v26  ;;  %v6887_v33 = vld [vmem:[#allocation59_spill] sm:$0xff] }
 0x130   : > { %v1668_v20 = vpop.f32.mrf.mxu0  ;;  %v1009_v40 = vadd.f32 %v1008_v52, %v1007_v34  ;;  %v1020_v41 = vrot.slane %v1019_v2, 4  ;;  %v5204_v43 = vmul.f32 %v5038_v8, %v5171_v19  ;;  %v5211_v62 = vadd.f32 %v922_v6, %v5042_v25 }
 0x131   : > { %v982_v59 = vmax.f32 %v950_v32, 0.0  ;;  %v983_v29 = vmax.f32 %v951_v45, 0.0  ;;  %v984_v4 = vmax.f32 %v952_v10, 0.0  ;;  %6886 = vst [vmem:[#allocation102_spill] sm:$0xff] %v5200_v3  ;;  %v5208_v20 = vmul.f32 %v5046_v37, %v5171_v19 }
 0x132   : > { %v1002_v1 = vadd.f32 %v1001_v21, %v1000_v14  ;;  %v1015_v10 = vrot.slane %v1014_v13, 2  ;;  %v1021_v52 = vadd.f32 %v1020_v41, %v1019_v2  ;;  %v6888_v14 = vld [vmem:[#allocation68_spill] sm:$0xff] }
 0x133   : > { %v1117_v24 = vsel %vm395_vm8, %v983_v29, 0.0  ;;  %v5215_v45 = vsel %vm395_vm8, %v982_v59, 0.0  ;;  %v5218_v26 = vsel %vm395_vm8, %v984_v4, 0.0  ;;  %v1010_v4 = vrot.slane %v1009_v40, 1 }
 0x134   : > { %v5220_v34 = vpop.f32.mrf.mxu1  ;;  %v1118_v57 = vrot.slane %v1117_v24, 4  ;;  %v1016_v59 = vadd.f32 %v1015_v10, %v1014_v13  ;;  %v6894_v13 = vld [vmem:[#allocation86_spill] sm:$0xff]  ;;  %v6895_v10 = vld [vmem:[#allocation77_spill] sm:$0xff] }
 0x135   : > { %v926_v32 = vmul.f32 %v4984_v39, %v5220_v34  ;;  %v927_v25 = vmul.f32 %v4909_v23, %v5220_v34  ;;  %v928_v29 = vmul.f32 %v6887_v33, %v5220_v34  ;;  %v929_v22 = vmul.f32 %v4977_v35, %v5220_v34  ;;  %v6891_v35 = vld [vmem:[#allocation84_spill] sm:$0xff] }
 0x136   : > { %v1649_v46 = vpop.f32.mrf.mxu3  ;;  %v930_v21 = vmul.f32 %v5019_v44, %v5220_v34  ;;  %v1003_v33 = vrot.slane %v1002_v1, 1  ;;  %v5238_v37 = vadd.f32 %v1118_v57, %v1117_v24  ;;  %v5242_v2 = vmul.f32 %v6891_v35, %v5220_v34 }
 0x137   : > { %v958_v6 = vadd.f32 %v926_v32, %v6888_v14  ;;  %v959_v36 = vadd.f32 %v927_v25, %v6889_v63  ;;  %v960_v23 = vadd.f32 %v928_v29, %v6890_v30  ;;  %v1022_v32 = vrot.slane %v1021_v52, 2  ;;  %v6897_v14 = vld [vmem:[#allocation75_spill] sm:$0xff] }
 0x138   : > { %v6892_v63 = vmax.f32 %v5110_v60, 0.0  ;;  %v6893_v25 = vmax.f32 %v5113_v54, 0.0  ;;  %v5252_v24 = vmul.f32 %v6894_v13, %v5220_v34  ;;  %v5255_v57 = vadd.f32 %v929_v22, %v6895_v10 }
 0x139   : > { %v990_v41 = vmax.f32 %v958_v6, 0.0  ;;  %v991_v44 = vmax.f32 %v959_v36, 0.0  ;;  %v992_v8 = vmax.f32 %v960_v23, 0.0  ;;  %v5258_v6 = vadd.f32 %v930_v21, %v6897_v14 }
 0x13a   : > { %v1026_v30 = vsel %vm395_vm8, %v6892_v63, 0.0  ;;  %v1033_v29 = vsel %vm395_vm8, %v6893_v25, 0.0  ;;  %6896 = vst [vmem:[#allocation68_spill] sm:$0xff] %v5255_v57  ;;  %v5260_v36 = vadd.f32 %v1003_v33, %v1002_v1  ;;  %v5262_v60 = vadd.f32 %v1010_v4, %v1009_v40 }
 0x13b   : > { %6898 = vst [vmem:[#allocation69_spill] sm:$0xff] %v5258_v6  ;;  %v1027_v23 = vrot.slane %v1026_v30, 4  ;;  %v1017_v63 = vrot.slane %v1016_v59, 1  ;;  %v1023_v46 = vadd.f32 %v1022_v32, %v1021_v52  ;;  %v1034_v39 = vrot.slane %v1033_v29, 4 }
 0x13c   : > { %v6900_v13 = vmax.f32 %v5119_v18, 0.0  ;;  %v6901_v22 = vmax.f32 %v5134_v38, 0.0  ;;  %v5273_v10 = vsel %vm395_vm8, %v990_v41, 0.0  ;;  %v5276_v40 = vsel %vm395_vm8, %v991_v44, 0.0 }
 0x13d   : > { %v1028_v25 = vadd.f32 %v1027_v23, %v1026_v30  ;;  %6902 = vst [vmem:[#allocation77_spill] sm:$0xff] %v5273_v10  ;;  %v5279_v1 = vsel %vm395_vm8, %v992_v8, 0.0  ;;  %v1035_v52 = vadd.f32 %v1034_v39, %v1033_v29  ;;  %v6904_v18 = vrot.slane %v5169_v50, 4 }
 0x13e   : > { %v5264_v54 = vpop.f32.mrf.mxu3  ;;  %v1040_v35 = vsel %vm395_vm8, %v6900_v13, 0.0  ;;  %v1047_v21 = vsel %vm395_vm8, %v6901_v22, 0.0  ;;  %6903 = vst [vmem:[#allocation75_spill] sm:$0xff] %v5279_v1  ;;  %v1024_v38 = vrot.slane %v1023_v46, 1  ;;  %v1064_v14 = vrot.slane %v5197_v51, 2 }
 0x13f   : > { %6899 = vst [vmem:[#allocation74_spill] sm:$0xff] %v5264_v54  ;;  %v1041_v33 = vrot.slane %v1040_v35, 4  ;;  %v1029_v4 = vrot.slane %v1028_v25, 2  ;;  %v1048_v32 = vrot.slane %v1047_v21, 4  ;;  %v1056_v30 = vadd.f32 %v6904_v18, %v5169_v50 }
 0x140   : > { %v6905_v41 = vrot.slane %v5176_v55, 4  ;;  %v1036_v22 = vrot.slane %v1035_v52, 2  ;;  %v1065_v39 = vadd.f32 %v1064_v14, %v5197_v51  ;;  %v1075_v50 = vsel %vm395_vm8, %v6906_v53, 0.0 }
 0x141   : > { %v1042_v13 = vadd.f32 %v1041_v33, %v1040_v35  ;;  %v1030_v23 = vadd.f32 %v1029_v4, %v1028_v25  ;;  %v1049_v8 = vadd.f32 %v1048_v32, %v1047_v21  ;;  %v1057_v11 = vrot.slane %v1056_v30, 2 }
 0x142   : > { %v1070_v44 = vadd.f32 %v6905_v41, %v5176_v55  ;;  %v1037_v35 = vadd.f32 %v1036_v22, %v1035_v52  ;;  %v1076_v25 = vrot.slane %v1075_v50, 4  ;;  %v1018_v32 = vadd.f32 %v1017_v63, %v1016_v59 }
 0x143   : > { %v1043_v47 = vrot.slane %v1042_v13, 2  ;;  %v1031_v18 = vrot.slane %v1030_v23, 1  ;;  %v1050_v33 = vrot.slane %v1049_v8, 2  ;;  %v1058_v9 = vadd.f32 %v1057_v11, %v1056_v30 }
 0x144   : > { %v1071_v29 = vrot.slane %v1070_v44, 2  ;;  %v1025_v41 = vadd.f32 %v1024_v38, %v1023_v46  ;;  %v1066_v53 = vrot.slane %v1065_v39, 1  ;;  %v1077_v27 = vadd.f32 %v1076_v25, %v1075_v50 }
 0x145   : > { %v1044_v42 = vadd.f32 %v1043_v47, %v1042_v13  ;;  %v1051_v51 = vadd.f32 %v1050_v33, %v1049_v8  ;;  %v1032_v52 = vadd.f32 %v1031_v18, %v1030_v23  ;;  %v1038_v22 = vrot.slane %v1037_v35, 1 }
 0x146   : > { %v1072_v55 = vadd.f32 %v1071_v29, %v1070_v44  ;;  %v1687_v14 = vpop.f32.mrf.mxu3  ;;  %v1059_v11 = vrot.slane %v1058_v9, 1  ;;  %v6907_v30 = vmax.f32 %v5150_v0, 0.0  ;;  %v1078_v29 = vrot.slane %v1077_v27, 2 }
 0x147   : > { %v1045_v13 = vrot.slane %v1044_v42, 1  ;;  %v1052_v21 = vrot.slane %v1051_v51, 1  ;;  %v6908_v59 = vmax.f32 %v5153_v15, 0.0  ;;  %v6909_v46 = vmax.f32 %v5159_v56, 0.0 }
 0x148   : > { %v1082_v47 = vsel %vm395_vm8, %v6907_v30, 0.0  ;;  %v1073_v44 = vrot.slane %v1072_v55, 1  ;;  %v6910_v23 = vmax.f32 %v5165_v16, 0.0  ;;  %v1079_v0 = vadd.f32 %v1078_v29, %v1077_v27  ;;  %v6911_v27 = vld [vmem:[#allocation3_spill] sm:$0xff] }
 0x149   : > { %v1083_v54 = vrot.slane %v1082_v47, 4  ;;  %v1089_v63 = vsel %vm395_vm8, %v6908_v59, 0.0  ;;  %v1096_v38 = vsel %vm395_vm8, %v6909_v46, 0.0  ;;  %v1039_v25 = vadd.f32 %v1038_v22, %v1037_v35  ;;  %v6912_v35 = vld [vmem:[#allocation61_spill] sm:$0xff]  ;;  %v6914_v22 = vld [vmem:[#allocation63_spill] sm:$0xff] }
 0x14a   : > { %v1103_v8 = vsel %vm395_vm8, %v6910_v23, 0.0  ;;  %v1090_v18 = vrot.slane %v1089_v63, 4  ;;  %v1097_v33 = vrot.slane %v1096_v38, 4  ;;  %v1060_v14 = vadd.f32 %v1059_v11, %v1058_v9 }
 0x14b   : > { %v1084_v50 = vadd.f32 %v1083_v54, %v1082_v47  ;;  %v1067_v30 = vadd.f32 %v1066_v53, %v1065_v39  ;;  %v1104_v61 = vrot.slane %v1103_v8, 4  ;;  %v1080_v4 = vrot.slane %v1079_v0, 1  ;;  %v6913_v39 = vld [vmem:[#allocation62_spill] sm:$0xff] }
 0x14c   : > { %v1091_v57 = vadd.f32 %v1090_v18, %v1089_v63  ;;  %v1098_v59 = vadd.f32 %v1097_v33, %v1096_v38  ;;  %v1046_v1 = vadd.f32 %v1045_v13, %v1044_v42  ;;  %v1053_v56 = vadd.f32 %v1052_v21, %v1051_v51  ;;  %v6915_v51 = vld [vmem:[#allocation64_spill] sm:$0xff]  ;;  %v6916_v13 = vld [vmem:[#allocation65_spill] sm:$0xff]  ;;  %v6917_v38 = vld [vmem:[#allocation66_spill] sm:$0xff] }
 0x14d   : > { %v1085_v15 = vrot.slane %v1084_v50, 2  ;;  %v1074_v10 = vadd.f32 %v1073_v44, %v1072_v55  ;;  %v1105_v46 = vadd.f32 %v1104_v61, %v1103_v8  ;;  %v1330_v54 = vmul.f32 %v6911_v27, %v5260_v36  ;;  %v6918_v18 = vld [vmem:[#allocation67_spill] sm:$0xff] }
 0x14e   : > { %v1092_v16 = vrot.slane %v1091_v57, 2  ;;  %v1099_v3 = vrot.slane %v1098_v59, 2  ;;  %v1331_v9 = vmul.f32 %v6912_v35, %v5262_v60  ;;  %v1332_v53 = vmul.f32 %v6913_v39, %v1018_v32 }
 0x14f   : > { %v1086_v6 = vadd.f32 %v1085_v15, %v1084_v50  ;;  %v1106_v47 = vrot.slane %v1105_v46, 2  ;;  %v1333_v11 = vmul.f32 %v6914_v22, %v1025_v41  ;;  %v1081_v29 = vadd.f32 %v1080_v4, %v1079_v0  ;;  %v6919_v41 = vld [vmem:[#allocation89_spill] sm:$0xff]  ;;  %v6920_v0 = vld [vmem:[#allocation91_spill] sm:$0xff] }
 0x150   : > { %v1093_v42 = vadd.f32 %v1092_v16, %v1091_v57  ;;  %v1100_v21 = vadd.f32 %v1099_v3, %v1098_v59  ;;  %v1334_v61 = vmul.f32 %v6915_v51, %v1032_v52  ;;  %v1335_v44 = vmul.f32 %v6916_v13, %v1039_v25  ;;  %v6921_v59 = vld [vmem:[#allocation92_spill] sm:$0xff]  ;;  %v6922_v16 = vld [vmem:[#allocation93_spill] sm:$0xff] }
 0x151   : > { %v1087_v63 = vrot.slane %v1086_v6, 1  ;;  %v1107_v55 = vadd.f32 %v1106_v47, %v1105_v46  ;;  %v1336_v23 = vmul.f32 %v6917_v38, %v1046_v1  ;;  %v1337_v60 = vmul.f32 %v6918_v18, %v1053_v56 }
 0x152   : > { %v1094_v8 = vrot.slane %v1093_v42, 1  ;;  %v1101_v50 = vrot.slane %v1100_v21, 1  ;;  %v1338_v32 = vmul.f32 %v4792_v48, %v1060_v14  ;;  %v1339_v4 = vmul.f32 %v6919_v41, %v1067_v30 }
 0x153   : > { %v1088_v36 = vadd.f32 %v1087_v63, %v1086_v6  ;;  %v1108_v33 = vrot.slane %v1107_v55, 1  ;;  %v1340_v57 = vmul.f32 %v6920_v0, %v1074_v10  ;;  %v1341_v52 = vmul.f32 %v6921_v59, %v1081_v29  ;;  %v6923_v63 = vld [vmem:[#allocation94_spill] sm:$0xff] }
 0x154   : > { %v1095_v3 = vadd.f32 %v1094_v8, %v1093_v42  ;;  %v1102_v15 = vadd.f32 %v1101_v50, %v1100_v21  ;;  %v1363_v46 = vpack.c.bf16 %v1331_v9, %v1331_v9  ;;  %v1362_v6 = vpack.c.bf16 %v1330_v54, %v1330_v54  ;;  %v5326_v21 = vpop.permute.xlu2 %1266 }
 0x155   : > { %v1109_v25 = vadd.f32 %v1108_v33, %v1107_v55  ;;  %v1342_v1 = vmul.f32 %v6922_v16, %v1088_v36  ;;  %v1364_v47 = vpack.c.bf16 %v1332_v53, %v1332_v53  ;;  %v1365_v18 = vpack.c.bf16 %v1333_v11, %v1333_v11  ;;  %6924 = vst [vmem:[#allocation3_spill] sm:$0xff] %v5326_v21 }
 0x156   : > { %v1343_v38 = vmul.f32 %v6923_v63, %v1095_v3  ;;  %v1344_v56 = vmul.f32 %v5086_v17, %v1102_v15  ;;  %v1366_v14 = vpack.c.bf16 %v1334_v61, %v1334_v61  ;;  %v1367_v41 = vpack.c.bf16 %v1335_v44, %v1335_v44 }
 0x157   : > { %v1345_v30 = vmul.f32 %v5093_v31, %v1109_v25  ;;  %v1368_v10 = vpack.c.bf16 %v1336_v23, %v1336_v23  ;;  %v1370_v42 = vpack.c.bf16 %v1338_v32, %v1338_v32  ;;  %v1369_v29 = vpack.c.bf16 %v1337_v60, %v1337_v60 }
 0x158   : > { %v1371_v9 = vpack.c.bf16 %v1339_v4, %v1339_v4  ;;  %v1372_v55 = vpack.c.bf16 %v1340_v57, %v1340_v57  ;;  %v1447_v8 = vunpack.c.l.b16 %v1363_v46  ;;  %v1373_v36 = vpack.c.bf16 %v1341_v52, %v1341_v52 }
 0x159   : > { %v1374_v54 = vpack.c.bf16 %v1342_v1, %v1342_v1  ;;  %v1446_v53 = vunpack.c.l.b16 %v1362_v6  ;;  %v1448_v50 = vunpack.c.l.b16 %v1364_v47  ;;  %v1375_v33 = vpack.c.bf16 %v1343_v38, %v1343_v38 }
 0x15a   : > { %v1376_v3 = vpack.c.bf16 %v1344_v56, %v1344_v56  ;;  %v1377_v15 = vpack.c.bf16 %v1345_v30, %v1345_v30  ;;  %v1449_v11 = vunpack.c.l.b16 %v1365_v18  ;;  %v1450_v61 = vunpack.c.l.b16 %v1366_v14 }
 0x15b   : > { %v1451_v17 = vunpack.c.l.b16 %v1367_v41  ;;  %v1452_v25 = vunpack.c.l.b16 %v1368_v10  ;;  %v1454_v44 = vunpack.c.l.b16 %v1370_v42  ;;  %v1455_v23 = vunpack.c.l.b16 %v1371_v9 }
 0x15c   : > { %v1456_v32 = vunpack.c.l.b16 %v1372_v55  ;;  %v1478_v31 = vrot.slane %v1447_v8, 7  ;;  %v1457_v60 = vunpack.c.l.b16 %v1373_v36  ;;  %v1481_v4 = vrot.slane %v1448_v50, 6  ;;  %v5331_v14 = vpop.permute.xlu2 %1395 }
 0x15d   : > { %v1458_v57 = vunpack.c.l.b16 %v1374_v54  ;;  %v1484_v46 = vrot.slane %v1449_v11, 5  ;;  %v1459_v38 = vunpack.c.l.b16 %v1375_v33  ;;  %v1487_v1 = vrot.slane %v1450_v61, 4  ;;  %6925 = vst [vmem:[#allocation61_spill] sm:$0xff] %v5331_v14 }
 0x15e   : > { %v1480_v52 = vsel %vm1479_vm9, %v1478_v31, %v1446_v53  ;;  %v1460_v41 = vunpack.c.l.b16 %v1376_v3  ;;  %v1490_v47 = vrot.slane %v1451_v17, 3  ;;  %v1499_v56 = vrot.slane %v1455_v23, 7 }
 0x15f   : > { %v1483_v18 = vsel %vm1482_vm10, %v1481_v4, %v1480_v52  ;;  %v1453_v30 = vunpack.c.l.b16 %v1369_v29  ;;  %v1461_v10 = vunpack.c.l.b16 %v1377_v15  ;;  %v1501_v9 = vrot.slane %v1456_v32, 6 }
 0x160   : > { %v1486_v6 = vsel %vm1485_vm11, %v1484_v46, %v1483_v18  ;;  %v1500_v55 = vsel %vm1479_vm9, %v1499_v56, %v1454_v44  ;;  %v1503_v8 = vrot.slane %v1457_v60, 5  ;;  %v1493_v36 = vrot.slane %v1452_v25, 2 }
 0x161   : > { %v1489_v42 = vsel %vm1488_vm12, %v1487_v1, %v1486_v6  ;;  %v1502_v54 = vsel %vm1482_vm10, %v1501_v9, %v1500_v55  ;;  %v1505_v53 = vrot.slane %v1458_v57, 4  ;;  %v1410_v17 = vmul.f32 %v5331_v14, %v4821_v7  ;;  %v6928_v6 = vld [vmem:[#allocation78_spill] sm:$0xff] }
 0x162   : > { %v1492_v31 = vsel %vm1491_vm13, %v1490_v47, %v1489_v42  ;;  %v1504_v29 = vsel %vm1485_vm11, %v1503_v8, %v1502_v54  ;;  %v1507_v50 = vrot.slane %v1459_v38, 3  ;;  %v1509_v33 = vrot.slane %v1460_v41, 2  ;;  %v6931_v42 = vld [vmem:[#allocation102_spill] sm:$0xff] }
 0x163   : > { %v1495_v3 = vsel %vm1494_vm14, %v1493_v36, %v1492_v31  ;;  %v1506_v15 = vsel %vm1488_vm12, %v1505_v53, %v1504_v29  ;;  %v925_v11 = vmul.f32 %v5097_v12, %v5171_v19  ;;  %v955_v61 = vadd.f32 %v5204_v43, %v5090_v5  ;;  %1563 = vrot.lane.b32.xlu1 %v1410_v17, %s4484_s19 }
 0x164   : > { %v1496_v25 = vrot.slane %v1453_v30, 1  ;;  %v1508_v44 = vsel %vm1491_vm13, %v1507_v50, %v1506_v15  ;;  %v1511_v23 = vrot.slane %v1461_v10, 1  ;;  %v956_v32 = vadd.f32 %v5208_v20, %v5101_v28  ;;  %v6927_v20 = vld [vmem:[#allocation76_spill] sm:$0xff]  ;;  %v6933_v50 = vld [vmem:[#allocation81_spill] sm:$0xff] }
 0x165   : > { %v6926_v60 = vrot.slane %v5276_v40, 4  ;;  %v1510_v57 = vsel %vm1494_vm14, %v1509_v33, %v1508_v44  ;;  %v957_v52 = vadd.f32 %v925_v11, %v5107_v49  ;;  %v986_v5 = vmax.f32 %v5211_v62, 0.0 }
 0x166   : > { %v1498_v43 = vsel %vm1497_vm15, %v1496_v25, %v1495_v3  ;;  %v1512_v46 = vsel %vm1497_vm15, %v1511_v23, %v1510_v57  ;;  %v987_v38 = vmax.f32 %v955_v61, 0.0  ;;  %v988_v18 = vmax.f32 %v956_v32, 0.0  ;;  %v6934_v32 = vld [vmem:[#allocation69_spill] sm:$0xff] }
 0x167   : > { %v5353_v4 = vadd.f32 %v6926_v60, %v5276_v40  ;;  %v1541_v1 = vpack.c.b16 %v1512_v46, %v1498_v43  ;;  %v933_v28 = vmul.f32 %v5095_v58, %v5220_v34  ;;  %v5364_v40 = vadd.f32 %v5242_v2, %v6927_v20  ;;  %v6935_v20 = vld [vmem:[#allocation77_spill] sm:$0xff] }
 0x168   : > { %v989_v41 = vmax.f32 %v957_v52, 0.0  ;;  %v5368_v49 = vadd.f32 %v5252_v24, %v6928_v6  ;;  %v6929_v62 = vrot.slane %v5215_v45, 4  ;;  %v1120_v56 = vrot.slane %v5238_v37, 2 }
 0x169   : > { %v6930_v30 = vrot.slane %v5218_v26, 4  ;;  %4167 = vmatmul.msk.bf16.vlgmr.msra.gmra.mxu2 %vm395_vm8, %v1541_v1  ;;  %v6932_v2 = vmax.f32 %v6931_v42, 0.0  ;;  %v1138_v31 = vsel %vm395_vm8, %v986_v5, 0.0  ;;  %v1145_v24 = vsel %vm395_vm8, %v987_v38, 0.0 }
 0x16a   : > { %v1112_v47 = vadd.f32 %v6929_v62, %v5215_v45  ;;  %v1152_v55 = vsel %vm395_vm8, %v988_v18, 0.0  ;;  %v1121_v45 = vadd.f32 %v1120_v56, %v5238_v37  ;;  %v1139_v53 = vrot.slane %v1138_v31, 4 }
 0x16b   : > { %v1126_v10 = vadd.f32 %v6930_v30, %v5218_v26  ;;  %v1131_v9 = vsel %vm395_vm8, %v6932_v2, 0.0  ;;  %v1146_v17 = vrot.slane %v1145_v24, 4  ;;  %v1153_v26 = vrot.slane %v1152_v55, 4  ;;  %v6937_v2 = vld [vmem:[#allocation75_spill] sm:$0xff] }
 0x16c   : > { %v1113_v8 = vrot.slane %v1112_v47, 2  ;;  %v1132_v54 = vrot.slane %v1131_v9, 4  ;;  %v1159_v29 = vsel %vm395_vm8, %v989_v41, 0.0  ;;  %v965_v33 = vadd.f32 %v933_v28, %v6933_v50 }
 0x16d   : > { %v1127_v36 = vrot.slane %v1126_v10, 2  ;;  %v1140_v61 = vadd.f32 %v1139_v53, %v1138_v31  ;;  %v1147_v25 = vadd.f32 %v1146_v17, %v1145_v24  ;;  %v1154_v44 = vadd.f32 %v1153_v26, %v1152_v55 }
 0x16e   : > { %v1114_v3 = vadd.f32 %v1113_v8, %v1112_v47  ;;  %v1133_v11 = vadd.f32 %v1132_v54, %v1131_v9  ;;  %v1160_v23 = vrot.slane %v1159_v29, 4  ;;  %v994_v60 = vmax.f32 %v6934_v32, 0.0 }
 0x16f   : > { %v1128_v15 = vadd.f32 %v1127_v36, %v1126_v10  ;;  %v995_v37 = vmax.f32 %v5364_v40, 0.0  ;;  %v1122_v57 = vrot.slane %v1121_v45, 1  ;;  %v1141_v5 = vrot.slane %v1140_v61, 2 }
 0x170   : > { %v1134_v52 = vrot.slane %v1133_v11, 2  ;;  %v1148_v43 = vrot.slane %v1147_v25, 2  ;;  %v1155_v46 = vrot.slane %v1154_v44, 2  ;;  %v1161_v38 = vadd.f32 %v1160_v23, %v1159_v29 }
 0x171   : > { %v1115_v18 = vrot.slane %v1114_v3, 1  ;;  %v1129_v1 = vrot.slane %v1128_v15, 1  ;;  %v6936_v41 = vrot.slane %v6935_v20, 4  ;;  %v1142_v62 = vadd.f32 %v1141_v5, %v1140_v61 }
 0x172   : > { %v1135_v28 = vadd.f32 %v1134_v52, %v1133_v11  ;;  %v1149_v47 = vadd.f32 %v1148_v43, %v1147_v25  ;;  %v1156_v56 = vadd.f32 %v1155_v46, %v1154_v44  ;;  %v1162_v30 = vrot.slane %v1161_v38, 2 }
 0x173   : > { %v1168_v6 = vadd.f32 %v6936_v41, %v6935_v20  ;;  %v1176_v40 = vrot.slane %v5353_v4, 2  ;;  %v6938_v9 = vrot.slane %v6937_v2, 4  ;;  %v996_v24 = vmax.f32 %v5368_v49, 0.0 }
 0x174   : > { %v1136_v10 = vrot.slane %v1135_v28, 1  ;;  %v997_v55 = vmax.f32 %v965_v33, 0.0  ;;  %v1143_v8 = vrot.slane %v1142_v62, 1  ;;  %v1163_v36 = vadd.f32 %v1162_v30, %v1161_v38  ;;  %v6939_v33 = vld [vmem:[#allocation68_spill] sm:$0xff] }
 0x175   : > { %v1169_v42 = vrot.slane %v1168_v6, 2  ;;  %v1182_v31 = vadd.f32 %v6938_v9, %v6937_v2  ;;  %v5397_v54 = vadd.f32 %v1122_v57, %v1121_v45  ;;  %v1177_v17 = vadd.f32 %v1176_v40, %v5353_v4 }
 0x176   : > { %v5400_v29 = vadd.f32 %v1115_v18, %v1114_v3  ;;  %v5402_v50 = vadd.f32 %v1129_v1, %v1128_v15  ;;  %v1150_v11 = vrot.slane %v1149_v47, 1  ;;  %v1157_v61 = vrot.slane %v1156_v56, 1 }
 0x177   : > { %v1170_v53 = vadd.f32 %v1169_v42, %v1168_v6  ;;  %v1183_v26 = vrot.slane %v1182_v31, 2  ;;  %v5404_v25 = vadd.f32 %v1136_v10, %v1135_v28  ;;  %v5406_v44 = vadd.f32 %v1143_v8, %v1142_v62 }
 0x178   : > { %v6940_v23 = vmax.f32 %v6939_v33, 0.0  ;;  %v1164_v32 = vrot.slane %v1163_v36, 1  ;;  %v1194_v4 = vsel %vm395_vm8, %v994_v60, 0.0  ;;  %v1201_v3 = vsel %vm395_vm8, %v995_v37, 0.0 }
 0x179   : > { %v1184_v49 = vadd.f32 %v1183_v26, %v1182_v31  ;;  %v1171_v52 = vrot.slane %v1170_v53, 1  ;;  %v1178_v15 = vrot.slane %v1177_v17, 1  ;;  %v1195_v43 = vrot.slane %v1194_v4, 4 }
 0x17a   : > { %v1187_v45 = vsel %vm395_vm8, %v6940_v23, 0.0  ;;  %v1202_v38 = vrot.slane %v1201_v3, 4  ;;  %v1208_v18 = vsel %vm395_vm8, %v996_v24, 0.0  ;;  %v1215_v1 = vsel %vm395_vm8, %v997_v55, 0.0  ;;  %v5418_v55 = vpop.permute.xlu0 %1271 }
 0x17b   : > { %v1188_v57 = vrot.slane %v1187_v45, 4  ;;  %v1185_v5 = vrot.slane %v1184_v49, 1  ;;  %v1151_v28 = vadd.f32 %v1150_v11, %v1149_v47  ;;  %v1196_v20 = vadd.f32 %v1195_v43, %v1194_v4  ;;  %6942 = vst [vmem:[#allocation63_spill] sm:$0xff] %v5418_v55 }
 0x17c   : > { %v1209_v41 = vrot.slane %v1208_v18, 4  ;;  %v1216_v6 = vrot.slane %v1215_v1, 4  ;;  %v1158_v62 = vadd.f32 %v1157_v61, %v1156_v56  ;;  %v1165_v30 = vadd.f32 %v1164_v32, %v1163_v36 }
 0x17d   : > { %v1189_v46 = vadd.f32 %v1188_v57, %v1187_v45  ;;  %v1203_v60 = vadd.f32 %v1202_v38, %v1201_v3  ;;  %v1172_v42 = vadd.f32 %v1171_v52, %v1170_v53  ;;  %v1197_v37 = vrot.slane %v1196_v20, 2 }
 0x17e   : > { %v1210_v40 = vadd.f32 %v1209_v41, %v1208_v18  ;;  %v1217_v2 = vadd.f32 %v1216_v6, %v1215_v1  ;;  %v1179_v9 = vadd.f32 %v1178_v15, %v1177_v17  ;;  %v1186_v31 = vadd.f32 %v1185_v5, %v1184_v49 }
 0x17f   : > { %v1190_v10 = vrot.slane %v1189_v46, 2  ;;  %v1204_v26 = vrot.slane %v1203_v60, 2  ;;  %v1198_v33 = vadd.f32 %v1197_v37, %v1196_v20  ;;  %v5416_v47 = vrot.slane %v5326_v21, 1 }
 0x180   : > { %v1211_v24 = vrot.slane %v1210_v40, 2  ;;  %v1218_v23 = vrot.slane %v1217_v2, 2  ;;  %v5421_v11 = vrot.slane %v5326_v21, 2  ;;  %v5424_v53 = vrot.slane %v5326_v21, 3 }
 0x181   : > { %v1191_v8 = vadd.f32 %v1190_v10, %v1189_v46  ;;  %6941 = vst [vmem:[#allocation62_spill] sm:$0xff] %v5416_v47  ;;  %v1205_v36 = vadd.f32 %v1204_v26, %v1203_v60  ;;  %v1199_v17 = vrot.slane %v1198_v33, 1  ;;  %v5427_v45 = vrot.slane %v5326_v21, 4 }
 0x182   : > { %6943 = vst [vmem:[#allocation64_spill] sm:$0xff] %v5421_v11  ;;  %v1212_v61 = vadd.f32 %v1211_v24, %v1210_v40  ;;  %v1219_v49 = vadd.f32 %v1218_v23, %v1217_v2  ;;  %v5430_v57 = vrot.slane %v5326_v21, 5  ;;  %v5433_v4 = vrot.slane %v5326_v21, 6 }
 0x183   : > { %v1192_v56 = vrot.slane %v1191_v8, 1  ;;  %6944 = vst [vmem:[#allocation65_spill] sm:$0xff] %v5424_v53  ;;  %v1206_v32 = vrot.slane %v1205_v36, 1  ;;  %v5436_v3 = vrot.slane %v5326_v21, 7  ;;  %v5439_v5 = vrot.slane %v5418_v55, 1 }
 0x184   : > { %6945 = vst [vmem:[#allocation91_spill] sm:$0xff] %v5427_v45  ;;  %v1213_v52 = vrot.slane %v1212_v61, 1  ;;  %v1220_v15 = vrot.slane %v1219_v49, 1  ;;  %v5442_v43 = vrot.slane %v5418_v55, 2  ;;  %v1200_v38 = vadd.f32 %v1199_v17, %v1198_v33 }
 0x185   : > { %6946 = vst [vmem:[#allocation92_spill] sm:$0xff] %v5430_v57  ;;  %v1193_v46 = vadd.f32 %v1192_v56, %v1191_v8  ;;  %v5445_v18 = vrot.slane %v5418_v55, 3  ;;  %v5448_v1 = vrot.slane %v5418_v55, 4  ;;  %v1207_v20 = vadd.f32 %v1206_v32, %v1205_v36 }
 0x186   : > { %6947 = vst [vmem:[#allocation93_spill] sm:$0xff] %v5433_v4  ;;  %v5451_v41 = vrot.slane %v5418_v55, 5  ;;  %v1347_v6 = vmul.f32 %v5416_v47, %v5397_v54  ;;  %v1348_v10 = vmul.f32 %v5421_v11, %v5402_v50  ;;  %v1214_v60 = vadd.f32 %v1213_v52, %v1212_v61 }
 0x187   : > { %6948 = vst [vmem:[#allocation94_spill] sm:$0xff] %v5436_v3  ;;  %v1221_v37 = vadd.f32 %v1220_v15, %v1219_v49  ;;  %v5458_v40 = vrot.slane %v5418_v55, 6  ;;  %v5461_v2 = vrot.slane %v5418_v55, 7  ;;  %v1346_v8 = vmul.f32 %v5326_v21, %v5400_v29 }
 0x188   : > { %6949 = vst [vmem:[#allocation76_spill] sm:$0xff] %v5439_v5  ;;  %v1349_v26 = vmul.f32 %v5424_v53, %v5404_v25  ;;  %v1355_v33 = vmul.f32 %v5439_v5, %v1179_v9  ;;  %v1356_v54 = vmul.f32 %v5442_v43, %v1186_v31  ;;  %v1350_v50 = vmul.f32 %v5427_v45, %v5406_v44 }
 0x189   : > { %6950 = vst [vmem:[#allocation78_spill] sm:$0xff] %v5442_v43  ;;  %v1351_v24 = vmul.f32 %v5430_v57, %v1151_v28  ;;  %v1352_v23 = vmul.f32 %v5433_v4, %v1158_v62  ;;  %v1353_v56 = vmul.f32 %v5436_v3, %v1165_v30  ;;  %v1354_v36 = vmul.f32 %v5418_v55, %v1172_v42  ;;  %v7017_v4 = vld [vmem:[#allocation71_spill] sm:$0xff] }
 0x18a   : > { %6951 = vst [vmem:[#allocation102_spill] sm:$0xff] %v5445_v18  ;;  %v1357_v29 = vmul.f32 %v5445_v18, %v1193_v46  ;;  %v1379_v17 = vpack.c.bf16 %v1347_v6, %v1347_v6  ;;  %v1380_v61 = vpack.c.bf16 %v1348_v10, %v1348_v10  ;;  %v1358_v25 = vmul.f32 %v5448_v1, %v1200_v38 }
 0x18b   : > { %6952 = vst [vmem:[#allocation81_spill] sm:$0xff] %v5448_v1  ;;  %v1359_v9 = vmul.f32 %v5451_v41, %v1207_v20  ;;  %v1360_v31 = vmul.f32 %v5458_v40, %v1214_v60  ;;  %v1361_v44 = vmul.f32 %v5461_v2, %v1221_v37  ;;  %v1378_v49 = vpack.c.bf16 %v1346_v8, %v1346_v8 }
 0x18c   : > { %6953 = vst [vmem:[#allocation69_spill] sm:$0xff] %v5451_v41  ;;  %v1381_v28 = vpack.c.bf16 %v1349_v26, %v1349_v26  ;;  %v1387_v32 = vpack.c.bf16 %v1355_v33, %v1355_v33  ;;  %v1388_v62 = vpack.c.bf16 %v1356_v54, %v1356_v54  ;;  %v1382_v52 = vpack.c.bf16 %v1350_v50, %v1350_v50 }
 0x18d   : > { %6954 = vst [vmem:[#allocation77_spill] sm:$0xff] %v5458_v40  ;;  %v1383_v30 = vpack.c.bf16 %v1351_v24, %v1351_v24  ;;  %v1384_v15 = vpack.c.bf16 %v1352_v23, %v1352_v23  ;;  %v1385_v42 = vpack.c.bf16 %v1353_v56, %v1353_v56  ;;  %v1386_v43 = vpack.c.bf16 %v1354_v36, %v1354_v36 }
 0x18e   : > { %6955 = vst [vmem:[#allocation75_spill] sm:$0xff] %v5461_v2  ;;  %v1389_v46 = vpack.c.bf16 %v1357_v29, %v1357_v29  ;;  %v1463_v6 = vunpack.c.l.b16 %v1379_v17  ;;  %v1464_v10 = vunpack.c.l.b16 %v1380_v61  ;;  %v1390_v18 = vpack.c.bf16 %v1358_v25, %v1358_v25  ;;  %v5480_v25 = vpop.permute.xlu2 %1403  ;;  %v7016_v2 = vld [vmem:[#allocation50_spill] sm:$0xff] }
 0x18f   : > { %v1391_v38 = vpack.c.bf16 %v1359_v9, %v1359_v9  ;;  %v1392_v1 = vpack.c.bf16 %v1360_v31, %v1360_v31  ;;  %v1393_v20 = vpack.c.bf16 %v1361_v44, %v1361_v44  ;;  %v1462_v41 = vunpack.c.l.b16 %v1378_v49  ;;  %6956 = vst [vmem:[#allocation68_spill] sm:$0xff] %v5480_v25 }
 0x190   : > { %v1465_v60 = vunpack.c.l.b16 %v1381_v28  ;;  %v1471_v40 = vunpack.c.l.b16 %v1387_v32  ;;  %v1472_v37 = vunpack.c.l.b16 %v1388_v62  ;;  %v1466_v8 = vunpack.c.l.b16 %v1382_v52 }
 0x191   : > { %v1467_v26 = vunpack.c.l.b16 %v1383_v30  ;;  %v1468_v33 = vunpack.c.l.b16 %v1384_v15  ;;  %v1469_v54 = vunpack.c.l.b16 %v1385_v42  ;;  %v1470_v50 = vunpack.c.l.b16 %v1386_v43  ;;  %v5484_v43 = vpop.permute.xlu1 %1399 }
 0x192   : > { %v1473_v24 = vunpack.c.l.b16 %v1389_v46  ;;  %v1513_v23 = vrot.slane %v1463_v6, 7  ;;  %v1515_v56 = vrot.slane %v1464_v10, 6  ;;  %v1474_v36 = vunpack.c.l.b16 %v1390_v18  ;;  %6957 = vst [vmem:[#allocation103_spill] sm:$0xff] %v5484_v43 }
 0x193   : > { %v1475_v29 = vunpack.c.l.b16 %v1391_v38  ;;  %v1476_v17 = vunpack.c.l.b16 %v1392_v1  ;;  %v1477_v61 = vunpack.c.l.b16 %v1393_v20  ;;  %v1517_v31 = vrot.slane %v1465_v60, 5 }
 0x194   : > { %v1514_v9 = vsel %vm1479_vm9, %v1513_v23, %v1462_v41  ;;  %v1527_v44 = vrot.slane %v1471_v40, 7  ;;  %v1529_v49 = vrot.slane %v1472_v37, 6  ;;  %v1519_v32 = vrot.slane %v1466_v8, 4 }
 0x195   : > { %v1516_v28 = vsel %vm1482_vm10, %v1515_v56, %v1514_v9  ;;  %v1521_v62 = vrot.slane %v1467_v26, 3  ;;  %v1523_v52 = vrot.slane %v1468_v33, 2  ;;  %v1531_v1 = vrot.slane %v1473_v24, 5  ;;  %v5503_v24 = vpop.permute.xlu0 %1407 }
 0x196   : > { %v1518_v30 = vsel %vm1485_vm11, %v1517_v31, %v1516_v28  ;;  %v1528_v18 = vsel %vm1479_vm9, %v1527_v44, %v1470_v50  ;;  %v1412_v15 = vmul.f32 %v5480_v25, %v4821_v7  ;;  %v1525_v42 = vrot.slane %v1469_v54, 1  ;;  %6958 = vst [vmem:[#allocation104_spill] sm:$0xff] %v5503_v24 }
 0x197   : > { %v1520_v41 = vsel %vm1488_vm12, %v1519_v32, %v1518_v30  ;;  %v1530_v40 = vsel %vm1482_vm10, %v1529_v49, %v1528_v18  ;;  %v1533_v46 = vrot.slane %v1474_v36, 4  ;;  %v1535_v38 = vrot.slane %v1475_v29, 3  ;;  %v4467_v30 = vld [vmem:[%s6570_s3 + $0x18] sm:$0xff]  ;;  %v4468_v18 = vld [vmem:[%s6570_s3 + $0x10] sm:$0xff] }
 0x198   : > { %v1522_v6 = vsel %vm1491_vm13, %v1521_v62, %v1520_v41  ;;  %v1532_v10 = vsel %vm1485_vm11, %v1531_v1, %v1530_v40  ;;  %1567 = vrot.lane.b32.xlu1 %v1412_v15, %s4484_s19  ;;  %v1411_v20 = vmul.f32 %v5484_v43, %v4821_v7  ;;  %v1537_v8 = vrot.slane %v1476_v17, 2  ;;  %v6959_v62 = vld [vmem:[#allocation6_spill] sm:$0xff] }
 0x199   : > { %v1524_v60 = vsel %vm1494_vm14, %v1523_v52, %v1522_v6  ;;  %v1534_v37 = vsel %vm1488_vm12, %v1533_v46, %v1532_v10  ;;  %v1539_v54 = vrot.slane %v1477_v61, 1  ;;  %v1413_v36 = vmul.f32 %v5503_v24, %v4821_v7  ;;  %v4311_v7 = vld [vmem:[%s6570_s3 + $0x20] sm:$0xff]  ;;  %v4312_v52 = vld [vmem:[%s6570_s3 + $0x28] sm:$0xff] }
 0x19a   : > { %v1526_v26 = vsel %vm1497_vm15, %v1525_v42, %v1524_v60  ;;  %v1536_v33 = vsel %vm1491_vm13, %v1535_v38, %v1534_v37  ;;  %1565 = vrot.lane.b32.xlu2 %v1411_v20, %s4484_s19  ;;  %1740 = vmatpush.bf16.msrb.mxu1 %v4312_v52  ;;  %v6960_v60 = vld [vmem:[#allocation90_spill] sm:$0xff] }
 0x19b   : > { %v1538_v50 = vsel %vm1494_vm14, %v1537_v8, %v1536_v33  ;;  %v1689_v37 = vmul.f32 %v6960_v60, %v6911_v27  ;;  %v6961_v8 = vld [vmem:[#allocation101_spill] sm:$0xff]  ;;  %v6965_v60 = vld [vmem:[#allocation12_spill] sm:$0xff] }
 0x19c   : > { %v1540_v23 = vsel %vm1497_vm15, %v1539_v54, %v1538_v50 }
 0x19d   : > { %v1542_v56 = vpack.c.b16 %v1540_v23, %v1526_v26  ;;  %v1690_v26 = vmul.f32 %v6961_v8, %v4792_v48 }
 0x19e   : > { %1741 = vmatpush.bf16.msrb.mxu1 %v4311_v7 }
 0x19f   : > { %4168 = vmatmul.msk.bf16.gmra.mxu2 %vm395_vm8, %v1542_v56 }
 0x1a2   : > { %1569 = vrot.lane.b32.xlu2 %v1413_v36, %s4484_s19  ;;  %1742 = vmatpush.bf16.msrb.mxu1 %v4467_v30 }
 0x1a6   : > { %1743 = vmatpush.bf16.msrb.mxu1 %v4468_v18 }
 0x1aa   : > { %1763 = vrot.lane.b32.xlu2 %v4312_v52, %s4484_s19 }
 0x1d5   : > { %v1564_v17 = vpop.permute.xlu1 %1563 }
 0x1ec   : > { %v1590_v29 = vpop.f32.mrf.mxu2 }
 0x1ed   : > { %v1591_v61 = vadd.f32 %v1590_v29, %v1564_v17 }
 0x1ef   : > { %v1600_v49 = vmax.f32 %v1591_v61, 0.0 }
 0x1f4   : > { %v1566_v9 = vpop.permute.xlu2 %1565  ;;  %v1592_v31 = vpop.f32.mrf.mxu2 }
 0x1f5   : > { %v1593_v44 = vadd.f32 %v1592_v31, %v1566_v9  ;;  %v6962_v9 = vld [vmem:[#allocation100_spill] sm:$0xff]  ;;  %v6963_v31 = vld [vmem:[#allocation74_spill] sm:$0xff] }
 0x1f6   : > { %v1691_v61 = vmul.f32 %v6962_v9, %v5326_v21  ;;  %v4316_v9 = vld [vmem:[%s6570_s3 + $0x50] sm:$0xff] }
 0x1f7   : > { %v1601_v28 = vmax.f32 %v1593_v44, 0.0  ;;  %v1692_v44 = vmul.f32 %v6963_v31, %v5418_v55  ;;  %v7020_v21 = vld [vmem:[#allocation36_spill] sm:$0xff] }
 0x1f9   : > { %v4436_v32 = vpack.i.bf16 %v1601_v28, %v1600_v49 }
 0x1fb   : > { %4437 = vrot.lane.b32.xlu0 %v4436_v32, %s4486_s25 }
 0x1fc   : > { %v1570_v41 = vpop.permute.xlu2 %1569 }
 0x203   : > { %1761 = vrot.lane.b32.xlu0 %v4311_v7, %s4484_s19 }
 0x204   : > { %v1764_v36 = vpop.permute.xlu2 %1763 }
 0x205   : > { %1779 = vmatpush.bf16.msrb.mxu2 %v1764_v36 }
 0x20a   : > { %v1568_v15 = vpop.permute.xlu1 %1567 }
 0x20b   : > { %1820 = vrot.lane.b32.xlu0 %v6959_v62, %s4486_s25 }
 0x222   : > { %v1595_v1 = vpop.f32.mrf.mxu2 }
 0x223   : > { %v1596_v42 = vadd.f32 %v1595_v1, %v1568_v15 }
 0x225   : > { %v1602_v6 = vmax.f32 %v1596_v42, 0.0 }
 0x22a   : > { %v1597_v40 = vpop.f32.mrf.mxu2 }
 0x22b   : > { %v1598_v46 = vadd.f32 %v1597_v40, %v1570_v41 }
 0x22d   : > { %v1603_v10 = vmax.f32 %v1598_v46, 0.0 }
 0x22f   : > { %v4441_v38 = vpack.i.bf16 %v1603_v10, %v1602_v6 }
 0x231   : > { %4442 = vrot.lane.b32.xlu1 %v4441_v38, %s4486_s25 }
 0x26d   : > { %v4438_v20 = vpop.permute.xlu0 %4437 }
 0x26e   : > { %v4440_v33 = vunpack.i.h.bf16 %v4438_v20  ;;  %v4439_v54 = vunpack.i.l.bf16 %v4438_v20  ;;  %v6964_v20 = vld [vmem:[#allocation10_spill] sm:$0xff] }
 0x270   : > { %v1710_v50 = vsel %vm395_vm8, %v1690_v26, %v4440_v33  ;;  %v1709_v23 = vsel %vm395_vm8, %v1689_v37, %v4439_v54  ;;  %v6966_v26 = vld [vmem:[#allocation17_spill] sm:$0xff] }
 0x271   : > { %v1713_v56 = vpack.c.bf16 %v1710_v50, %v1709_v23  ;;  %v6967_v50 = vld [vmem:[#allocation88_spill] sm:$0xff] }
 0x273   : > { %4181 = vmatmul.msk.bf16.vlgmr.msrb.gmra.mxu1 %vm1729_vm0, %v1713_v56  ;;  %v6968_v56 = vld [vmem:[#allocation99_spill] sm:$0xff] }
 0x275   : > { %v1762_v29 = vpop.permute.xlu0 %1761 }
 0x276   : > { %1780 = vmatpush.bf16.msrb.mxu2 %v1762_v29 }
 0x2a3   : > { %v4443_v17 = vpop.permute.xlu1 %4442 }
 0x2a4   : > { %v4445_v49 = vunpack.i.h.bf16 %v4443_v17  ;;  %v4444_v28 = vunpack.i.l.bf16 %v4443_v17  ;;  %v1821_v17 = vpop.permute.xlu0 %1820 }
 0x2a6   : > { %v1711_v32 = vsel %vm395_vm8, %v1691_v61, %v4444_v28  ;;  %v1712_v7 = vsel %vm395_vm8, %v1692_v44, %v4445_v49 }
 0x2a7   : > { %v1714_v62 = vpack.c.bf16 %v1712_v7, %v1711_v32  ;;  %v4197_v7 = vld [vmem:[%s6570_s3 + $0x68] sm:$0xf] }
 0x2a9   : > { %4182 = vmatmul.msk.bf16.gmra.mxu1 %vm1729_vm0, %v1714_v62 }
 0x2f0   : > { %v1745_v52 = vpop.f32.mrf.mxu1 }
 0x2f1   : > { %v1755_v18 = vmax.f32 %v1745_v52, 0.0 }
 0x2f8   : > { %v1747_v30 = vpop.f32.mrf.mxu1 }
 0x2f9   : > { %v1756_v1 = vmax.f32 %v1747_v30, 0.0  ;;  %v1850_v30 = vunpack.c.l.bf16 %v4197_v7 }
 0x2fb   : > { %v1759_v15 = vpack.c.bf16 %v1756_v1, %v1755_v18  ;;  %v5573_v18 = vperm.slane %v1850_v30, 0 }
 0x2fd   : > { %4183 = vmatmul.msk.bf16.vlgmr.msrb.gmra.mxu2 %vm395_vm8, %v1759_v15  ;;  %v2345_v1 = vmul.f32 %v5573_v18, %v5331_v14  ;;  %v2348_v15 = vmul.f32 %v5573_v18, %v5503_v24  ;;  %v7011_v24 = vld [vmem:[#allocation53_spill] sm:$0xff] }
 0x326   : > { %v1750_v41 = vpop.f32.mrf.mxu1 }
 0x327   : > { %v1757_v40 = vmax.f32 %v1750_v41, 0.0  ;;  %v4315_v41 = vld [vmem:[%s6570_s3 + $0x48] sm:$0xff] }
 0x32e   : > { %v1752_v42 = vpop.f32.mrf.mxu1 }
 0x32f   : > { %v1758_v46 = vmax.f32 %v1752_v42, 0.0 }
 0x331   : > { %v1760_v6 = vpack.c.bf16 %v1758_v46, %v1757_v40 }
 0x333   : > { %4184 = vmatmul.msk.bf16.gmra.mxu2 %vm395_vm8, %v1760_v6 }
 0x380   : > { %v1782_v10 = vpop.f32.mrf.mxu2 }
 0x381   : > { %1796 = vrot.lane.b32.xlu1 %v1782_v10, %s4486_s25 }
 0x388   : > { %v1784_v38 = vpop.f32.mrf.mxu2 }
 0x389   : > { %1798 = vrot.lane.b32.xlu2 %v1784_v38, %s4486_s25  ;;  %1822 = vrot.lane.b32.xlu1 %v6964_v20, %s4486_s25 }
 0x391   : > { %1824 = vrot.lane.b32.xlu1 %v6965_v60, %s4486_s25 }
 0x3b6   : > { %v1787_v37 = vpop.f32.mrf.mxu2 }
 0x3b7   : > { %1800 = vrot.lane.b32.xlu2 %v1787_v37, %s4486_s25 }
 0x3be   : > { %v1789_v8 = vpop.f32.mrf.mxu2 }
 0x3bf   : > { %1826 = vrot.lane.b32.xlu2 %v6966_v26, %s4486_s25  ;;  %1802 = vrot.lane.b32.xlu0 %v1789_v8, %s4486_s25 }
 0x3c7   : > { %2483 = vrot.lane.b32.xlu2 %v4316_v9, %s4484_s19 }
 0x3e3   : > { %v1799_v33 = vpop.permute.xlu2 %1798 }
 0x3e4   : > { %v1809_v36 = vadd.f32 %v1799_v33, %v6968_v56 }
 0x3e6   : > { %v1813_v31 = vmax.f32 %v1809_v36, 0.0  ;;  %v2346_v36 = vmul.f32 %v5573_v18, %v5484_v43 }
 0x3f3   : > { %v1797_v54 = vpop.permute.xlu1 %1796 }
 0x3f4   : > { %v1808_v23 = vadd.f32 %v1797_v54, %v6967_v50 }
 0x3f6   : > { %v1812_v29 = vmax.f32 %v1808_v23, 0.0 }
 0x3f8   : > { %v5559_v61 = vadd.f32 %v1821_v17, %v1812_v29  ;;  %v4314_v17 = vld [vmem:[%s6570_s3 + $0x40] sm:$0xff] }
 0x3f9   : > { %1883 = vmatpush.bf16.msra.mxu0 %v4314_v17  ;;  %v6982_v17 = vld [vmem:[#allocation11_spill] sm:$0xff] }
 0x3fa   : > { %6969 = vst [vmem:[#allocation6_spill] sm:$0xff] %v5559_v61  ;;  %v2532_v44 = vpack.c.bf16 %v5559_v61, %v5559_v61 }
 0x3fb   : > { %v1823_v49 = vpop.permute.xlu1 %1822 }
 0x3fc   : > { %v5564_v28 = vadd.f32 %v1823_v49, %v1813_v31  ;;  %v2537_v32 = vunpack.c.l.b16 %v2532_v44  ;;  %v4313_v31 = vld [vmem:[%s6570_s3 + $0x38] sm:$0xff]  ;;  %v2347_v44 = vmul.f32 %v5573_v18, %v5480_v25 }
 0x3fd   : > { %1884 = vmatpush.bf16.msra.mxu0 %v4313_v31  ;;  %v6983_v31 = vld [vmem:[#allocation13_spill] sm:$0xff] }
 0x3fe   : > { %6970 = vst [vmem:[#allocation90_spill] sm:$0xff] %v5564_v28  ;;  %v2538_v62 = vpack.c.b16 %v2537_v32, %v2537_v32  ;;  %v1851_v52 = vpack.c.bf16 %v5564_v28, %v5559_v61 }
 0x400   : > { %1855 = vrot.lane.b32.xlu0 %v1851_v52, %s4484_s19  ;;  %2539 = vrot.lane.b32.xlu2 %v2538_v62, %s4484_s19  ;;  %v6973_v62 = vld [vmem:[#allocation8_spill] sm:$0xff] }
 0x403   : > { %v1825_v10 = vpop.permute.xlu1 %1824 }
 0x408   : > { %2491 = vrot.lane.b32.xlu2 %v2345_v1, %s4484_s19  ;;  %2481 = vrot.lane.b32.xlu0 %v4315_v41, %s4484_s19 }
 0x410   : > { %2497 = vrot.lane.b32.xlu2 %v2348_v15, %s4484_s19 }
 0x411   : > { %v1801_v42 = vpop.permute.xlu2 %1800 }
 0x412   : > { %v1810_v40 = vadd.f32 %v1801_v42, %v5171_v19  ;;  %v2533_v19 = vpack.c.bf16 %v5564_v28, %v5564_v28 }
 0x414   : > { %v1814_v38 = vmax.f32 %v1810_v40, 0.0  ;;  %v2558_v50 = vunpack.c.l.b16 %v2533_v19  ;;  %v6978_v19 = vld [vmem:[#allocation4_spill] sm:$0xff] }
 0x416   : > { %v5587_v37 = vadd.f32 %v1825_v10, %v1814_v38  ;;  %v2559_v23 = vpack.c.b16 %v2558_v50, %v2558_v50  ;;  %v6975_v38 = vld [vmem:[#allocation15_spill] sm:$0xff] }
 0x418   : > { %6971 = vst [vmem:[#allocation101_spill] sm:$0xff] %v5587_v37  ;;  %v2534_v56 = vpack.c.bf16 %v5587_v37, %v5587_v37 }
 0x419   : > { %v1827_v60 = vpop.permute.xlu2 %1826 }
 0x41a   : > { %v2579_v29 = vunpack.c.l.b16 %v2534_v56 }
 0x41c   : > { %v2580_v9 = vpack.c.b16 %v2579_v29, %v2579_v29 }
 0x421   : > { %v2484_v49 = vpop.permute.xlu2 %2483 }
 0x422   : > { %2515 = vmatpush.bf16.msrb.mxu3 %v2484_v49  ;;  %v6984_v49 = vld [vmem:[#allocation16_spill] sm:$0xff] }
 0x431   : > { %v1803_v46 = vpop.permute.xlu0 %1802 }
 0x432   : > { %v1811_v6 = vadd.f32 %v1803_v46, %v5220_v34  ;;  %v6974_v46 = vld [vmem:[#allocation14_spill] sm:$0xff] }
 0x434   : > { %v1815_v20 = vmax.f32 %v1811_v6, 0.0 }
 0x436   : > { %v5589_v8 = vadd.f32 %v1827_v60, %v1815_v20 }
 0x438   : > { %6972 = vst [vmem:[#allocation100_spill] sm:$0xff] %v5589_v8  ;;  %v1852_v26 = vpack.c.bf16 %v5589_v8, %v5587_v37  ;;  %v2535_v33 = vpack.c.bf16 %v5589_v8, %v5589_v8  ;;  %v7010_v37 = vld [vmem:[#allocation40_spill] sm:$0xff] }
 0x43a   : > { %1857 = vrot.lane.b32.xlu1 %v1852_v26, %s4484_s19  ;;  %v2600_v34 = vunpack.c.l.b16 %v2535_v33  ;;  %v6977_v26 = vld [vmem:[#allocation2_spill] sm:$0xff] }
 0x43b   : > { %v5631_v33 = vmul.f32 %v5573_v18, %v6977_v26 }
 0x43c   : > { %v2601_v54 = vpack.c.b16 %v2600_v34, %v2600_v34  ;;  %v5635_v34 = vmul.f32 %v5573_v18, %v6978_v19 }
 0x43e   : > { %2602 = vrot.lane.b32.xlu0 %v2601_v54, %s4484_s19  ;;  %v6979_v54 = vld [vmem:[#allocation5_spill] sm:$0xff] }
 0x43f   : > { %v1899_v50 = vmul.f32 %v5573_v18, %v6979_v54 }
 0x442   : > { %2560 = vrot.lane.b32.xlu1 %v2559_v23, %s4484_s19  ;;  %v6980_v23 = vld [vmem:[#allocation7_spill] sm:$0xff] }
 0x443   : > { %v1898_v56 = vmul.f32 %v5573_v18, %v6980_v23 }
 0x446   : > { %2493 = vrot.lane.b32.xlu0 %v2346_v36, %s4484_s19  ;;  %v6981_v36 = vld [vmem:[#allocation9_spill] sm:$0xff] }
 0x447   : > { %v1900_v29 = vmul.f32 %v5573_v18, %v6981_v36  ;;  %v6993_v36 = vld [vmem:[#allocation31_spill] sm:$0xff] }
 0x44a   : > { %2581 = vrot.lane.b32.xlu1 %v2580_v9, %s4484_s19  ;;  %v5645_v9 = vmul.f32 %v5573_v18, %v6982_v17 }
 0x452   : > { %2495 = vrot.lane.b32.xlu1 %v2347_v44, %s4484_s19  ;;  %v1897_v44 = vmul.f32 %v5573_v18, %v6983_v31 }
 0x45a   : > { %v2540_v32 = vpop.permute.xlu2 %2539 }
 0x45b   : > { %v2542_v7 = vsel %vm338_vm1, %v2540_v32, 0  ;;  %v5651_v32 = vmul.f32 %v5573_v18, %v6984_v49 }
 0x45c   : > { %2551 = vmatpush.bf16.msra.mxu1 %v2542_v7  ;;  %v6985_v7 = vld [vmem:[#allocation18_spill] sm:$0xff] }
 0x45f   : > { %4218 = vmatmul.msk.bf16.vlgmr.msra.gmra.mxu1 %vm1612_vm7, %v6973_v62 }
 0x472   : > { %v1856_v52 = vpop.permute.xlu0 %1855 }
 0x473   : > { %4206 = vmatmul.msk.bf16.vlgmr.msra.gmra.mxu0 %vm395_vm8, %v1856_v52  ;;  %v5655_v52 = vmul.f32 %v5573_v18, %v6985_v7  ;;  %v6991_v7 = vld [vmem:[#allocation24_spill] sm:$0xff] }
 0x474   : > { %v5675_v31 = vmul.f32 %v5573_v18, %v6991_v7  ;;  %v6999_v7 = vld [vmem:[#allocation30_spill] sm:$0xff] }
 0x475   : > { %v5695_v26 = vmul.f32 %v5573_v18, %v6999_v7  ;;  %v7008_v7 = vld [vmem:[#allocation54_spill] sm:$0xff] }
 0x47a   : > { %v2482_v30 = vpop.permute.xlu0 %2481 }
 0x47b   : > { %2516 = vmatpush.bf16.msrb.mxu3 %v2482_v30  ;;  %v6986_v30 = vld [vmem:[#allocation19_spill] sm:$0xff] }
 0x4ac   : > { %v1858_v1 = vpop.permute.xlu1 %1857 }
 0x4ad   : > { %4207 = vmatmul.msk.bf16.gmra.mxu0 %vm395_vm8, %v1858_v1  ;;  %v5659_v1 = vmul.f32 %v5573_v18, %v6986_v30  ;;  %v6992_v30 = vld [vmem:[#allocation25_spill] sm:$0xff] }
 0x4ae   : > { %v1903_v17 = vmul.f32 %v5573_v18, %v6992_v30  ;;  %v7000_v30 = vld [vmem:[#allocation35_spill] sm:$0xff] }
 0x4b0   : > { %v2603_v15 = vpop.permute.xlu0 %2602 }
 0x4b1   : > { %v2605_v41 = vsel %vm338_vm1, %v2603_v15, 0  ;;  %v6987_v15 = vld [vmem:[#allocation21_spill] sm:$0xff] }
 0x4b2   : > { %2614 = vmatpush.bf16.msra.mxu3 %v2605_v41  ;;  %v1901_v41 = vmul.f32 %v5573_v18, %v6987_v15  ;;  %v5681_v15 = vmul.f32 %v5573_v18, %v6993_v36  ;;  %v7002_v36 = vld [vmem:[#allocation33_spill] sm:$0xff] }
 0x4b4   : > { %v2561_v42 = vpop.permute.xlu1 %2560 }
 0x4b5   : > { %v2563_v40 = vsel %vm338_vm1, %v2561_v42, 0  ;;  %v6988_v42 = vld [vmem:[#allocation22_spill] sm:$0xff] }
 0x4b6   : > { %2572 = vmatpush.bf16.msra.mxu2 %v2563_v40  ;;  %v5665_v40 = vmul.f32 %v5573_v18, %v6988_v42  ;;  %v6994_v42 = vld [vmem:[#allocation26_spill] sm:$0xff] }
 0x4b7   : > { %v5685_v23 = vmul.f32 %v5573_v18, %v6994_v42  ;;  %v7003_v42 = vld [vmem:[#allocation37_spill] sm:$0xff] }
 0x4b8   : > { %v5707_v62 = vmul.f32 %v5573_v18, %v7003_v42  ;;  %v7012_v42 = vld [vmem:[#allocation44_spill] sm:$0xff] }
 0x4b9   : > { %4219 = vmatmul.msk.bf16.vlgmr.msra.gmra.mxu2 %vm1612_vm7, %v6974_v46  ;;  %6995 = vst [vmem:[#allocation10_spill] sm:$0xff] %v5685_v23  ;;  %v5703_v46 = vmul.f32 %v5573_v18, %v7002_v36  ;;  %v5725_v61 = vmul.f32 %v5573_v18, %v7012_v42  ;;  %v7019_v42 = vld [vmem:[#allocation52_spill] sm:$0xff] }
 0x4ba   : > { %7004 = vst [vmem:[#allocation88_spill] sm:$0xff] %v5707_v62 }
 0x4bb   : > { %7013 = vst [vmem:[#allocation106_spill] sm:$0xff] %v5725_v61 }
 0x4bc   : > { %v2582_v6 = vpop.permute.xlu1 %2581 }
 0x4bd   : > { %v2584_v10 = vsel %vm338_vm1, %v2582_v6, 0  ;;  %v6989_v6 = vld [vmem:[#allocation23_spill] sm:$0xff] }
 0x4be   : > { %2593 = vmatpush.bf16.msrb.mxu0 %v2584_v10  ;;  %v1902_v10 = vmul.f32 %v5573_v18, %v6989_v6  ;;  %v6996_v6 = vld [vmem:[#allocation27_spill] sm:$0xff] }
 0x4bf   : > { %v1904_v54 = vmul.f32 %v5573_v18, %v6996_v6  ;;  %v7005_v6 = vld [vmem:[#allocation34_spill] sm:$0xff] }
 0x4c1   : > { %4220 = vmatmul.msk.bf16.vlgmr.msrb.gmra.mxu0 %vm1612_vm7, %v6975_v38  ;;  %v5699_v38 = vmul.f32 %v5573_v18, %v7000_v30  ;;  %v7009_v30 = vld [vmem:[#allocation46_spill] sm:$0xff] }
 0x4c3   : > { %7001 = vst [vmem:[#allocation17_spill] sm:$0xff] %v5699_v38 }
 0x4dc   : > { %v5627_v20 = vpop.f32.mrf.mxu1 }
 0x4dd   : > { %6976 = vst [vmem:[#allocation74_spill] sm:$0xff] %v5627_v20  ;;  %v7015_v20 = vld [vmem:[#allocation48_spill] sm:$0xff] }
 0x4e4   : > { %v2555_v60 = vpop.f32.mrf.mxu1 }
 0x4e5   : > { %v6990_v60 = vld [vmem:[#allocation29_spill] sm:$0xff] }
 0x4e6   : > { %v5671_v49 = vmul.f32 %v5573_v18, %v6990_v60  ;;  %v6997_v60 = vld [vmem:[#allocation28_spill] sm:$0xff] }
 0x4e7   : > { %v5691_v19 = vmul.f32 %v5573_v18, %v6997_v60  ;;  %v5711_v60 = vmul.f32 %v5573_v18, %v7005_v6  ;;  %v7014_v6 = vld [vmem:[#allocation32_spill] sm:$0xff] }
 0x4e8   : > { %v5729_v28 = vmul.f32 %v5573_v18, %v7014_v6 }
 0x4e9   : > { %6998 = vst [vmem:[#allocation12_spill] sm:$0xff] %v5691_v19 }
 0x4ea   : > { %7006 = vst [vmem:[#allocation99_spill] sm:$0xff] %v5711_v60 }
 0x4f0   : > { %v5713_v25 = vpop.f32.mrf.mxu0 }
 0x4f1   : > { %7007 = vst [vmem:[#allocation105_spill] sm:$0xff] %v5713_v25  ;;  %v1929_v43 = vmul.f32 %v7008_v7, %v5713_v25  ;;  %v1930_v8 = vmul.f32 %v7009_v30, %v5713_v25  ;;  %v1931_v36 = vmul.f32 %v7010_v37, %v5713_v25  ;;  %v1932_v14 = vmul.f32 %v7011_v24, %v5713_v25 }
 0x4f2   : > { %v1933_v7 = vmul.f32 %v7015_v20, %v5713_v25  ;;  %v1934_v30 = vmul.f32 %v7016_v2, %v5713_v25  ;;  %v5737_v24 = vmul.f32 %v5573_v18, %v7017_v4  ;;  %v1935_v57 = vmul.f32 %v7019_v42, %v5713_v25  ;;  %v7028_v42 = vld [vmem:[#allocation43_spill] sm:$0xff] }
 0x4f3   : > { %v1961_v55 = vadd.f32 %v1929_v43, %v1897_v44  ;;  %v1962_v5 = vadd.f32 %v1930_v8, %v1898_v56  ;;  %v1963_v37 = vadd.f32 %v1931_v36, %v1899_v50  ;;  %v1964_v3 = vadd.f32 %v1932_v14, %v1900_v29  ;;  %v7021_v43 = vld [vmem:[#allocation38_spill] sm:$0xff]  ;;  %v7023_v8 = vld [vmem:[#allocation56_spill] sm:$0xff] }
 0x4f4   : > { %7018 = vst [vmem:[#allocation107_spill] sm:$0xff] %v5737_v24  ;;  %v1965_v45 = vadd.f32 %v1933_v7, %v1901_v41  ;;  %v1966_v6 = vadd.f32 %v1934_v30, %v1902_v10  ;;  %v5743_v2 = vmul.f32 %v5573_v18, %v7020_v21  ;;  %v5747_v14 = vmul.f32 %v5573_v18, %v7021_v43  ;;  %v7025_v41 = vld [vmem:[#allocation45_spill] sm:$0xff]  ;;  %v7027_v21 = vld [vmem:[#allocation42_spill] sm:$0xff]  ;;  %v7029_v24 = vld [vmem:[#allocation39_spill] sm:$0xff] }
 0x4f5   : > { %v1993_v53 = vmax.f32 %v1961_v55, 0.0  ;;  %v1994_v11 = vmax.f32 %v1962_v5, 0.0  ;;  %v1995_v47 = vmax.f32 %v1963_v37, 0.0  ;;  %v1996_v20 = vmax.f32 %v1964_v3, 0.0 }
 0x4f6   : > { %7022 = vst [vmem:[#allocation108_spill] sm:$0xff] %v5747_v14  ;;  %v1936_v50 = vmul.f32 %v7023_v8, %v5713_v25  ;;  %v1997_v56 = vmax.f32 %v1965_v45, 0.0  ;;  %v5759_v10 = vmul.f32 %v5573_v18, %v7025_v41  ;;  %v5761_v4 = vadd.f32 %v1935_v57, %v1903_v17  ;;  %v7030_v57 = vld [vmem:[#allocation41_spill] sm:$0xff] }
 0x4f7   : > { %v2025_v36 = vsel %vm395_vm8, %v1993_v53, 0.0  ;;  %v2032_v29 = vsel %vm395_vm8, %v1994_v11, 0.0  ;;  %v2039_v55 = vsel %vm395_vm8, %v1995_v47, 0.0  ;;  %v2046_v3 = vsel %vm395_vm8, %v1996_v20, 0.0 }
 0x4f8   : > { %v2026_v5 = vrot.slane %v2025_v36, 4  ;;  %v2033_v37 = vrot.slane %v2032_v29, 4  ;;  %v2040_v44 = vrot.slane %v2039_v55, 4  ;;  %v2047_v7 = vrot.slane %v2046_v3, 4  ;;  %v5755_v30 = vpop.f32.mrf.mxu0  ;;  %7026 = vst [vmem:[#allocation110_spill] sm:$0xff] %v5759_v10 }
 0x4f9   : > { %7024 = vst [vmem:[#allocation109_spill] sm:$0xff] %v5755_v30  ;;  %v1998_v45 = vmax.f32 %v1966_v6, 0.0  ;;  %v2053_v53 = vsel %vm395_vm8, %v1997_v56, 0.0  ;;  %v5764_v11 = vadd.f32 %v1936_v50, %v1904_v54  ;;  %v1937_v8 = vmul.f32 %v7027_v21, %v5755_v30  ;;  %v7031_v6 = vld [vmem:[#allocation72_spill] sm:$0xff] }
 0x4fa   : > { %v2027_v47 = vadd.f32 %v2026_v5, %v2025_v36  ;;  %v2034_v43 = vadd.f32 %v2033_v37, %v2032_v29  ;;  %v2041_v20 = vadd.f32 %v2040_v44, %v2039_v55  ;;  %v1938_v25 = vmul.f32 %v7028_v42, %v5755_v30  ;;  %v7033_v5 = vld [vmem:[#allocation47_spill] sm:$0xff]  ;;  %v7034_v44 = vld [vmem:[#allocation49_spill] sm:$0xff] }
 0x4fb   : > { %v1939_v41 = vmul.f32 %v7029_v24, %v5755_v30  ;;  %v1940_v17 = vmul.f32 %v7030_v57, %v5755_v30  ;;  %v5776_v56 = vmul.f32 %v5573_v18, %v7031_v6  ;;  %v2048_v50 = vadd.f32 %v2047_v7, %v2046_v3 }
 0x4fc   : > { %v2035_v54 = vrot.slane %v2034_v43, 2  ;;  %v2054_v36 = vrot.slane %v2053_v53, 4  ;;  %v2028_v29 = vrot.slane %v2027_v47, 2  ;;  %v2060_v55 = vsel %vm395_vm8, %v1998_v45, 0.0 }
 0x4fd   : > { %7032 = vst [vmem:[#allocation111_spill] sm:$0xff] %v5776_v56  ;;  %v1941_v37 = vmul.f32 %v7033_v5, %v5755_v30  ;;  %v1942_v42 = vmul.f32 %v7034_v44, %v5755_v30  ;;  %v1999_v24 = vmax.f32 %v5761_v4, 0.0  ;;  %v2000_v57 = vmax.f32 %v5764_v11, 0.0  ;;  %v7035_v4 = vld [vmem:[#allocation51_spill] sm:$0xff] }
 0x4fe   : > { %v2036_v21 = vadd.f32 %v2035_v54, %v2034_v43  ;;  %v2042_v61 = vrot.slane %v2041_v20, 2  ;;  %v1969_v18 = vadd.f32 %v1937_v8, %v5635_v34  ;;  %v1970_v3 = vadd.f32 %v1938_v25, %v5645_v9  ;;  %v7036_v34 = vld [vmem:[#allocation55_spill] sm:$0xff] }
 0x4ff   : > { %v1971_v7 = vadd.f32 %v1939_v41, %v5631_v33  ;;  %v1972_v45 = vadd.f32 %v1940_v17, %v5655_v52  ;;  %v2049_v6 = vrot.slane %v2048_v50, 2  ;;  %v2055_v62 = vadd.f32 %v2054_v36, %v2053_v53 }
 0x500   : > { %v2061_v5 = vrot.slane %v2060_v55, 4  ;;  %v1973_v58 = vadd.f32 %v1941_v37, %v5651_v32  ;;  %v5790_v44 = vadd.f32 %v2028_v29, %v2027_v47  ;;  %v1943_v11 = vmul.f32 %v7035_v4, %v5755_v30 }
 0x501   : > { %v1974_v43 = vadd.f32 %v1942_v42, %v5659_v1  ;;  %v2001_v54 = vmax.f32 %v1969_v18, 0.0  ;;  %v1944_v25 = vmul.f32 %v7036_v34, %v5755_v30  ;;  %v2002_v9 = vmax.f32 %v1970_v3, 0.0 }
 0x502   : > { %v2003_v33 = vmax.f32 %v1971_v7, 0.0  ;;  %v2004_v8 = vmax.f32 %v1972_v45, 0.0  ;;  %v2037_v52 = vrot.slane %v2036_v21, 1  ;;  %v5797_v41 = vadd.f32 %v2042_v61, %v2041_v20 }
 0x503   : > { %v2005_v53 = vmax.f32 %v1973_v58, 0.0  ;;  %v2006_v17 = vmax.f32 %v1974_v43, 0.0  ;;  %v2081_v32 = vsel %vm395_vm8, %v2001_v54, 0.0  ;;  %v2088_v47 = vsel %vm395_vm8, %v2002_v9, 0.0 }
 0x504   : > { %v2095_v36 = vsel %vm395_vm8, %v2003_v33, 0.0  ;;  %v2102_v1 = vsel %vm395_vm8, %v2004_v8, 0.0  ;;  %v2082_v42 = vrot.slane %v2081_v32, 4  ;;  %v2089_v29 = vrot.slane %v2088_v47, 4 }
 0x505   : > { %v2096_v37 = vrot.slane %v2095_v36, 4  ;;  %v2103_v18 = vrot.slane %v2102_v1, 4  ;;  %v1975_v3 = vadd.f32 %v1943_v11, %v5665_v40  ;;  %v1976_v7 = vadd.f32 %v1944_v25, %v5675_v31 }
 0x506   : > { %v2109_v61 = vsel %vm395_vm8, %v2005_v53, 0.0  ;;  %v2062_v58 = vadd.f32 %v2061_v5, %v2060_v55  ;;  %v2083_v20 = vadd.f32 %v2082_v42, %v2081_v32  ;;  %v2090_v45 = vadd.f32 %v2089_v29, %v2088_v47 }
 0x507   : > { %v2097_v43 = vadd.f32 %v2096_v37, %v2095_v36  ;;  %v2116_v54 = vsel %vm395_vm8, %v2006_v17, 0.0  ;;  %v2110_v9 = vrot.slane %v2109_v61, 4  ;;  %v2056_v33 = vrot.slane %v2055_v62, 2 }
 0x508   : > { %v2063_v34 = vrot.slane %v2062_v58, 2  ;;  %v2067_v8 = vsel %vm395_vm8, %v1999_v24, 0.0  ;;  %v2084_v4 = vrot.slane %v2083_v20, 2  ;;  %v2091_v30 = vrot.slane %v2090_v45, 2 }
 0x509   : > { %v2098_v38 = vrot.slane %v2097_v43, 2  ;;  %v2104_v56 = vadd.f32 %v2103_v18, %v2102_v1  ;;  %v2007_v40 = vmax.f32 %v1975_v3, 0.0  ;;  %v2050_v11 = vadd.f32 %v2049_v6, %v2048_v50 }
 0x50a   : > { %v2057_v31 = vadd.f32 %v2056_v33, %v2055_v62  ;;  %v2064_v25 = vadd.f32 %v2063_v34, %v2062_v58  ;;  %v2085_v53 = vadd.f32 %v2084_v4, %v2083_v20  ;;  %v2092_v55 = vadd.f32 %v2091_v30, %v2090_v45 }
 0x50b   : > { %v2111_v5 = vadd.f32 %v2110_v9, %v2109_v61  ;;  %v2068_v32 = vrot.slane %v2067_v8, 4  ;;  %v2008_v47 = vmax.f32 %v1976_v7, 0.0  ;;  %v2099_v36 = vadd.f32 %v2098_v38, %v2097_v43 }
 0x50c   : > { %v2117_v17 = vrot.slane %v2116_v54, 4  ;;  %v2074_v42 = vsel %vm395_vm8, %v2000_v57, 0.0  ;;  %v2030_v29 = vrot.slane %v5790_v44, 1  ;;  %v2038_v24 = vadd.f32 %v2037_v52, %v2036_v21 }
 0x50d   : > { %v2044_v37 = vrot.slane %v5797_v41, 1  ;;  %v2105_v10 = vrot.slane %v2104_v56, 2  ;;  %v2086_v1 = vrot.slane %v2085_v53, 1  ;;  %v2051_v18 = vrot.slane %v2050_v11, 1 }
 0x50e   : > { %v2058_v6 = vrot.slane %v2057_v31, 1  ;;  %v2065_v62 = vrot.slane %v2064_v25, 1  ;;  %v2093_v50 = vrot.slane %v2092_v55, 1  ;;  %v2069_v4 = vadd.f32 %v2068_v32, %v2067_v8 }
 0x50f   : > { %v2075_v30 = vrot.slane %v2074_v42, 4  ;;  %v2112_v34 = vrot.slane %v2111_v5, 2  ;;  %v2100_v3 = vrot.slane %v2099_v36, 1  ;;  %v2118_v7 = vadd.f32 %v2117_v17, %v2116_v54 }
 0x510   : > { %v2123_v38 = vsel %vm395_vm8, %v2007_v40, 0.0  ;;  %v2130_v57 = vsel %vm395_vm8, %v2008_v47, 0.0  ;;  %v2031_v61 = vadd.f32 %v2030_v29, %v5790_v44  ;;  %v2070_v21 = vrot.slane %v2069_v4, 2 }
 0x511   : > { %v2076_v52 = vadd.f32 %v2075_v30, %v2074_v42  ;;  %v2106_v58 = vadd.f32 %v2105_v10, %v2104_v56  ;;  %v2113_v20 = vadd.f32 %v2112_v34, %v2111_v5  ;;  %v2119_v45 = vrot.slane %v2118_v7, 2 }
 0x512   : > { %v2124_v43 = vrot.slane %v2123_v38, 4  ;;  %v2131_v9 = vrot.slane %v2130_v57, 4  ;;  %v2045_v33 = vadd.f32 %v2044_v37, %v5797_v41  ;;  %v2052_v8 = vadd.f32 %v2051_v18, %v2050_v11 }
 0x513   : > { %v2071_v32 = vadd.f32 %v2070_v21, %v2069_v4  ;;  %v2077_v60 = vrot.slane %v2076_v52, 2  ;;  %v2059_v14 = vadd.f32 %v2058_v6, %v2057_v31  ;;  %v2120_v54 = vadd.f32 %v2119_v45, %v2118_v7 }
 0x514   : > { %v2125_v17 = vadd.f32 %v2124_v43, %v2123_v38  ;;  %v2132_v40 = vadd.f32 %v2131_v9, %v2130_v57  ;;  %v2066_v19 = vadd.f32 %v2065_v62, %v2064_v25  ;;  %v2107_v44 = vrot.slane %v2106_v58, 1 }
 0x515   : > { %v2072_v47 = vrot.slane %v2071_v32, 1  ;;  %v2078_v23 = vadd.f32 %v2077_v60, %v2076_v52  ;;  %v2094_v29 = vadd.f32 %v2093_v50, %v2092_v55  ;;  %v2114_v42 = vrot.slane %v2113_v20, 1 }
 0x516   : > { %v2121_v10 = vrot.slane %v2120_v54, 1  ;;  %v2126_v56 = vrot.slane %v2125_v17, 2  ;;  %v2133_v30 = vrot.slane %v2132_v40, 2  ;;  %v2281_v34 = vmul.f32 %v2031_v61, %v6911_v27 }
 0x517   : > { %v2079_v5 = vrot.slane %v2078_v23, 1  ;;  %v2282_v41 = vmul.f32 %v2038_v24, %v6912_v35  ;;  %v2073_v11 = vadd.f32 %v2072_v47, %v2071_v32  ;;  %v2087_v37 = vadd.f32 %v2086_v1, %v2085_v53  ;;  %v7037_v24 = vld [vmem:[#allocation89_spill] sm:$0xff]  ;;  %v7041_v32 = vld [vmem:[#allocation96_spill] sm:$0xff] }
 0x518   : > { %v2101_v31 = vadd.f32 %v2100_v3, %v2099_v36  ;;  %v2127_v18 = vadd.f32 %v2126_v56, %v2125_v17  ;;  %v2108_v4 = vadd.f32 %v2107_v44, %v2106_v58  ;;  %v2134_v25 = vadd.f32 %v2133_v30, %v2132_v40  ;;  %v7038_v36 = vld [vmem:[#allocation66_spill] sm:$0xff]  ;;  %v7039_v58 = vld [vmem:[#allocation67_spill] sm:$0xff] }
 0x519   : > { %v2080_v6 = vadd.f32 %v2079_v5, %v2078_v23  ;;  %v2283_v60 = vmul.f32 %v2045_v33, %v6913_v39  ;;  %v2115_v62 = vadd.f32 %v2114_v42, %v2113_v20  ;;  %v2122_v55 = vadd.f32 %v2121_v10, %v2120_v54  ;;  %v7040_v33 = vld [vmem:[#allocation95_spill] sm:$0xff] }
 0x51a   : > { %v2128_v50 = vrot.slane %v2127_v18, 1  ;;  %v2284_v7 = vmul.f32 %v2052_v8, %v6914_v22  ;;  %v2135_v38 = vrot.slane %v2134_v25, 1  ;;  %v2285_v57 = vmul.f32 %v2059_v14, %v6915_v51 }
 0x51b   : > { %v2286_v61 = vmul.f32 %v2066_v19, %v6916_v13  ;;  %v2290_v21 = vmul.f32 %v2094_v29, %v7037_v24  ;;  %v2287_v1 = vmul.f32 %v2073_v11, %v7038_v36  ;;  %v2289_v23 = vmul.f32 %v2087_v37, %v4792_v48 }
 0x51c   : > { %v2129_v53 = vadd.f32 %v2128_v50, %v2127_v18  ;;  %v2291_v3 = vmul.f32 %v2101_v31, %v6920_v0  ;;  %v2136_v52 = vadd.f32 %v2135_v38, %v2134_v25  ;;  %v2288_v20 = vmul.f32 %v2080_v6, %v7039_v58 }
 0x51d   : > { %v2314_v45 = vpack.c.bf16 %v2282_v41, %v2282_v41  ;;  %v2315_v43 = vpack.c.bf16 %v2283_v60, %v2283_v60  ;;  %v2292_v9 = vmul.f32 %v2108_v4, %v6921_v59  ;;  %v2293_v14 = vmul.f32 %v2115_v62, %v6922_v16 }
 0x51e   : > { %v2294_v19 = vmul.f32 %v2122_v55, %v6923_v63  ;;  %v2295_v8 = vmul.f32 %v2129_v53, %v7040_v33  ;;  %v2296_v54 = vmul.f32 %v2136_v52, %v7041_v32  ;;  %v2313_v17 = vpack.c.bf16 %v2281_v34, %v2281_v34  ;;  %v7069_v33 = vld [vmem:[#allocation62_spill] sm:$0xff] }
 0x51f   : > { %v2316_v40 = vpack.c.bf16 %v2284_v7, %v2284_v7  ;;  %v2322_v47 = vpack.c.bf16 %v2290_v21, %v2290_v21  ;;  %v2317_v44 = vpack.c.bf16 %v2285_v57, %v2285_v57  ;;  %v2318_v29 = vpack.c.bf16 %v2286_v61, %v2286_v61 }
 0x520   : > { %v2319_v42 = vpack.c.bf16 %v2287_v1, %v2287_v1  ;;  %v2323_v10 = vpack.c.bf16 %v2291_v3, %v2291_v3  ;;  %v2320_v56 = vpack.c.bf16 %v2288_v20, %v2288_v20  ;;  %v2321_v5 = vpack.c.bf16 %v2289_v23, %v2289_v23 }
 0x521   : > { %v2382_v30 = vunpack.c.l.b16 %v2314_v45  ;;  %v2383_v41 = vunpack.c.l.b16 %v2315_v43  ;;  %v2324_v11 = vpack.c.bf16 %v2292_v9, %v2292_v9  ;;  %v2325_v37 = vpack.c.bf16 %v2293_v14, %v2293_v14 }
 0x522   : > { %v2326_v31 = vpack.c.bf16 %v2294_v19, %v2294_v19  ;;  %v2327_v18 = vpack.c.bf16 %v2295_v8, %v2295_v8  ;;  %v2328_v6 = vpack.c.bf16 %v2296_v54, %v2296_v54  ;;  %v2381_v4 = vunpack.c.l.b16 %v2313_v17  ;;  %v7042_v54 = vld [vmem:[#allocation83_spill] sm:$0xff] }
 0x523   : > { %v2384_v25 = vunpack.c.l.b16 %v2316_v40  ;;  %v2390_v60 = vunpack.c.l.b16 %v2322_v47  ;;  %v2385_v62 = vunpack.c.l.b16 %v2317_v44  ;;  %v2386_v34 = vunpack.c.l.b16 %v2318_v29  ;;  %v7043_v40 = vld [vmem:[#allocation58_spill] sm:$0xff]  ;;  %v7044_v44 = vld [vmem:[#allocation60_spill] sm:$0xff] }
 0x524   : > { %v2387_v55 = vunpack.c.l.b16 %v2319_v42  ;;  %v2391_v50 = vunpack.c.l.b16 %v2323_v10  ;;  %v2388_v7 = vunpack.c.l.b16 %v2320_v56  ;;  %v2389_v38 = vunpack.c.l.b16 %v2321_v5  ;;  %v7045_v10 = vld [vmem:[#allocation82_spill] sm:$0xff] }
 0x525   : > { %v2413_v57 = vrot.slane %v2382_v30, 7  ;;  %v2415_v61 = vrot.slane %v2383_v41, 6  ;;  %v2392_v21 = vunpack.c.l.b16 %v2324_v11  ;;  %v2393_v53 = vunpack.c.l.b16 %v2325_v37 }
 0x526   : > { %v5831_v1 = vunpack.c.l.b16 %v2326_v31  ;;  %v2427_v23 = vrot.slane %v2390_v60, 7  ;;  %v5833_v3 = vunpack.c.l.b16 %v2327_v18  ;;  %v5835_v52 = vunpack.c.l.b16 %v2328_v6  ;;  %v7046_v6 = vld [vmem:[#allocation80_spill] sm:$0xff] }
 0x527   : > { %v2414_v20 = vsel %vm1479_vm9, %v2413_v57, %v2381_v4  ;;  %v2417_v45 = vrot.slane %v2384_v25, 5  ;;  %v2419_v14 = vrot.slane %v2385_v62, 4  ;;  %v2429_v8 = vrot.slane %v2391_v50, 6  ;;  %v7047_v57 = vld [vmem:[#allocation85_spill] sm:$0xff] }
 0x528   : > { %v2416_v9 = vsel %vm1482_vm10, %v2415_v61, %v2414_v20  ;;  %v2428_v19 = vsel %vm1479_vm9, %v2427_v23, %v2389_v38  ;;  %v2421_v42 = vrot.slane %v2386_v34, 3  ;;  %v2423_v30 = vrot.slane %v2387_v55, 2 }
 0x529   : > { %v2418_v5 = vsel %vm1485_vm11, %v2417_v45, %v2416_v9  ;;  %v2425_v41 = vrot.slane %v2388_v7, 1  ;;  %v2431_v18 = vrot.slane %v2392_v21, 5  ;;  %v2430_v60 = vsel %vm1482_vm10, %v2429_v8, %v2428_v19  ;;  %v7048_v21 = vld [vmem:[#allocation87_spill] sm:$0xff]  ;;  %v7049_v19 = vld [vmem:[#allocation73_spill] sm:$0xff] }
 0x52a   : > { %v5838_v43 = vpop.f32.mrf.mxu0  ;;  %v2420_v25 = vsel %vm1488_vm12, %v2419_v14, %v2418_v5  ;;  %v2433_v62 = vrot.slane %v2393_v53, 4  ;;  %v2435_v55 = vrot.slane %v5831_v1, 3  ;;  %v2437_v7 = vrot.slane %v5833_v3, 2 }
 0x52b   : > { %v1945_v17 = vmul.f32 %v7042_v54, %v5838_v43  ;;  %v1946_v47 = vmul.f32 %v7043_v40, %v5838_v43  ;;  %v1947_v29 = vmul.f32 %v7044_v44, %v5838_v43  ;;  %v1948_v56 = vmul.f32 %v7045_v10, %v5838_v43 }
 0x52c   : > { %v1949_v4 = vmul.f32 %v7046_v6, %v5838_v43  ;;  %v1950_v61 = vmul.f32 %v7047_v57, %v5838_v43  ;;  %v1951_v53 = vmul.f32 %v7048_v21, %v5838_v43 }
 0x52d   : > { %v1977_v11 = vadd.f32 %v1945_v17, %v5671_v49  ;;  %v1978_v37 = vadd.f32 %v1946_v47, %v5695_v26  ;;  %v1979_v31 = vadd.f32 %v1947_v29, %v5703_v46  ;;  %v5860_v49 = vadd.f32 %v1948_v56, %v5729_v28  ;;  %v7050_v17 = vld [vmem:[#allocation57_spill] sm:$0xff]  ;;  %v7051_v29 = vld [vmem:[#allocation59_spill] sm:$0xff]  ;;  %v7052_v56 = vld [vmem:[#allocation70_spill] sm:$0xff] }
 0x52e   : > { %v2422_v26 = vsel %vm1491_vm13, %v2421_v42, %v2420_v25  ;;  %v2432_v46 = vsel %vm1485_vm11, %v2431_v18, %v2430_v60  ;;  %v1981_v1 = vadd.f32 %v1949_v4, %v5743_v2  ;;  %v7054_v18 = vld [vmem:[#allocation12_spill] sm:$0xff] }
 0x52f   : > { %v2009_v34 = vmax.f32 %v1977_v11, 0.0  ;;  %v2010_v50 = vmax.f32 %v1978_v37, 0.0  ;;  %v2011_v38 = vmax.f32 %v1979_v31, 0.0  ;;  %v2424_v20 = vsel %vm1494_vm14, %v2423_v30, %v2422_v26  ;;  %v7053_v37 = vld [vmem:[#allocation10_spill] sm:$0xff]  ;;  %v7055_v25 = vld [vmem:[#allocation108_spill] sm:$0xff] }
 0x530   : > { %v2426_v3 = vsel %vm1497_vm15, %v2425_v41, %v2424_v20  ;;  %v2012_v2 = vmax.f32 %v5860_v49, 0.0  ;;  %v2439_v30 = vrot.slane %v5835_v52, 1  ;;  %v1952_v41 = vmul.f32 %v5097_v12, %v5838_v43 }
 0x531   : > { %v2144_v23 = vsel %vm395_vm8, %v2010_v50, 0.0  ;;  %v2137_v28 = vsel %vm395_vm8, %v2009_v34, 0.0  ;;  %v2151_v45 = vsel %vm395_vm8, %v2011_v38, 0.0  ;;  %v1982_v60 = vadd.f32 %v1950_v61, %v7055_v25  ;;  %v7056_v38 = vld [vmem:[#allocation79_spill] sm:$0xff] }
 0x532   : > { %v5874_v9 = vpop.f32.mrf.mxu0  ;;  %v2145_v14 = vrot.slane %v2144_v23, 4  ;;  %v2138_v34 = vrot.slane %v2137_v28, 4  ;;  %v2152_v50 = vrot.slane %v2151_v45, 4  ;;  %v2434_v26 = vsel %vm1488_vm12, %v2433_v62, %v2432_v46  ;;  %v7060_v62 = vld [vmem:[#allocation110_spill] sm:$0xff] }
 0x533   : > { %v1953_v8 = vmul.f32 %v7049_v19, %v5874_v9  ;;  %v1954_v47 = vmul.f32 %v7050_v17, %v5874_v9  ;;  %v1955_v42 = vmul.f32 %v7051_v29, %v5874_v9  ;;  %v1956_v5 = vmul.f32 %v7052_v56, %v5874_v9  ;;  %v7057_v17 = vld [vmem:[#allocation84_spill] sm:$0xff] }
 0x534   : > { %v1957_v49 = vmul.f32 %v7056_v38, %v5874_v9  ;;  %v2146_v20 = vadd.f32 %v2145_v14, %v2144_v23  ;;  %v2436_v61 = vsel %vm1491_vm13, %v2435_v55, %v2434_v26  ;;  %v1983_v46 = vadd.f32 %v1951_v53, %v7060_v62  ;;  %v7061_v23 = vld [vmem:[#allocation111_spill] sm:$0xff]  ;;  %v7063_v55 = vld [vmem:[#allocation97_spill] sm:$0xff]  ;;  %v7065_v62 = vld [vmem:[#allocation106_spill] sm:$0xff] }
 0x535   : > { %v1985_v11 = vadd.f32 %v1953_v8, %v5681_v15  ;;  %v1986_v31 = vadd.f32 %v1954_v47, %v7053_v37  ;;  %v1987_v4 = vadd.f32 %v1955_v42, %v7054_v18  ;;  %v1958_v15 = vmul.f32 %v7057_v17, %v5874_v9  ;;  %v7058_v8 = vld [vmem:[#allocation86_spill] sm:$0xff]  ;;  %v7059_v42 = vld [vmem:[#allocation99_spill] sm:$0xff] }
 0x536   : > { %v1959_v47 = vmul.f32 %v7058_v8, %v5874_v9  ;;  %v5901_v37 = vadd.f32 %v1956_v5, %v7059_v42  ;;  %v2438_v25 = vsel %vm1494_vm14, %v2437_v7, %v2436_v61  ;;  %v1984_v14 = vadd.f32 %v1952_v41, %v7061_v23  ;;  %v7064_v41 = vld [vmem:[#allocation88_spill] sm:$0xff]  ;;  %v7066_v7 = vld [vmem:[#allocation107_spill] sm:$0xff] }
 0x537   : > { %v2017_v52 = vmax.f32 %v1985_v11, 0.0  ;;  %v2018_v56 = vmax.f32 %v1986_v31, 0.0  ;;  %v2019_v29 = vmax.f32 %v1987_v4, 0.0  ;;  %v7062_v11 = vld [vmem:[#allocation17_spill] sm:$0xff]  ;;  %v2440_v5 = vsel %vm1497_vm15, %v2439_v30, %v2438_v25 }
 0x538   : > { %v5909_v31 = vadd.f32 %v1957_v49, %v7062_v11  ;;  %v2469_v42 = vpack.c.b16 %v2440_v5, %v2426_v3  ;;  %v1960_v26 = vmul.f32 %v7063_v55, %v5874_v9  ;;  %v2014_v17 = vmax.f32 %v1982_v60, 0.0 }
 0x539   : > { %v2193_v18 = vsel %vm395_vm8, %v2017_v52, 0.0  ;;  %v2200_v4 = vsel %vm395_vm8, %v2018_v56, 0.0  ;;  %v2207_v8 = vsel %vm395_vm8, %v2019_v29, 0.0  ;;  %v2013_v52 = vmax.f32 %v1981_v1, 0.0 }
 0x53a   : > { %v2194_v53 = vrot.slane %v2193_v18, 4  ;;  %v5920_v49 = vadd.f32 %v1958_v15, %v7064_v41  ;;  %v5923_v56 = vadd.f32 %v1959_v47, %v7065_v62  ;;  %v2201_v29 = vrot.slane %v2200_v4, 4  ;;  %4216 = vmatmul.msk.bf16.vlgmr.msrb.gmra.mxu3 %vm395_vm8, %v2469_v42 }
 0x53b   : > { %v2208_v23 = vrot.slane %v2207_v8, 4  ;;  %v2015_v3 = vmax.f32 %v1983_v46, 0.0  ;;  %v2016_v30 = vmax.f32 %v1984_v14, 0.0  ;;  %v2139_v1 = vadd.f32 %v2138_v34, %v2137_v28 }
 0x53c   : > { %v5917_v61 = vpop.f32.mrf.mxu2  ;;  %v2147_v60 = vrot.slane %v2146_v20, 2  ;;  %v2153_v11 = vadd.f32 %v2152_v50, %v2151_v45  ;;  %v2158_v5 = vsel %vm395_vm8, %v2012_v2, 0.0  ;;  %v5930_v55 = vadd.f32 %v1960_v26, %v7066_v7 }
 0x53d   : > { %v2159_v15 = vrot.slane %v2158_v5, 4  ;;  %v2165_v47 = vsel %vm395_vm8, %v2013_v52, 0.0  ;;  %v2172_v41 = vsel %vm395_vm8, %v2014_v17, 0.0  ;;  %v2140_v62 = vrot.slane %v2139_v1, 2 }
 0x53e   : > { %v5926_v25 = vpop.f32.mrf.mxu0  ;;  %v2148_v38 = vadd.f32 %v2147_v60, %v2146_v20  ;;  %v2154_v42 = vrot.slane %v2153_v11, 2  ;;  %v2166_v46 = vrot.slane %v2165_v47, 4  ;;  %v2173_v19 = vrot.slane %v2172_v41, 4 }
 0x53f   : > { %v2160_v14 = vadd.f32 %v2159_v15, %v2158_v5  ;;  %v2179_v28 = vsel %vm395_vm8, %v2015_v3, 0.0  ;;  %v2186_v45 = vsel %vm395_vm8, %v2016_v30, 0.0  ;;  %v2202_v34 = vadd.f32 %v2201_v29, %v2200_v4 }
 0x540   : > { %v2141_v2 = vadd.f32 %v2140_v62, %v2139_v1  ;;  %v2155_v50 = vadd.f32 %v2154_v42, %v2153_v11  ;;  %v2167_v26 = vadd.f32 %v2166_v46, %v2165_v47  ;;  %v2174_v12 = vadd.f32 %v2173_v19, %v2172_v41 }
 0x541   : > { %v2161_v7 = vrot.slane %v2160_v14, 2  ;;  %v2180_v21 = vrot.slane %v2179_v28, 4  ;;  %v2187_v52 = vrot.slane %v2186_v45, 4  ;;  %v2021_v17 = vmax.f32 %v5909_v31, 0.0 }
 0x542   : > { %v2022_v20 = vmax.f32 %v5920_v49, 0.0  ;;  %v2149_v60 = vrot.slane %v2148_v38, 1  ;;  %v2168_v57 = vrot.slane %v2167_v26, 2  ;;  %v2175_v6 = vrot.slane %v2174_v12, 2 }
 0x543   : > { %v2162_v15 = vadd.f32 %v2161_v7, %v2160_v14  ;;  %v2181_v3 = vadd.f32 %v2180_v21, %v2179_v28  ;;  %v2188_v10 = vadd.f32 %v2187_v52, %v2186_v45  ;;  %v2142_v30 = vrot.slane %v2141_v2, 1 }
 0x544   : > { %v2576_v5 = vpop.f32.mrf.mxu2  ;;  %v2156_v4 = vrot.slane %v2155_v50, 1  ;;  %v2169_v29 = vadd.f32 %v2168_v57, %v2167_v26  ;;  %v2195_v1 = vadd.f32 %v2194_v53, %v2193_v18  ;;  %v2176_v19 = vadd.f32 %v2175_v6, %v2174_v12 }
 0x545   : > { %v2163_v47 = vrot.slane %v2162_v15, 1  ;;  %v2182_v41 = vrot.slane %v2181_v3, 2  ;;  %v2189_v62 = vrot.slane %v2188_v10, 2  ;;  %v2203_v46 = vrot.slane %v2202_v34, 2 }
 0x546   : > { %v2597_v11 = vpop.f32.mrf.mxu0  ;;  %v2170_v42 = vrot.slane %v2169_v29, 1  ;;  %v2196_v31 = vrot.slane %v2195_v1, 2  ;;  %v2209_v49 = vadd.f32 %v2208_v23, %v2207_v8  ;;  %v2023_v44 = vmax.f32 %v5923_v56, 0.0 }
 0x547   : > { %v2024_v14 = vmax.f32 %v5930_v55, 0.0  ;;  %v2183_v7 = vadd.f32 %v2182_v41, %v2181_v3  ;;  %v2190_v21 = vadd.f32 %v2189_v62, %v2188_v10  ;;  %v2150_v28 = vadd.f32 %v2149_v60, %v2148_v38 }
 0x548   : > { %v2197_v45 = vadd.f32 %v2196_v31, %v2195_v1  ;;  %v2204_v52 = vadd.f32 %v2203_v46, %v2202_v34  ;;  %v2210_v57 = vrot.slane %v2209_v49, 2  ;;  %v2143_v18 = vadd.f32 %v2142_v30, %v2141_v2 }
 0x549   : > { %v2157_v53 = vadd.f32 %v2156_v4, %v2155_v50  ;;  %v2164_v26 = vadd.f32 %v2163_v47, %v2162_v15  ;;  %v7067_v12 = vmax.f32 %v5901_v37, 0.0  ;;  %v2171_v5 = vadd.f32 %v2170_v42, %v2169_v29 }
 0x54a   : > { %v2177_v11 = vrot.slane %v2176_v19, 1  ;;  %v2211_v8 = vadd.f32 %v2210_v57, %v2209_v49  ;;  %v2184_v56 = vrot.slane %v2183_v7, 1  ;;  %v2191_v40 = vrot.slane %v2190_v21, 1 }
 0x54b   : > { %v2214_v6 = vsel %vm395_vm8, %v7067_v12, 0.0  ;;  %v2221_v55 = vsel %vm395_vm8, %v2021_v17, 0.0  ;;  %v2228_v10 = vsel %vm395_vm8, %v2022_v20, 0.0  ;;  %v2198_v38 = vrot.slane %v2197_v45, 1 }
 0x54c   : > { %v2215_v23 = vrot.slane %v2214_v6, 4  ;;  %v2205_v34 = vrot.slane %v2204_v52, 1  ;;  %v2212_v60 = vrot.slane %v2211_v8, 1  ;;  %v2222_v50 = vrot.slane %v2221_v55, 4 }
 0x54d   : > { %v2229_v15 = vrot.slane %v2228_v10, 4  ;;  %v2235_v37 = vsel %vm395_vm8, %v2023_v44, 0.0  ;;  %v2242_v3 = vsel %vm395_vm8, %v2024_v14, 0.0  ;;  %v2178_v30 = vadd.f32 %v2177_v11, %v2176_v19  ;;  %v7068_v14 = vld [vmem:[#allocation3_spill] sm:$0xff] }
 0x54e   : > { %v2216_v2 = vadd.f32 %v2215_v23, %v2214_v6  ;;  %v2236_v29 = vrot.slane %v2235_v37, 4  ;;  %v2243_v1 = vrot.slane %v2242_v3, 4  ;;  %v2185_v47 = vadd.f32 %v2184_v56, %v2183_v7 }
 0x54f   : > { %v2192_v41 = vadd.f32 %v2191_v40, %v2190_v21  ;;  %v2223_v62 = vadd.f32 %v2222_v50, %v2221_v55  ;;  %v2230_v17 = vadd.f32 %v2229_v15, %v2228_v10  ;;  %v2199_v42 = vadd.f32 %v2198_v38, %v2197_v45  ;;  %v7070_v40 = vld [vmem:[#allocation64_spill] sm:$0xff]  ;;  %v7071_v10 = vld [vmem:[#allocation65_spill] sm:$0xff] }
 0x550   : > { %v2217_v4 = vrot.slane %v2216_v2, 2  ;;  %v2237_v31 = vadd.f32 %v2236_v29, %v2235_v37  ;;  %v2244_v46 = vadd.f32 %v2243_v1, %v2242_v3  ;;  %v2206_v49 = vadd.f32 %v2205_v34, %v2204_v52  ;;  %v7072_v34 = vld [vmem:[#allocation91_spill] sm:$0xff] }
 0x551   : > { %v2213_v57 = vadd.f32 %v2212_v60, %v2211_v8  ;;  %v2224_v12 = vrot.slane %v2223_v62, 2  ;;  %v2231_v6 = vrot.slane %v2230_v17, 2  ;;  %v2297_v19 = vmul.f32 %v2143_v18, %v7068_v14  ;;  %v7074_v18 = vld [vmem:[#allocation93_spill] sm:$0xff] }
 0x552   : > { %v2218_v20 = vadd.f32 %v2217_v4, %v2216_v2  ;;  %v2238_v44 = vrot.slane %v2237_v31, 2  ;;  %v2245_v54 = vrot.slane %v2244_v46, 2  ;;  %v2298_v7 = vmul.f32 %v2150_v28, %v7069_v33  ;;  %v7073_v2 = vld [vmem:[#allocation92_spill] sm:$0xff]  ;;  %v7075_v4 = vld [vmem:[#allocation94_spill] sm:$0xff] }
 0x553   : > { %v2225_v11 = vadd.f32 %v2224_v12, %v2223_v62  ;;  %v2232_v32 = vadd.f32 %v2231_v6, %v2230_v17  ;;  %v2299_v21 = vmul.f32 %v2157_v53, %v7070_v40  ;;  %v2300_v38 = vmul.f32 %v2164_v26, %v7071_v10  ;;  %v7076_v53 = vld [vmem:[#allocation76_spill] sm:$0xff]  ;;  %v7077_v17 = vld [vmem:[#allocation78_spill] sm:$0xff]  ;;  %v7080_v6 = vld [vmem:[#allocation81_spill] sm:$0xff] }
 0x554   : > { %v2219_v23 = vrot.slane %v2218_v20, 1  ;;  %v2239_v45 = vadd.f32 %v2238_v44, %v2237_v31  ;;  %v2246_v55 = vadd.f32 %v2245_v54, %v2244_v46  ;;  %v2301_v60 = vmul.f32 %v2171_v5, %v7072_v34  ;;  %v7078_v31 = vld [vmem:[#allocation63_spill] sm:$0xff]  ;;  %v7079_v12 = vld [vmem:[#allocation102_spill] sm:$0xff] }
 0x555   : > { %v2226_v52 = vrot.slane %v2225_v11, 1  ;;  %v2233_v8 = vrot.slane %v2232_v32, 1  ;;  %v2302_v50 = vmul.f32 %v2178_v30, %v7073_v2  ;;  %v2303_v3 = vmul.f32 %v2185_v47, %v7074_v18  ;;  %v7082_v18 = vld [vmem:[#allocation77_spill] sm:$0xff] }
 0x556   : > { %v2220_v56 = vadd.f32 %v2219_v23, %v2218_v20  ;;  %v2240_v15 = vrot.slane %v2239_v45, 1  ;;  %v2247_v37 = vrot.slane %v2246_v55, 1  ;;  %v2304_v29 = vmul.f32 %v2192_v41, %v7075_v4  ;;  %v7081_v23 = vld [vmem:[#allocation69_spill] sm:$0xff] }
 0x557   : > { %v2227_v28 = vadd.f32 %v2226_v52, %v2225_v11  ;;  %v2234_v1 = vadd.f32 %v2233_v8, %v2232_v32  ;;  %v2306_v62 = vmul.f32 %v2206_v49, %v7076_v53  ;;  %v2307_v54 = vmul.f32 %v2213_v57, %v7077_v17  ;;  %v7083_v11 = vld [vmem:[#allocation75_spill] sm:$0xff] }
 0x558   : > { %v2241_v20 = vadd.f32 %v2240_v15, %v2239_v45  ;;  %v2248_v26 = vadd.f32 %v2247_v37, %v2246_v55  ;;  %v2305_v46 = vmul.f32 %v2199_v42, %v7078_v31  ;;  %v2308_v5 = vmul.f32 %v2220_v56, %v7079_v12 }
 0x559   : > { %v2309_v30 = vmul.f32 %v2227_v28, %v7080_v6  ;;  %v2310_v44 = vmul.f32 %v2234_v1, %v7081_v23  ;;  %v2330_v2 = vpack.c.bf16 %v2298_v7, %v2298_v7  ;;  %v2331_v47 = vpack.c.bf16 %v2299_v21, %v2299_v21 }
 0x55a   : > { %v2311_v41 = vmul.f32 %v2241_v20, %v7082_v18  ;;  %v2312_v32 = vmul.f32 %v2248_v26, %v7083_v11  ;;  %v2329_v52 = vpack.c.bf16 %v2297_v19, %v2297_v19  ;;  %v2332_v49 = vpack.c.bf16 %v2300_v38, %v2300_v38 }
 0x55b   : > { %v2333_v8 = vpack.c.bf16 %v2301_v60, %v2301_v60  ;;  %v2334_v57 = vpack.c.bf16 %v2302_v50, %v2302_v50  ;;  %v2338_v45 = vpack.c.bf16 %v2306_v62, %v2306_v62  ;;  %v2339_v55 = vpack.c.bf16 %v2307_v54, %v2307_v54 }
 0x55c   : > { %v2335_v15 = vpack.c.bf16 %v2303_v3, %v2303_v3  ;;  %v2336_v42 = vpack.c.bf16 %v2304_v29, %v2304_v29  ;;  %v2337_v37 = vpack.c.bf16 %v2305_v46, %v2305_v46  ;;  %v2340_v56 = vpack.c.bf16 %v2308_v5, %v2308_v5 }
 0x55d   : > { %v2341_v12 = vpack.c.bf16 %v2309_v30, %v2309_v30  ;;  %v2342_v28 = vpack.c.bf16 %v2310_v44, %v2310_v44  ;;  %v2398_v6 = vunpack.c.l.b16 %v2330_v2  ;;  %v2399_v1 = vunpack.c.l.b16 %v2331_v47 }
 0x55e   : > { %v2343_v7 = vpack.c.bf16 %v2311_v41, %v2311_v41  ;;  %v2344_v21 = vpack.c.bf16 %v2312_v32, %v2312_v32  ;;  %v2397_v23 = vunpack.c.l.b16 %v2329_v52  ;;  %v2400_v20 = vunpack.c.l.b16 %v2332_v49 }
 0x55f   : > { %v2401_v18 = vunpack.c.l.b16 %v2333_v8  ;;  %v2402_v26 = vunpack.c.l.b16 %v2334_v57  ;;  %v2406_v19 = vunpack.c.l.b16 %v2338_v45  ;;  %v2407_v38 = vunpack.c.l.b16 %v2339_v55 }
 0x560   : > { %v2403_v60 = vunpack.c.l.b16 %v2335_v15  ;;  %v2404_v50 = vunpack.c.l.b16 %v2336_v42  ;;  %v2408_v62 = vunpack.c.l.b16 %v2340_v56  ;;  %v2441_v54 = vrot.slane %v2398_v6, 7 }
 0x561   : > { %v2405_v3 = vunpack.c.l.b16 %v2337_v37  ;;  %v2409_v29 = vunpack.c.l.b16 %v2341_v12  ;;  %v2410_v46 = vunpack.c.l.b16 %v2342_v28  ;;  %v2443_v5 = vrot.slane %v2399_v1, 6 }
 0x562   : > { %v2411_v30 = vunpack.c.l.b16 %v2343_v7  ;;  %v2442_v2 = vsel %vm1479_vm9, %v2441_v54, %v2397_v23  ;;  %v2445_v44 = vrot.slane %v2400_v20, 5  ;;  %v2455_v47 = vrot.slane %v2406_v19, 7  ;;  %v2492_v54 = vpop.permute.xlu2 %2491 }
 0x563   : > { %v2412_v41 = vunpack.c.l.b16 %v2344_v21  ;;  %v2444_v32 = vsel %vm1482_vm10, %v2443_v5, %v2442_v2  ;;  %v2447_v52 = vrot.slane %v2401_v18, 4  ;;  %v2457_v49 = vrot.slane %v2407_v38, 6 }
 0x564   : > { %v2446_v8 = vsel %vm1485_vm11, %v2445_v44, %v2444_v32  ;;  %v2449_v57 = vrot.slane %v2402_v26, 3  ;;  %v2456_v45 = vsel %vm1479_vm9, %v2455_v47, %v2405_v3  ;;  %v2459_v6 = vrot.slane %v2408_v62, 5  ;;  %v4318_v47 = vld [vmem:[%s6570_s3 + $0x60] sm:$0xff]  ;;  %v4469_v32 = vld [vmem:[%s6570_s3 + $0x50] sm:$0xff] }
 0x565   : > { %v2448_v12 = vsel %vm1488_vm12, %v2447_v52, %v2446_v8  ;;  %v2451_v55 = vrot.slane %v2403_v60, 2  ;;  %v2458_v15 = vsel %vm1482_vm10, %v2457_v49, %v2456_v45  ;;  %v2461_v42 = vrot.slane %v2409_v29, 4  ;;  %v2494_v29 = vpop.permute.xlu0 %2493  ;;  %2670 = vmatpush.bf16.msrb.mxu1 %v4318_v47  ;;  %2693 = vrot.lane.b32.xlu2 %v4318_v47, %s4484_s19  ;;  %v4470_v52 = vld [vmem:[%s6570_s3 + $0x48] sm:$0xff]  ;;  %v2496_v8 = vpop.permute.xlu1 %2495 }
 0x566   : > { %v2450_v23 = vsel %vm1491_vm13, %v2449_v57, %v2448_v12  ;;  %v2453_v37 = vrot.slane %v2404_v50, 1  ;;  %v2460_v56 = vsel %vm1485_vm11, %v2459_v6, %v2458_v15  ;;  %v2463_v28 = vrot.slane %v2410_v46, 3  ;;  %v7084_v50 = vld [vmem:[#allocation20_spill] sm:$0xff] }
 0x567   : > { %v2452_v18 = vsel %vm1494_vm14, %v2451_v55, %v2450_v23  ;;  %v2462_v1 = vsel %vm1488_vm12, %v2461_v42, %v2460_v56  ;;  %v2465_v7 = vrot.slane %v2411_v30, 2  ;;  %v2467_v26 = vrot.slane %v2412_v41, 1  ;;  %v4317_v41 = vld [vmem:[%s6570_s3 + $0x58] sm:$0xff] }
 0x568   : > { %v2454_v21 = vsel %vm1497_vm15, %v2453_v37, %v2452_v18  ;;  %v2464_v20 = vsel %vm1491_vm13, %v2463_v28, %v2462_v1  ;;  %v7085_v28 = vld [vmem:[#allocation74_spill] sm:$0xff]  ;;  %v2621_v1 = vmul.f32 %v5917_v61, %v4792_v48 }
 0x569   : > { %v2466_v19 = vsel %vm1494_vm14, %v2465_v7, %v2464_v20  ;;  %2671 = vmatpush.bf16.msrb.mxu1 %v4317_v41  ;;  %v2620_v18 = vmul.f32 %v7085_v28, %v6911_v27 }
 0x56a   : > { %v2468_v38 = vsel %vm1497_vm15, %v2467_v26, %v2466_v19  ;;  %v2498_v45 = vpop.permute.xlu2 %2497 }
 0x56b   : > { %v2470_v60 = vpack.c.b16 %v2468_v38, %v2454_v21 }
 0x56d   : > { %4217 = vmatmul.msk.bf16.gmra.mxu3 %vm395_vm8, %v2470_v60  ;;  %2672 = vmatpush.bf16.msrb.mxu1 %v4469_v32 }
 0x571   : > { %2673 = vmatpush.bf16.msrb.mxu1 %v4470_v52 }
 0x57d   : > { %4221 = vmatmul.msk.bf16.vlgmr.msra.gmra.mxu3 %vm1612_vm7, %v7084_v50 }
 0x5bd   : > { %v2518_v62 = vpop.f32.mrf.mxu3 }
 0x5be   : > { %v2519_v3 = vadd.f32 %v2518_v62, %v2492_v54  ;;  %v2622_v62 = vmul.f32 %v5926_v25, %v7068_v14 }
 0x5bf   : > { %v2694_v38 = vpop.permute.xlu2 %2693 }
 0x5c0   : > { %v2528_v30 = vmax.f32 %v2519_v3, 0.0  ;;  %2709 = vmatpush.bf16.msrb.mxu2 %v2694_v38 }
 0x5c5   : > { %v2520_v46 = vpop.f32.mrf.mxu3 }
 0x5c6   : > { %v2521_v5 = vadd.f32 %v2520_v46, %v2494_v29 }
 0x5c8   : > { %v2529_v2 = vmax.f32 %v2521_v5, 0.0 }
 0x5ca   : > { %v4446_v44 = vpack.i.bf16 %v2529_v2, %v2528_v30 }
 0x5cc   : > { %4447 = vrot.lane.b32.xlu0 %v4446_v44, %s4486_s25 }
 0x5d4   : > { %2691 = vrot.lane.b32.xlu0 %v4317_v41, %s4484_s19 }
 0x5f0   : > { %v2523_v49 = vpop.f32.mrf.mxu3 }
 0x5f1   : > { %v2524_v57 = vadd.f32 %v2523_v49, %v2496_v8 }
 0x5f3   : > { %v2530_v55 = vmax.f32 %v2524_v57, 0.0 }
 0x5f8   : > { %v2525_v6 = vpop.f32.mrf.mxu3 }
 0x5f9   : > { %v2526_v12 = vadd.f32 %v2525_v6, %v2498_v45 }
 0x5fb   : > { %v2531_v15 = vmax.f32 %v2526_v12, 0.0 }
 0x5fd   : > { %v4451_v42 = vpack.i.bf16 %v2531_v15, %v2530_v55  ;;  %v4322_v15 = vld [vmem:[%s6570_s3 + $0x88] sm:$0xff] }
 0x5ff   : > { %4452 = vrot.lane.b32.xlu1 %v4451_v42, %s4486_s25 }
 0x600   : > { %v2616_v23 = vpop.f32.mrf.mxu3 }
 0x601   : > { %v2623_v54 = vmul.f32 %v2616_v23, %v7078_v31  ;;  %v7086_v23 = vld [vmem:[#allocation109_spill] sm:$0xff] }
 0x608   : > { %v2618_v37 = vpop.f32.mrf.mxu3 }
 0x63e   : > { %v4448_v56 = vpop.permute.xlu0 %4447 }
 0x63f   : > { %v4450_v7 = vunpack.i.h.bf16 %v4448_v56  ;;  %v4449_v21 = vunpack.i.l.bf16 %v4448_v56 }
 0x641   : > { %v2641_v20 = vsel %vm395_vm8, %v2621_v1, %v4450_v7  ;;  %v2640_v26 = vsel %vm395_vm8, %v2620_v18, %v4449_v21  ;;  %v7087_v18 = vld [vmem:[#allocation105_spill] sm:$0xff]  ;;  %v7088_v21 = vld [vmem:[#allocation90_spill] sm:$0xff] }
 0x642   : > { %v2644_v19 = vpack.c.bf16 %v2641_v20, %v2640_v26  ;;  %v7090_v26 = vld [vmem:[#allocation6_spill] sm:$0xff] }
 0x644   : > { %4230 = vmatmul.msk.bf16.vlgmr.msrb.gmra.mxu1 %vm1729_vm0, %v2644_v19 }
 0x646   : > { %v2692_v30 = vpop.permute.xlu0 %2691 }
 0x647   : > { %2710 = vmatpush.bf16.msrb.mxu2 %v2692_v30  ;;  %v7093_v30 = vld [vmem:[#allocation104_spill] sm:$0xff] }
 0x671   : > { %v4453_v60 = vpop.permute.xlu1 %4452 }
 0x672   : > { %v4455_v3 = vunpack.i.h.bf16 %v4453_v60  ;;  %v4454_v29 = vunpack.i.l.bf16 %v4453_v60 }
 0x674   : > { %v2642_v61 = vsel %vm395_vm8, %v2622_v62, %v4454_v29  ;;  %v2643_v46 = vsel %vm395_vm8, %v2623_v54, %v4455_v3  ;;  %v4246_v54 = vld [vmem:[%s6570_s3 + $0xa0] sm:$0xf] }
 0x675   : > { %v2645_v5 = vpack.c.bf16 %v2643_v46, %v2642_v61  ;;  %v2764_v29 = vunpack.c.l.bf16 %v4246_v54  ;;  %v7092_v46 = vld [vmem:[#allocation61_spill] sm:$0xff] }
 0x677   : > { %4231 = vmatmul.msk.bf16.gmra.mxu1 %vm1729_vm0, %v2645_v5  ;;  %v6036_v61 = vperm.slane %v2764_v29, 0 }
 0x679   : > { %v3259_v5 = vmul.f32 %v6036_v61, %v7092_v46  ;;  %v7100_v46 = vld [vmem:[#allocation8_spill] sm:$0xff] }
 0x6c1   : > { %v2675_v2 = vpop.f32.mrf.mxu1 }
 0x6c2   : > { %v2685_v47 = vmax.f32 %v2675_v2, 0.0  ;;  %v3262_v2 = vmul.f32 %v6036_v61, %v7093_v30 }
 0x6c9   : > { %v2677_v44 = vpop.f32.mrf.mxu1 }
 0x6ca   : > { %v2686_v41 = vmax.f32 %v2677_v44, 0.0  ;;  %v4321_v44 = vld [vmem:[%s6570_s3 + $0x80] sm:$0xff] }
 0x6cc   : > { %v2689_v32 = vpack.c.bf16 %v2686_v41, %v2685_v47 }
 0x6ce   : > { %4232 = vmatmul.msk.bf16.vlgmr.msrb.gmra.mxu2 %vm395_vm8, %v2689_v32 }
 0x6f4   : > { %v2680_v25 = vpop.f32.mrf.mxu1 }
 0x6f5   : > { %v2687_v49 = vmax.f32 %v2680_v25, 0.0 }
 0x6fc   : > { %v2682_v52 = vpop.f32.mrf.mxu1 }
 0x6fd   : > { %v2688_v8 = vmax.f32 %v2682_v52, 0.0 }
 0x6ff   : > { %v2690_v57 = vpack.c.bf16 %v2688_v8, %v2687_v49  ;;  %v4320_v49 = vld [vmem:[%s6570_s3 + $0x78] sm:$0xff] }
 0x700   : > { %2797 = vmatpush.bf16.msra.mxu0 %v4320_v49  ;;  %v7103_v49 = vld [vmem:[#allocation2_spill] sm:$0xff] }
 0x701   : > { %4233 = vmatmul.msk.bf16.gmra.mxu2 %vm395_vm8, %v2690_v57  ;;  %v4319_v57 = vld [vmem:[%s6570_s3 + $0x70] sm:$0xff] }
 0x704   : > { %2798 = vmatpush.bf16.msra.mxu0 %v4319_v57  ;;  %v7104_v57 = vld [vmem:[#allocation4_spill] sm:$0xff] }
 0x751   : > { %v2712_v45 = vpop.f32.mrf.mxu2 }
 0x752   : > { %2726 = vrot.lane.b32.xlu1 %v2712_v45, %s4486_s25  ;;  %v7094_v45 = vld [vmem:[#allocation101_spill] sm:$0xff] }
 0x759   : > { %v2714_v6 = vpop.f32.mrf.mxu2 }
 0x75a   : > { %2728 = vrot.lane.b32.xlu2 %v2714_v6, %s4486_s25 }
 0x784   : > { %v2717_v12 = vpop.f32.mrf.mxu2 }
 0x785   : > { %2730 = vrot.lane.b32.xlu0 %v2717_v12, %s4486_s25  ;;  %v7096_v12 = vld [vmem:[#allocation100_spill] sm:$0xff] }
 0x78c   : > { %v2719_v55 = vpop.f32.mrf.mxu2 }
 0x78d   : > { %2732 = vrot.lane.b32.xlu1 %v2719_v55, %s4486_s25 }
 0x795   : > { %3397 = vrot.lane.b32.xlu1 %v4322_v15, %s4484_s19 }
 0x7b4   : > { %v2729_v42 = vpop.permute.xlu2 %2728 }
 0x7b5   : > { %v2739_v37 = vadd.f32 %v2729_v42, %v7086_v23 }
 0x7b7   : > { %v2743_v28 = vmax.f32 %v2739_v37, 0.0 }
 0x7b9   : > { %v6022_v20 = vadd.f32 %v2743_v28, %v7088_v21 }
 0x7bb   : > { %7089 = vst [vmem:[#allocation89_spill] sm:$0xff] %v6022_v20  ;;  %v3447_v15 = vpack.c.bf16 %v6022_v20, %v6022_v20 }
 0x7bd   : > { %v3472_v37 = vunpack.c.l.b16 %v3447_v15 }
 0x7c4   : > { %v2727_v56 = vpop.permute.xlu1 %2726 }
 0x7c5   : > { %v2738_v1 = vadd.f32 %v2727_v56, %v7087_v18  ;;  %v3473_v56 = vpack.c.b16 %v3472_v37, %v3472_v37  ;;  %v7098_v18 = vld [vmem:[#allocation103_spill] sm:$0xff] }
 0x7c6   : > { %v7108_v37 = vld [vmem:[#allocation11_spill] sm:$0xff] }
 0x7c7   : > { %v2742_v7 = vmax.f32 %v2738_v1, 0.0  ;;  %v3260_v1 = vmul.f32 %v6036_v61, %v7098_v18 }
 0x7c9   : > { %v6025_v19 = vadd.f32 %v2742_v7, %v7090_v26  ;;  %v7099_v26 = vld [vmem:[#allocation68_spill] sm:$0xff] }
 0x7cb   : > { %7091 = vst [vmem:[#allocation66_spill] sm:$0xff] %v6025_v19  ;;  %v2765_v38 = vpack.c.bf16 %v6022_v20, %v6025_v19  ;;  %v3446_v60 = vpack.c.bf16 %v6025_v19, %v6025_v19  ;;  %v7131_v20 = vld [vmem:[#allocation41_spill] sm:$0xff] }
 0x7cd   : > { %2769 = vrot.lane.b32.xlu2 %v2765_v38, %s4484_s19  ;;  %v3451_v62 = vunpack.c.l.b16 %v3446_v60  ;;  %v3261_v38 = vmul.f32 %v6036_v61, %v7099_v26  ;;  %v7112_v26 = vld [vmem:[#allocation54_spill] sm:$0xff] }
 0x7cf   : > { %v3452_v3 = vpack.c.b16 %v3451_v62, %v3451_v62 }
 0x7d1   : > { %3453 = vrot.lane.b32.xlu1 %v3452_v3, %s4484_s19 }
 0x7d5   : > { %3395 = vrot.lane.b32.xlu2 %v4321_v44, %s4484_s19 }
 0x7d9   : > { %3405 = vrot.lane.b32.xlu1 %v3259_v5, %s4484_s19 }
 0x7e1   : > { %3411 = vrot.lane.b32.xlu1 %v3262_v2, %s4484_s19 }
 0x7f7   : > { %v2731_v47 = vpop.permute.xlu0 %2730 }
 0x7f8   : > { %v2740_v41 = vadd.f32 %v2731_v47, %v5838_v43 }
 0x7fa   : > { %v2744_v25 = vmax.f32 %v2740_v41, 0.0  ;;  %v7101_v41 = vld [vmem:[#allocation14_spill] sm:$0xff] }
 0x7fc   : > { %v6057_v6 = vadd.f32 %v2744_v25, %v7094_v45  ;;  %v6098_v45 = vmul.f32 %v6036_v61, %v7104_v57 }
 0x7fe   : > { %7095 = vst [vmem:[#allocation67_spill] sm:$0xff] %v6057_v6  ;;  %v3448_v28 = vpack.c.bf16 %v6057_v6, %v6057_v6 }
 0x7ff   : > { %v2733_v32 = vpop.permute.xlu1 %2732 }
 0x800   : > { %v2741_v52 = vadd.f32 %v2733_v32, %v5874_v9  ;;  %v3493_v7 = vunpack.c.l.b16 %v3448_v28  ;;  %v7109_v28 = vld [vmem:[#allocation13_spill] sm:$0xff] }
 0x801   : > { %v2811_v18 = vmul.f32 %v6036_v61, %v7109_v28 }
 0x802   : > { %v2745_v8 = vmax.f32 %v2741_v52, 0.0  ;;  %v3494_v21 = vpack.c.b16 %v3493_v7, %v3493_v7  ;;  %v7102_v52 = vld [vmem:[#allocation15_spill] sm:$0xff] }
 0x804   : > { %v6060_v55 = vadd.f32 %v2745_v8, %v7096_v12  ;;  %v6094_v8 = vmul.f32 %v6036_v61, %v7103_v49  ;;  %v7105_v12 = vld [vmem:[#allocation5_spill] sm:$0xff] }
 0x806   : > { %7097 = vst [vmem:[#allocation10_spill] sm:$0xff] %v6060_v55  ;;  %v2766_v43 = vpack.c.bf16 %v6060_v55, %v6057_v6  ;;  %v3449_v9 = vpack.c.bf16 %v6060_v55, %v6060_v55  ;;  %v7130_v6 = vld [vmem:[#allocation39_spill] sm:$0xff] }
 0x807   : > { %v3398_v60 = vpop.permute.xlu1 %3397 }
 0x808   : > { %2771 = vrot.lane.b32.xlu0 %v2766_v43, %s4484_s19  ;;  %v3514_v42 = vunpack.c.l.b16 %v3449_v9  ;;  %3429 = vmatpush.bf16.msrb.mxu3 %v3398_v60  ;;  %v2813_v43 = vmul.f32 %v6036_v61, %v7105_v12  ;;  %v7106_v9 = vld [vmem:[#allocation7_spill] sm:$0xff]  ;;  %v7113_v60 = vld [vmem:[#allocation46_spill] sm:$0xff] }
 0x809   : > { %v2812_v15 = vmul.f32 %v6036_v61, %v7106_v9  ;;  %v7120_v9 = vld [vmem:[#allocation18_spill] sm:$0xff] }
 0x80a   : > { %v3515_v23 = vpack.c.b16 %v3514_v42, %v3514_v42  ;;  %v7107_v42 = vld [vmem:[#allocation9_spill] sm:$0xff] }
 0x80c   : > { %3516 = vrot.lane.b32.xlu2 %v3515_v23, %s4484_s19  ;;  %v2814_v23 = vmul.f32 %v6036_v61, %v7107_v42  ;;  %v2822_v42 = vmul.f32 %v6036_v61, %v7120_v9 }
 0x810   : > { %3474 = vrot.lane.b32.xlu0 %v3473_v56, %s4484_s19  ;;  %v2820_v56 = vmul.f32 %v6036_v61, %v7108_v37  ;;  %v7121_v37 = vld [vmem:[#allocation52_spill] sm:$0xff] }
 0x814   : > { %3407 = vrot.lane.b32.xlu2 %v3260_v1, %s4484_s19  ;;  %v7110_v1 = vld [vmem:[#allocation16_spill] sm:$0xff] }
 0x815   : > { %v6112_v7 = vmul.f32 %v6036_v61, %v7110_v1 }
 0x818   : > { %3495 = vrot.lane.b32.xlu0 %v3494_v21, %s4484_s19 }
 0x820   : > { %3409 = vrot.lane.b32.xlu0 %v3261_v38, %s4484_s19 }
 0x827   : > { %v2770_v62 = vpop.permute.xlu2 %2769 }
 0x828   : > { %4255 = vmatmul.msk.bf16.vlgmr.msra.gmra.mxu0 %vm395_vm8, %v2770_v62 }
 0x82f   : > { %v3396_v54 = vpop.permute.xlu2 %3395 }
 0x830   : > { %3430 = vmatpush.bf16.msrb.mxu3 %v3396_v54  ;;  %v7114_v54 = vld [vmem:[#allocation40_spill] sm:$0xff] }
 0x843   : > { %v3454_v3 = vpop.permute.xlu1 %3453 }
 0x844   : > { %v3456_v29 = vsel %vm338_vm1, %v3454_v3, 0 }
 0x845   : > { %3465 = vmatpush.bf16.msra.mxu1 %v3456_v29  ;;  %v7115_v29 = vld [vmem:[#allocation53_spill] sm:$0xff] }
 0x848   : > { %4267 = vmatmul.msk.bf16.vlgmr.msra.gmra.mxu1 %vm1612_vm7, %v7100_v46 }
 0x866   : > { %v3517_v5 = vpop.permute.xlu2 %3516 }
 0x867   : > { %v3519_v30 = vsel %vm338_vm1, %v3517_v5, 0  ;;  %v7116_v5 = vld [vmem:[#allocation21_spill] sm:$0xff] }
 0x868   : > { %3528 = vmatpush.bf16.msra.mxu3 %v3519_v30  ;;  %v2815_v30 = vmul.f32 %v6036_v61, %v7116_v5 }
 0x87a   : > { %v2772_v2 = vpop.permute.xlu0 %2771 }
 0x87b   : > { %4256 = vmatmul.msk.bf16.gmra.mxu0 %vm395_vm8, %v2772_v2  ;;  %v7117_v2 = vld [vmem:[#allocation23_spill] sm:$0xff] }
 0x882   : > { %v3475_v44 = vpop.permute.xlu0 %3474 }
 0x883   : > { %v3477_v47 = vsel %vm338_vm1, %v3475_v44, 0  ;;  %v2816_v44 = vmul.f32 %v6036_v61, %v7117_v2  ;;  %v7122_v2 = vld [vmem:[#allocation19_spill] sm:$0xff] }
 0x884   : > { %3486 = vmatpush.bf16.msra.mxu2 %v3477_v47  ;;  %v7118_v47 = vld [vmem:[#allocation48_spill] sm:$0xff] }
 0x887   : > { %4268 = vmatmul.msk.bf16.vlgmr.msra.gmra.mxu2 %vm1612_vm7, %v7101_v41 }
 0x88a   : > { %v3496_v32 = vpop.permute.xlu0 %3495 }
 0x88b   : > { %v3498_v25 = vsel %vm338_vm1, %v3496_v32, 0  ;;  %v7119_v32 = vld [vmem:[#allocation50_spill] sm:$0xff]  ;;  %vm4028_vm1 = vcmask 31744  }
 0x88c   : > { %3507 = vmatpush.bf16.msrb.mxu0 %v3498_v25 }
 0x88f   : > { %4269 = vmatmul.msk.bf16.vlgmr.msrb.gmra.mxu0 %vm1612_vm7, %v7102_v52 }
 0x8a5   : > { %v6114_v21 = vpop.f32.mrf.mxu0 }
 0x8a6   : > { %7111 = vst [vmem:[#allocation12_spill] sm:$0xff] %v6114_v21  ;;  %v2843_v38 = vmul.f32 %v7112_v26, %v6114_v21  ;;  %v2844_v62 = vmul.f32 %v7113_v60, %v6114_v21  ;;  %v2845_v3 = vmul.f32 %v7114_v54, %v6114_v21  ;;  %v2846_v46 = vmul.f32 %v7115_v29, %v6114_v21 }
 0x8a7   : > { %v2847_v41 = vmul.f32 %v7118_v47, %v6114_v21  ;;  %v2848_v25 = vmul.f32 %v7119_v32, %v6114_v21  ;;  %v2849_v28 = vmul.f32 %v7121_v37, %v6114_v21  ;;  %v2824_v47 = vmul.f32 %v6036_v61, %v7122_v2  ;;  %v7123_v32 = vld [vmem:[#allocation25_spill] sm:$0xff]  ;;  %v7128_v2 = vld [vmem:[#allocation42_spill] sm:$0xff] }
 0x8a8   : > { %v2875_v52 = vadd.f32 %v2843_v38, %v2811_v18  ;;  %v2876_v49 = vadd.f32 %v2844_v62, %v2812_v15  ;;  %v2877_v57 = vadd.f32 %v2845_v3, %v2813_v43  ;;  %v2878_v12 = vadd.f32 %v2846_v46, %v2814_v23  ;;  %v7124_v43 = vld [vmem:[#allocation56_spill] sm:$0xff] }
 0x8a9   : > { %v2879_v1 = vadd.f32 %v2847_v41, %v2815_v30  ;;  %v2880_v26 = vadd.f32 %v2848_v25, %v2816_v44  ;;  %v2817_v15 = vmul.f32 %v6036_v61, %v7123_v32  ;;  %v2850_v23 = vmul.f32 %v7124_v43, %v6114_v21  ;;  %v7129_v43 = vld [vmem:[#allocation43_spill] sm:$0xff] }
 0x8aa   : > { %v2907_v60 = vmax.f32 %v2875_v52, 0.0  ;;  %v2908_v54 = vmax.f32 %v2876_v49, 0.0  ;;  %v2909_v29 = vmax.f32 %v2877_v57, 0.0  ;;  %v2910_v5 = vmax.f32 %v2878_v12, 0.0  ;;  %v7126_v49 = vld [vmem:[#allocation22_spill] sm:$0xff]  ;;  %v7127_v12 = vld [vmem:[#allocation27_spill] sm:$0xff] }
 0x8ab   : > { %v2911_v18 = vmax.f32 %v2879_v1, 0.0  ;;  %v2825_v57 = vmul.f32 %v6036_v61, %v7126_v49  ;;  %v2818_v9 = vmul.f32 %v6036_v61, %v7127_v12  ;;  %v6152_v37 = vadd.f32 %v2849_v28, %v2817_v15  ;;  %v7132_v28 = vld [vmem:[#allocation24_spill] sm:$0xff] }
 0x8ac   : > { %v2939_v38 = vsel %vm395_vm8, %v2907_v60, 0.0  ;;  %v2946_v62 = vsel %vm395_vm8, %v2908_v54, 0.0  ;;  %v2953_v3 = vsel %vm395_vm8, %v2909_v29, 0.0  ;;  %v2960_v46 = vsel %vm395_vm8, %v2910_v5, 0.0 }
 0x8ad   : > { %v2940_v30 = vrot.slane %v2939_v38, 4  ;;  %v2947_v44 = vrot.slane %v2946_v62, 4  ;;  %v2954_v41 = vrot.slane %v2953_v3, 4  ;;  %v2961_v25 = vrot.slane %v2960_v46, 4  ;;  %v6146_v52 = vpop.f32.mrf.mxu0 }
 0x8ae   : > { %7125 = vst [vmem:[#allocation108_spill] sm:$0xff] %v6146_v52  ;;  %v2912_v1 = vmax.f32 %v2880_v26, 0.0  ;;  %v2967_v5 = vsel %vm395_vm8, %v2911_v18, 0.0  ;;  %v2851_v32 = vmul.f32 %v7128_v2, %v6146_v52  ;;  %v2852_v55 = vmul.f32 %v7129_v43, %v6146_v52 }
 0x8af   : > { %v2941_v60 = vadd.f32 %v2940_v30, %v2939_v38  ;;  %v2948_v54 = vadd.f32 %v2947_v44, %v2946_v62  ;;  %v2955_v29 = vadd.f32 %v2954_v41, %v2953_v3  ;;  %v2853_v49 = vmul.f32 %v7130_v6, %v6146_v52  ;;  %v7133_v44 = vld [vmem:[#allocation47_spill] sm:$0xff] }
 0x8b0   : > { %v2854_v12 = vmul.f32 %v7131_v20, %v6146_v52  ;;  %v2826_v26 = vmul.f32 %v6036_v61, %v7132_v28  ;;  %v6165_v15 = vadd.f32 %v2850_v23, %v2818_v9  ;;  %v2962_v62 = vadd.f32 %v2961_v25, %v2960_v46  ;;  %v7134_v20 = vld [vmem:[#allocation49_spill] sm:$0xff] }
 0x8b1   : > { %v2949_v38 = vrot.slane %v2948_v54, 2  ;;  %v2942_v18 = vrot.slane %v2941_v60, 2  ;;  %v2968_v3 = vrot.slane %v2967_v5, 4  ;;  %v2974_v30 = vsel %vm395_vm8, %v2912_v1, 0.0 }
 0x8b2   : > { %v2855_v41 = vmul.f32 %v7133_v44, %v6146_v52  ;;  %v2913_v2 = vmax.f32 %v6152_v37, 0.0  ;;  %v2956_v43 = vrot.slane %v2955_v29, 2  ;;  %v2856_v19 = vmul.f32 %v7134_v20, %v6146_v52  ;;  %v7135_v37 = vld [vmem:[#allocation51_spill] sm:$0xff] }
 0x8b3   : > { %v2950_v6 = vadd.f32 %v2949_v38, %v2948_v54  ;;  %v2883_v28 = vadd.f32 %v2851_v32, %v6098_v45  ;;  %v2884_v23 = vadd.f32 %v2852_v55, %v2820_v56  ;;  %v2885_v9 = vadd.f32 %v2853_v49, %v6094_v8  ;;  %v7136_v8 = vld [vmem:[#allocation55_spill] sm:$0xff] }
 0x8b4   : > { %v2886_v46 = vadd.f32 %v2854_v12, %v2822_v42  ;;  %v2914_v25 = vmax.f32 %v6165_v15, 0.0  ;;  %v2963_v21 = vrot.slane %v2962_v62, 2  ;;  %v2975_v1 = vrot.slane %v2974_v30, 4 }
 0x8b5   : > { %v2887_v50 = vadd.f32 %v2855_v41, %v6112_v7  ;;  %v2943_v44 = vadd.f32 %v2942_v18, %v2941_v60  ;;  %v2969_v11 = vadd.f32 %v2968_v3, %v2967_v5  ;;  %v2857_v54 = vmul.f32 %v7135_v37, %v6146_v52 }
 0x8b6   : > { %v2915_v38 = vmax.f32 %v2883_v28, 0.0  ;;  %v2888_v31 = vadd.f32 %v2856_v19, %v2824_v47  ;;  %v2916_v20 = vmax.f32 %v2884_v23, 0.0  ;;  %v2917_v4 = vmax.f32 %v2885_v9, 0.0 }
 0x8b7   : > { %v2918_v45 = vmax.f32 %v2886_v46, 0.0  ;;  %v2951_v55 = vrot.slane %v2950_v6, 1  ;;  %v2957_v56 = vadd.f32 %v2956_v43, %v2955_v29  ;;  %v2858_v42 = vmul.f32 %v7136_v8, %v6146_v52 }
 0x8b8   : > { %v2919_v32 = vmax.f32 %v2887_v50, 0.0  ;;  %v2995_v49 = vsel %vm395_vm8, %v2915_v38, 0.0  ;;  %v3002_v7 = vsel %vm395_vm8, %v2916_v20, 0.0  ;;  %v3009_v60 = vsel %vm395_vm8, %v2917_v4, 0.0 }
 0x8b9   : > { %v3016_v5 = vsel %vm395_vm8, %v2918_v45, 0.0  ;;  %v2996_v12 = vrot.slane %v2995_v49, 4  ;;  %v3003_v15 = vrot.slane %v3002_v7, 4  ;;  %v3010_v19 = vrot.slane %v3009_v60, 4 }
 0x8ba   : > { %v3017_v47 = vrot.slane %v3016_v5, 4  ;;  %v2944_v18 = vrot.slane %v2943_v44, 1  ;;  %v2889_v3 = vadd.f32 %v2857_v54, %v2825_v57  ;;  %v2920_v41 = vmax.f32 %v2888_v31, 0.0 }
 0x8bb   : > { %v3023_v29 = vsel %vm395_vm8, %v2919_v32, 0.0  ;;  %v2890_v43 = vadd.f32 %v2858_v42, %v2826_v26  ;;  %v2997_v28 = vadd.f32 %v2996_v12, %v2995_v49  ;;  %v3004_v50 = vadd.f32 %v3003_v15, %v3002_v7 }
 0x8bc   : > { %v3011_v23 = vadd.f32 %v3010_v19, %v3009_v60  ;;  %v3018_v9 = vadd.f32 %v3017_v47, %v3016_v5  ;;  %v3024_v46 = vrot.slane %v3023_v29, 4  ;;  %v2964_v37 = vadd.f32 %v2963_v21, %v2962_v62 }
 0x8bd   : > { %v2970_v38 = vrot.slane %v2969_v11, 2  ;;  %v6186_v4 = vadd.f32 %v2951_v55, %v2950_v6  ;;  %v2958_v20 = vrot.slane %v2957_v56, 1  ;;  %v2998_v45 = vrot.slane %v2997_v28, 2 }
 0x8be   : > { %v3005_v8 = vrot.slane %v3004_v50, 2  ;;  %v2921_v52 = vmax.f32 %v2889_v3, 0.0  ;;  %v3012_v17 = vrot.slane %v3011_v23, 2  ;;  %v3030_v57 = vsel %vm395_vm8, %v2920_v41, 0.0 }
 0x8bf   : > { %v2976_v31 = vadd.f32 %v2975_v1, %v2974_v30  ;;  %v2922_v54 = vmax.f32 %v2890_v43, 0.0  ;;  %v2965_v32 = vrot.slane %v2964_v37, 1  ;;  %v2971_v26 = vadd.f32 %v2970_v38, %v2969_v11 }
 0x8c0   : > { %v2981_v42 = vsel %vm395_vm8, %v2913_v2, 0.0  ;;  %v3019_v49 = vrot.slane %v3018_v9, 2  ;;  %v3025_v7 = vadd.f32 %v3024_v46, %v3023_v29  ;;  %v2999_v62 = vadd.f32 %v2998_v45, %v2997_v28 }
 0x8c1   : > { %v2977_v60 = vrot.slane %v2976_v31, 2  ;;  %v2982_v21 = vrot.slane %v2981_v42, 4  ;;  %v3006_v6 = vadd.f32 %v3005_v8, %v3004_v50  ;;  %v3031_v55 = vrot.slane %v3030_v57, 4 }
 0x8c2   : > { %v2988_v5 = vsel %vm395_vm8, %v2914_v25, 0.0  ;;  %v3013_v12 = vadd.f32 %v3012_v17, %v3011_v23  ;;  %v2945_v15 = vadd.f32 %v2944_v18, %v2943_v44  ;;  %v2959_v3 = vadd.f32 %v2958_v20, %v2957_v56 }
 0x8c3   : > { %v2983_v19 = vadd.f32 %v2982_v21, %v2981_v42  ;;  %v2989_v47 = vrot.slane %v2988_v5, 4  ;;  %v2966_v30 = vadd.f32 %v2965_v32, %v2964_v37  ;;  %v2972_v1 = vrot.slane %v2971_v26, 1 }
 0x8c4   : > { %v2978_v41 = vadd.f32 %v2977_v60, %v2976_v31  ;;  %v3020_v29 = vadd.f32 %v3019_v49, %v3018_v9  ;;  %v3026_v46 = vrot.slane %v3025_v7, 2  ;;  %v3000_v38 = vrot.slane %v2999_v62, 1 }
 0x8c5   : > { %v6191_v11 = vpop.f32.mrf.mxu1  ;;  %v2984_v2 = vrot.slane %v2983_v19, 2  ;;  %v2990_v43 = vadd.f32 %v2989_v47, %v2988_v5  ;;  %v3007_v28 = vrot.slane %v3006_v6, 1  ;;  %v3032_v50 = vadd.f32 %v3031_v55, %v3030_v57 }
 0x8c6   : > { %7137 = vst [vmem:[#allocation99_spill] sm:$0xff] %v6191_v11  ;;  %v3037_v45 = vsel %vm395_vm8, %v2921_v52, 0.0  ;;  %v3014_v25 = vrot.slane %v3013_v12, 1  ;;  %v3027_v18 = vadd.f32 %v3026_v46, %v3025_v7  ;;  %v2979_v23 = vrot.slane %v2978_v41, 1 }
 0x8c7   : > { %v2985_v17 = vadd.f32 %v2984_v2, %v2983_v19  ;;  %v2991_v44 = vrot.slane %v2990_v43, 2  ;;  %v3033_v56 = vrot.slane %v3032_v50, 2  ;;  %v3038_v37 = vrot.slane %v3037_v45, 4 }
 0x8c8   : > { %v3044_v20 = vsel %vm395_vm8, %v2922_v54, 0.0  ;;  %v3021_v32 = vrot.slane %v3020_v29, 1  ;;  %v2973_v9 = vadd.f32 %v2972_v1, %v2971_v26  ;;  %v3028_v49 = vrot.slane %v3027_v18, 1 }
 0x8c9   : > { %v2986_v8 = vrot.slane %v2985_v17, 1  ;;  %v2992_v31 = vadd.f32 %v2991_v44, %v2990_v43  ;;  %v3045_v42 = vrot.slane %v3044_v20, 4  ;;  %v3034_v60 = vadd.f32 %v3033_v56, %v3032_v50  ;;  %v7139_v56 = vld [vmem:[#allocation96_spill] sm:$0xff] }
 0x8ca   : > { %v3039_v21 = vadd.f32 %v3038_v37, %v3037_v45  ;;  %v3008_v57 = vadd.f32 %v3007_v28, %v3006_v6  ;;  %v3001_v52 = vadd.f32 %v3000_v38, %v2999_v62  ;;  %v2980_v19 = vadd.f32 %v2979_v23, %v2978_v41  ;;  %v7138_v23 = vld [vmem:[#allocation95_spill] sm:$0xff] }
 0x8cb   : > { %v2993_v55 = vrot.slane %v2992_v31, 1  ;;  %v3046_v5 = vadd.f32 %v3045_v42, %v3044_v20  ;;  %v3015_v47 = vadd.f32 %v3014_v25, %v3013_v12  ;;  %v3035_v7 = vrot.slane %v3034_v60, 1 }
 0x8cc   : > { %v3040_v2 = vrot.slane %v3039_v21, 2  ;;  %v2987_v46 = vadd.f32 %v2986_v8, %v2985_v17  ;;  %v3022_v11 = vadd.f32 %v3021_v32, %v3020_v29  ;;  %v3195_v54 = vmul.f32 %v2945_v15, %v6911_v27 }
 0x8cd   : > { %v3047_v53 = vrot.slane %v3046_v5, 2  ;;  %v3469_v43 = vpop.f32.mrf.mxu1  ;;  %v3029_v44 = vadd.f32 %v3028_v49, %v3027_v18  ;;  %v3196_v26 = vmul.f32 %v6186_v4, %v6912_v35  ;;  %v3197_v6 = vmul.f32 %v2959_v3, %v6913_v39 }
 0x8ce   : > { %v3041_v34 = vadd.f32 %v3040_v2, %v3039_v21  ;;  %v2994_v1 = vadd.f32 %v2993_v55, %v2992_v31  ;;  %v3036_v62 = vadd.f32 %v3035_v7, %v3034_v60  ;;  %v3198_v12 = vmul.f32 %v2966_v30, %v6914_v22 }
 0x8cf   : > { %v3048_v38 = vadd.f32 %v3047_v53, %v3046_v5  ;;  %v3199_v28 = vmul.f32 %v2973_v9, %v6915_v51  ;;  %v3204_v29 = vmul.f32 %v3008_v57, %v7037_v24  ;;  %v3205_v15 = vmul.f32 %v3015_v47, %v6920_v0 }
 0x8d0   : > { %v3042_v41 = vrot.slane %v3041_v34, 1  ;;  %v3200_v45 = vmul.f32 %v2980_v19, %v6916_v13  ;;  %v3201_v25 = vmul.f32 %v2987_v46, %v7038_v36  ;;  %v3203_v35 = vmul.f32 %v3001_v52, %v4792_v48 }
 0x8d1   : > { %v3049_v50 = vrot.slane %v3048_v38, 1  ;;  %v3206_v4 = vmul.f32 %v3022_v11, %v6921_v59  ;;  %v3228_v53 = vpack.c.bf16 %v3196_v26, %v3196_v26  ;;  %v3229_v3 = vpack.c.bf16 %v3197_v6, %v3197_v6 }
 0x8d2   : > { %v3043_v39 = vadd.f32 %v3042_v41, %v3041_v34  ;;  %v3202_v30 = vmul.f32 %v2994_v1, %v7039_v58  ;;  %v3207_v51 = vmul.f32 %v3029_v44, %v6922_v16  ;;  %v3208_v24 = vmul.f32 %v3036_v62, %v6923_v63 }
 0x8d3   : > { %v3050_v22 = vadd.f32 %v3049_v50, %v3048_v38  ;;  %v3227_v0 = vpack.c.bf16 %v3195_v54, %v3195_v54  ;;  %v3230_v17 = vpack.c.bf16 %v3198_v12, %v3198_v12  ;;  %v3236_v18 = vpack.c.bf16 %v3204_v29, %v3204_v29 }
 0x8d4   : > { %v3237_v13 = vpack.c.bf16 %v3205_v15, %v3205_v15  ;;  %v3209_v36 = vmul.f32 %v3043_v39, %v7138_v23  ;;  %v3231_v34 = vpack.c.bf16 %v3199_v28, %v3199_v28  ;;  %v3232_v20 = vpack.c.bf16 %v3200_v45, %v3200_v45 }
 0x8d5   : > { %v3210_v37 = vmul.f32 %v3050_v22, %v7139_v56  ;;  %v3233_v59 = vpack.c.bf16 %v3201_v25, %v3201_v25  ;;  %v3238_v11 = vpack.c.bf16 %v3206_v4, %v3206_v4  ;;  %v3296_v8 = vunpack.c.l.b16 %v3228_v53  ;;  %v7140_v56 = vld [vmem:[#allocation29_spill] sm:$0xff] }
 0x8d6   : > { %v3297_v31 = vunpack.c.l.b16 %v3229_v3  ;;  %v3234_v32 = vpack.c.bf16 %v3202_v30, %v3202_v30  ;;  %v3235_v58 = vpack.c.bf16 %v3203_v35, %v3203_v35  ;;  %v3239_v42 = vpack.c.bf16 %v3207_v51, %v3207_v51 }
 0x8d7   : > { %v3240_v16 = vpack.c.bf16 %v3208_v24, %v3208_v24  ;;  %v3295_v9 = vunpack.c.l.b16 %v3227_v0  ;;  %v3298_v63 = vunpack.c.l.b16 %v3230_v17  ;;  %v3304_v49 = vunpack.c.l.b16 %v3236_v18 }
 0x8d8   : > { %v3305_v60 = vunpack.c.l.b16 %v3237_v13  ;;  %v3241_v21 = vpack.c.bf16 %v3209_v36, %v3209_v36  ;;  %v3242_v57 = vpack.c.bf16 %v3210_v37, %v3210_v37  ;;  %v3299_v55 = vunpack.c.l.b16 %v3231_v34  ;;  %v7141_v34 = vld [vmem:[#allocation31_spill] sm:$0xff] }
 0x8d9   : > { %v3300_v52 = vunpack.c.l.b16 %v3232_v20  ;;  %v3301_v5 = vunpack.c.l.b16 %v3233_v59  ;;  %v3306_v19 = vunpack.c.l.b16 %v3238_v11  ;;  %v3327_v47 = vrot.slane %v3296_v8, 7  ;;  %v7142_v59 = vld [vmem:[#allocation26_spill] sm:$0xff]  ;;  %v7143_v8 = vld [vmem:[#allocation28_spill] sm:$0xff] }
 0x8da   : > { %v3329_v7 = vrot.slane %v3297_v31, 6  ;;  %v3302_v2 = vunpack.c.l.b16 %v3234_v32  ;;  %v3303_v46 = vunpack.c.l.b16 %v3235_v58  ;;  %v3307_v54 = vunpack.c.l.b16 %v3239_v42  ;;  %v7144_v32 = vld [vmem:[#allocation30_spill] sm:$0xff]  ;;  %v7145_v42 = vld [vmem:[#allocation35_spill] sm:$0xff] }
 0x8db   : > { %v3308_v43 = vunpack.c.l.b16 %v3240_v16  ;;  %v3328_v44 = vsel %vm1479_vm9, %v3327_v47, %v3295_v9  ;;  %v3331_v26 = vrot.slane %v3298_v63, 5  ;;  %v3341_v6 = vrot.slane %v3304_v49, 7  ;;  %v7146_v9 = vld [vmem:[#allocation33_spill] sm:$0xff]  ;;  %v7147_v49 = vld [vmem:[#allocation32_spill] sm:$0xff] }
 0x8dc   : > { %v3343_v1 = vrot.slane %v3305_v60, 6  ;;  %v3309_v62 = vunpack.c.l.b16 %v3241_v21  ;;  %v3310_v38 = vunpack.c.l.b16 %v3242_v57  ;;  %v3330_v12 = vsel %vm1482_vm10, %v3329_v7, %v3328_v44  ;;  %v7148_v57 = vld [vmem:[#allocation83_spill] sm:$0xff]  ;;  %v7151_v7 = vld [vmem:[#allocation82_spill] sm:$0xff] }
 0x8dd   : > { %v3333_v41 = vrot.slane %v3299_v55, 4  ;;  %v3332_v28 = vsel %vm1485_vm11, %v3331_v26, %v3330_v12  ;;  %v3335_v29 = vrot.slane %v3300_v52, 3  ;;  %v3342_v15 = vsel %vm1479_vm9, %v3341_v6, %v3303_v46  ;;  %v7149_v52 = vld [vmem:[#allocation58_spill] sm:$0xff]  ;;  %v7152_v46 = vld [vmem:[#allocation37_spill] sm:$0xff]  ;;  %v7154_v26 = vld [vmem:[#allocation80_spill] sm:$0xff] }
 0x8de   : > { %v3345_v50 = vrot.slane %v3306_v19, 5  ;;  %v3337_v25 = vrot.slane %v3301_v5, 2  ;;  %v3344_v35 = vsel %vm1482_vm10, %v3343_v1, %v3342_v15  ;;  %v3347_v39 = vrot.slane %v3307_v54, 4  ;;  %v7150_v19 = vld [vmem:[#allocation60_spill] sm:$0xff]  ;;  %v7155_v1 = vld [vmem:[#allocation85_spill] sm:$0xff] }
 0x8df   : > { %v3334_v45 = vsel %vm1488_vm12, %v3333_v41, %v3332_v28  ;;  %v3339_v53 = vrot.slane %v3302_v2, 1  ;;  %v3349_v22 = vrot.slane %v3308_v43, 3  ;;  %v3351_v24 = vrot.slane %v3309_v62, 2  ;;  %v7153_v43 = vld [vmem:[#allocation36_spill] sm:$0xff] }
 0x8e0   : > { %v3336_v4 = vsel %vm1491_vm13, %v3335_v29, %v3334_v45  ;;  %v3346_v3 = vsel %vm1485_vm11, %v3345_v50, %v3344_v35  ;;  %v3353_v18 = vrot.slane %v3310_v38, 1  ;;  %v2827_v37 = vmul.f32 %v6036_v61, %v7140_v56  ;;  %v7156_v29 = vld [vmem:[#allocation34_spill] sm:$0xff]  ;;  %v7157_v50 = vld [vmem:[#allocation87_spill] sm:$0xff] }
 0x8e1   : > { %v3338_v30 = vsel %vm1494_vm14, %v3337_v25, %v3336_v4  ;;  %v3348_v51 = vsel %vm1488_vm12, %v3347_v39, %v3346_v3  ;;  %v2835_v20 = vmul.f32 %v6036_v61, %v7141_v34  ;;  %v2836_v11 = vmul.f32 %v6036_v61, %v7142_v59  ;;  %v7158_v35 = vld [vmem:[#allocation98_spill] sm:$0xff]  ;;  %v7159_v4 = vld [vmem:[#allocation44_spill] sm:$0xff] }
 0x8e2   : > { %v3340_v0 = vsel %vm1497_vm15, %v3339_v53, %v3338_v30  ;;  %v3350_v17 = vsel %vm1491_vm13, %v3349_v22, %v3348_v51  ;;  %v2837_v31 = vmul.f32 %v6036_v61, %v7143_v8  ;;  %v2828_v58 = vmul.f32 %v6036_v61, %v7144_v32  ;;  %v7160_v3 = vld [vmem:[#allocation38_spill] sm:$0xff] }
 0x8e3   : > { %v3352_v13 = vsel %vm1494_vm14, %v3351_v24, %v3350_v17  ;;  %v2839_v16 = vmul.f32 %v6036_v61, %v7145_v42  ;;  %v2829_v63 = vmul.f32 %v6036_v61, %v7146_v9  ;;  %v2830_v60 = vmul.f32 %v6036_v61, %v7147_v49  ;;  %v7161_v24 = vld [vmem:[#allocation45_spill] sm:$0xff]  ;;  %v7162_v17 = vld [vmem:[#allocation72_spill] sm:$0xff] }
 0x8e4   : > { %v3354_v23 = vsel %vm1497_vm15, %v3353_v18, %v3352_v13  ;;  %v2840_v54 = vmul.f32 %v6036_v61, %v7152_v46  ;;  %v2831_v44 = vmul.f32 %v6036_v61, %v7153_v43  ;;  %v2838_v15 = vmul.f32 %v6036_v61, %v7156_v29  ;;  %v7169_v43 = vld [vmem:[#allocation84_spill] sm:$0xff] }
 0x8e5   : > { %v3383_v36 = vpack.c.b16 %v3354_v23, %v3340_v0  ;;  %v2841_v53 = vmul.f32 %v6036_v61, %v7159_v4  ;;  %v2832_v22 = vmul.f32 %v6036_v61, %v7160_v3  ;;  %v2833_v0 = vmul.f32 %v6036_v61, %v7161_v24 }
 0x8e6   : > { %v2834_v18 = vmul.f32 %v6036_v61, %v7162_v17 }
 0x8e7   : > { %4265 = vmatmul.msk.bf16.vlgmr.msrb.gmra.mxu3 %vm395_vm8, %v3383_v36  ;;  %v7163_v36 = vld [vmem:[#allocation71_spill] sm:$0xff] }
 0x8e8   : > { %v2842_v56 = vmul.f32 %v6036_v61, %v7163_v36  ;;  %v7166_v61 = vld [vmem:[#allocation59_spill] sm:$0xff] }
 0x8f8   : > { %v6243_v21 = vpop.f32.mrf.mxu0 }
 0x8f9   : > { %v2859_v55 = vmul.f32 %v7148_v57, %v6243_v21  ;;  %v2860_v5 = vmul.f32 %v7149_v52, %v6243_v21  ;;  %v2861_v47 = vmul.f32 %v7150_v19, %v6243_v21  ;;  %v2862_v2 = vmul.f32 %v7151_v7, %v6243_v21  ;;  %v7167_v52 = vld [vmem:[#allocation70_spill] sm:$0xff]  ;;  %v7168_v7 = vld [vmem:[#allocation79_spill] sm:$0xff] }
 0x8fa   : > { %v2863_v6 = vmul.f32 %v7154_v26, %v6243_v21  ;;  %v2864_v62 = vmul.f32 %v7155_v1, %v6243_v21  ;;  %v2865_v45 = vmul.f32 %v7157_v50, %v6243_v21  ;;  %v2866_v39 = vmul.f32 %v7158_v35, %v6243_v21 }
 0x8fb   : > { %v2891_v38 = vadd.f32 %v2859_v55, %v2827_v37  ;;  %v2892_v12 = vadd.f32 %v2860_v5, %v2828_v58  ;;  %v2893_v41 = vadd.f32 %v2861_v47, %v2829_v63  ;;  %v2894_v28 = vadd.f32 %v2862_v2, %v2830_v60  ;;  %v7164_v63 = vld [vmem:[#allocation73_spill] sm:$0xff] }
 0x8fc   : > { %v2895_v25 = vadd.f32 %v2863_v6, %v2831_v44  ;;  %v2896_v59 = vadd.f32 %v2864_v62, %v2832_v22  ;;  %v2897_v58 = vadd.f32 %v2865_v45, %v2833_v0  ;;  %v6281_v42 = vadd.f32 %v2866_v39, %v2834_v18  ;;  %v7165_v60 = vld [vmem:[#allocation57_spill] sm:$0xff]  ;;  %v7170_v62 = vld [vmem:[#allocation86_spill] sm:$0xff] }
 0x8fd   : > { %v2923_v30 = vmax.f32 %v2891_v38, 0.0  ;;  %v2924_v51 = vmax.f32 %v2892_v12, 0.0  ;;  %v2925_v13 = vmax.f32 %v2893_v41, 0.0  ;;  %v2926_v23 = vmax.f32 %v2894_v28, 0.0  ;;  %v7171_v41 = vld [vmem:[#allocation97_spill] sm:$0xff] }
 0x8fe   : > { %v2927_v9 = vmax.f32 %v2895_v25, 0.0  ;;  %v2928_v29 = vmax.f32 %v2896_v59, 0.0  ;;  %v2929_v3 = vmax.f32 %v2897_v58, 0.0 }
 0x8ff   : > { %v3051_v37 = vsel %vm395_vm8, %v2923_v30, 0.0  ;;  %v3058_v34 = vsel %vm395_vm8, %v2924_v51, 0.0  ;;  %v3065_v47 = vsel %vm395_vm8, %v2925_v13, 0.0  ;;  %v3072_v46 = vsel %vm395_vm8, %v2926_v23, 0.0 }
 0x900   : > { %v3059_v8 = vrot.slane %v3058_v34, 4  ;;  %v6279_v32 = vpop.f32.mrf.mxu0  ;;  %v3052_v19 = vrot.slane %v3051_v37, 4  ;;  %v3066_v45 = vrot.slane %v3065_v47, 4  ;;  %v3073_v35 = vrot.slane %v3072_v46, 4 }
 0x901   : > { %v2867_v49 = vmul.f32 %v7164_v63, %v6279_v32  ;;  %v2868_v57 = vmul.f32 %v7165_v60, %v6279_v32  ;;  %v2869_v55 = vmul.f32 %v7166_v61, %v6279_v32  ;;  %v2870_v5 = vmul.f32 %v7167_v52, %v6279_v32 }
 0x902   : > { %v2871_v2 = vmul.f32 %v7168_v7, %v6279_v32  ;;  %v2872_v44 = vmul.f32 %v7169_v43, %v6279_v32  ;;  %v2873_v38 = vmul.f32 %v7170_v62, %v6279_v32  ;;  %v2874_v28 = vmul.f32 %v7171_v41, %v6279_v32 }
 0x903   : > { %v2899_v26 = vadd.f32 %v2867_v49, %v2835_v20  ;;  %v2900_v6 = vadd.f32 %v2868_v57, %v2836_v11  ;;  %v2901_v1 = vadd.f32 %v2869_v55, %v2837_v31  ;;  %v6299_v12 = vadd.f32 %v2870_v5, %v2838_v15 }
 0x904   : > { %v3060_v50 = vadd.f32 %v3059_v8, %v3058_v34  ;;  %v6303_v39 = vadd.f32 %v2871_v2, %v2839_v16  ;;  %v2930_v20 = vmax.f32 %v6281_v42, 0.0  ;;  %v6307_v22 = vadd.f32 %v2872_v44, %v2840_v54 }
 0x905   : > { %v2932_v25 = vmax.f32 %v2900_v6, 0.0  ;;  %v2931_v4 = vmax.f32 %v2899_v26, 0.0  ;;  %v2933_v11 = vmax.f32 %v2901_v1, 0.0  ;;  %v3053_v15 = vadd.f32 %v3052_v19, %v3051_v37 }
 0x906   : > { %v2934_v30 = vmax.f32 %v6299_v12, 0.0  ;;  %v6310_v24 = vadd.f32 %v2873_v38, %v2841_v53  ;;  %v6312_v0 = vadd.f32 %v2874_v28, %v2842_v56  ;;  %v3061_v16 = vrot.slane %v3060_v50, 2 }
 0x907   : > { %v3114_v31 = vsel %vm395_vm8, %v2932_v25, 0.0  ;;  %v3054_v17 = vrot.slane %v3053_v15, 2  ;;  %v3067_v18 = vadd.f32 %v3066_v45, %v3065_v47  ;;  %v3074_v13 = vadd.f32 %v3073_v35, %v3072_v46 }
 0x908   : > { %v3115_v51 = vrot.slane %v3114_v31, 4  ;;  %v3107_v23 = vsel %vm395_vm8, %v2931_v4, 0.0  ;;  %v3079_v34 = vsel %vm395_vm8, %v2927_v9, 0.0  ;;  %v3086_v54 = vsel %vm395_vm8, %v2928_v29, 0.0 }
 0x909   : > { %v3093_v37 = vsel %vm395_vm8, %v2929_v3, 0.0  ;;  %v3121_v59 = vsel %vm395_vm8, %v2933_v11, 0.0  ;;  %v2935_v53 = vmax.f32 %v6303_v39, 0.0  ;;  %v3055_v56 = vadd.f32 %v3054_v17, %v3053_v15 }
 0x90a   : > { %v6315_v36 = vpop.f32.mrf.mxu2  ;;  %v3068_v8 = vrot.slane %v3067_v18, 2  ;;  %v3075_v42 = vrot.slane %v3074_v13, 2  ;;  %v3080_v63 = vrot.slane %v3079_v34, 4  ;;  %v3087_v49 = vrot.slane %v3086_v54, 4 }
 0x90b   : > { %v3094_v60 = vrot.slane %v3093_v37, 4  ;;  %v3108_v57 = vrot.slane %v3107_v23, 4  ;;  %v3116_v61 = vadd.f32 %v3115_v51, %v3114_v31  ;;  %v3062_v55 = vadd.f32 %v3061_v16, %v3060_v50 }
 0x90c   : > { %v6322_v58 = vpop.f32.mrf.mxu0  ;;  %v3069_v9 = vadd.f32 %v3068_v8, %v3067_v18  ;;  %v3076_v52 = vadd.f32 %v3075_v42, %v3074_v13  ;;  %v3081_v5 = vadd.f32 %v3080_v63, %v3079_v34  ;;  %v3088_v19 = vadd.f32 %v3087_v49, %v3086_v54 }
 0x90d   : > { %v3095_v47 = vadd.f32 %v3094_v60, %v3093_v37  ;;  %v3122_v7 = vrot.slane %v3121_v59, 4  ;;  %v2936_v2 = vmax.f32 %v6307_v22, 0.0  ;;  %v2937_v46 = vmax.f32 %v6310_v24, 0.0 }
 0x90e   : > { %v3100_v43 = vsel %vm395_vm8, %v2930_v20, 0.0  ;;  %v3056_v44 = vrot.slane %v3055_v56, 1  ;;  %v3082_v26 = vrot.slane %v3081_v5, 2  ;;  %v3089_v6 = vrot.slane %v3088_v19, 2 }
 0x90f   : > { %v3096_v1 = vrot.slane %v3095_v47, 2  ;;  %v3063_v62 = vrot.slane %v3062_v55, 1  ;;  %v3101_v38 = vrot.slane %v3100_v43, 4  ;;  %v3109_v12 = vadd.f32 %v3108_v57, %v3107_v23 }
 0x910   : > { %v3117_v41 = vrot.slane %v3116_v61, 2  ;;  %v3070_v28 = vrot.slane %v3069_v9, 1  ;;  %v3077_v29 = vrot.slane %v3076_v52, 1  ;;  %v3083_v50 = vadd.f32 %v3082_v26, %v3081_v5 }
 0x911   : > { %v3090_v45 = vadd.f32 %v3089_v6, %v3088_v19  ;;  %v3097_v35 = vadd.f32 %v3096_v1, %v3095_v47  ;;  %v3102_v39 = vadd.f32 %v3101_v38, %v3100_v43  ;;  %v3110_v4 = vrot.slane %v3109_v12, 2 }
 0x912   : > { %v3490_v25 = vpop.f32.mrf.mxu2  ;;  %v3123_v3 = vadd.f32 %v3122_v7, %v3121_v59  ;;  %v2938_v11 = vmax.f32 %v6312_v0, 0.0  ;;  %v3057_v20 = vadd.f32 %v3056_v44, %v3055_v56  ;;  %v3118_v31 = vadd.f32 %v3117_v41, %v3116_v61 }
 0x913   : > { %v3128_v22 = vsel %vm395_vm8, %v2934_v30, 0.0  ;;  %v3084_v51 = vrot.slane %v3083_v50, 1  ;;  %v3103_v24 = vrot.slane %v3102_v39, 2  ;;  %v3111_v17 = vadd.f32 %v3110_v4, %v3109_v12 }
 0x914   : > { %v3511_v15 = vpop.f32.mrf.mxu0  ;;  %v3124_v16 = vrot.slane %v3123_v3, 2  ;;  %v3064_v18 = vadd.f32 %v3063_v62, %v3062_v55  ;;  %v3071_v13 = vadd.f32 %v3070_v28, %v3069_v9  ;;  %v3078_v23 = vadd.f32 %v3077_v29, %v3076_v52 }
 0x915   : > { %v3129_v34 = vrot.slane %v3128_v22, 4  ;;  %v3091_v54 = vrot.slane %v3090_v45, 1  ;;  %v3098_v37 = vrot.slane %v3097_v35, 1  ;;  %v3104_v8 = vadd.f32 %v3103_v24, %v3102_v39 }
 0x916   : > { %v3125_v42 = vadd.f32 %v3124_v16, %v3123_v3  ;;  %v3135_v0 = vsel %vm395_vm8, %v2935_v53, 0.0  ;;  %v3142_v56 = vsel %vm395_vm8, %v2936_v2, 0.0  ;;  %v3149_v30 = vsel %vm395_vm8, %v2937_v46, 0.0 }
 0x917   : > { %v3130_v59 = vadd.f32 %v3129_v34, %v3128_v22  ;;  %v3085_v63 = vadd.f32 %v3084_v51, %v3083_v50  ;;  %v3112_v49 = vrot.slane %v3111_v17, 1  ;;  %v3119_v60 = vrot.slane %v3118_v31, 1 }
 0x918   : > { %v3136_v57 = vrot.slane %v3135_v0, 4  ;;  %v3143_v55 = vrot.slane %v3142_v56, 4  ;;  %v3150_v9 = vrot.slane %v3149_v30, 4  ;;  %v3156_v52 = vsel %vm395_vm8, %v2938_v11, 0.0 }
 0x919   : > { %v3131_v61 = vrot.slane %v3130_v59, 2  ;;  %v3105_v5 = vrot.slane %v3104_v8, 1  ;;  %v3126_v19 = vrot.slane %v3125_v42, 1  ;;  %v3157_v7 = vrot.slane %v3156_v52, 4 }
 0x91a   : > { %v3137_v47 = vadd.f32 %v3136_v57, %v3135_v0  ;;  %v3092_v43 = vadd.f32 %v3091_v54, %v3090_v45  ;;  %v3144_v53 = vadd.f32 %v3143_v55, %v3142_v56  ;;  %v3151_v26 = vadd.f32 %v3150_v9, %v3149_v30  ;;  %v7176_v56 = vld [vmem:[#allocation78_spill] sm:$0xff]  ;;  %v7181_v9 = vld [vmem:[#allocation69_spill] sm:$0xff] }
 0x91b   : > { %v3132_v44 = vadd.f32 %v3131_v61, %v3130_v59  ;;  %v3099_v2 = vadd.f32 %v3098_v37, %v3097_v35  ;;  %v3120_v6 = vadd.f32 %v3119_v60, %v3118_v31  ;;  %v3158_v1 = vadd.f32 %v3157_v7, %v3156_v52  ;;  %v7173_v37 = vld [vmem:[#allocation92_spill] sm:$0xff]  ;;  %v7178_v60 = vld [vmem:[#allocation102_spill] sm:$0xff]  ;;  %v7180_v61 = vld [vmem:[#allocation81_spill] sm:$0xff] }
 0x91c   : > { %v3138_v46 = vrot.slane %v3137_v47, 2  ;;  %v3113_v62 = vadd.f32 %v3112_v49, %v3111_v17  ;;  %v3145_v12 = vrot.slane %v3144_v53, 2  ;;  %v3152_v41 = vrot.slane %v3151_v26, 2  ;;  %v7172_v17 = vld [vmem:[#allocation91_spill] sm:$0xff] }
 0x91d   : > { %v3133_v38 = vrot.slane %v3132_v44, 1  ;;  %v3106_v28 = vadd.f32 %v3105_v5, %v3104_v8  ;;  %v3127_v29 = vadd.f32 %v3126_v19, %v3125_v42  ;;  %v3159_v25 = vrot.slane %v3158_v1, 2  ;;  %v7174_v42 = vld [vmem:[#allocation76_spill] sm:$0xff]  ;;  %v7182_v19 = vld [vmem:[#allocation77_spill] sm:$0xff]  ;;  %v7183_v7 = vld [vmem:[#allocation75_spill] sm:$0xff] }
 0x91e   : > { %v3139_v50 = vadd.f32 %v3138_v46, %v3137_v47  ;;  %v3146_v39 = vadd.f32 %v3145_v12, %v3144_v53  ;;  %v3153_v4 = vadd.f32 %v3152_v41, %v3151_v26  ;;  %v3211_v3 = vmul.f32 %v3057_v20, %v7068_v14 }
 0x91f   : > { %v3212_v45 = vmul.f32 %v3064_v18, %v7069_v33  ;;  %v3134_v11 = vadd.f32 %v3133_v38, %v3132_v44  ;;  %v3160_v35 = vadd.f32 %v3159_v25, %v3158_v1  ;;  %v3213_v31 = vmul.f32 %v3071_v13, %v7070_v40  ;;  %v7175_v33 = vld [vmem:[#allocation93_spill] sm:$0xff]  ;;  %v7177_v40 = vld [vmem:[#allocation94_spill] sm:$0xff] }
 0x920   : > { %v3140_v22 = vrot.slane %v3139_v50, 1  ;;  %v3147_v15 = vrot.slane %v3146_v39, 1  ;;  %v3154_v51 = vrot.slane %v3153_v4, 1  ;;  %v3214_v24 = vmul.f32 %v3078_v23, %v7071_v10  ;;  %v7179_v23 = vld [vmem:[#allocation63_spill] sm:$0xff] }
 0x921   : > { %v3215_v16 = vmul.f32 %v3085_v63, %v7172_v17  ;;  %v3161_v54 = vrot.slane %v3160_v35, 1  ;;  %v3216_v8 = vmul.f32 %v3092_v43, %v7173_v37  ;;  %v3220_v59 = vmul.f32 %v3120_v6, %v7174_v42 }
 0x922   : > { %v3141_v34 = vadd.f32 %v3140_v22, %v3139_v50  ;;  %v3148_v20 = vadd.f32 %v3147_v15, %v3146_v39  ;;  %v3155_v0 = vadd.f32 %v3154_v51, %v3153_v4  ;;  %v3217_v18 = vmul.f32 %v3099_v2, %v7175_v33 }
 0x923   : > { %v3221_v30 = vmul.f32 %v3127_v29, %v7176_v56  ;;  %v3162_v49 = vadd.f32 %v3161_v54, %v3160_v35  ;;  %v3218_v13 = vmul.f32 %v3106_v28, %v7177_v40  ;;  %v3222_v57 = vmul.f32 %v3134_v11, %v7178_v60 }
 0x924   : > { %v3244_v10 = vpack.c.bf16 %v3212_v45, %v3212_v45  ;;  %v3219_v63 = vmul.f32 %v3113_v62, %v7179_v23  ;;  %v3223_v55 = vmul.f32 %v3141_v34, %v7180_v61  ;;  %v3224_v52 = vmul.f32 %v3148_v20, %v7181_v9 }
 0x925   : > { %v3245_v5 = vpack.c.bf16 %v3213_v31, %v3213_v31  ;;  %v3225_v47 = vmul.f32 %v3155_v0, %v7182_v19  ;;  %v3226_v43 = vmul.f32 %v3162_v49, %v7183_v7  ;;  %v3246_v44 = vpack.c.bf16 %v3214_v24, %v3214_v24 }
 0x926   : > { %v3252_v53 = vpack.c.bf16 %v3220_v59, %v3220_v59  ;;  %v3243_v26 = vpack.c.bf16 %v3211_v3, %v3211_v3  ;;  %v3247_v2 = vpack.c.bf16 %v3215_v16, %v3215_v16  ;;  %v3248_v6 = vpack.c.bf16 %v3216_v8, %v3216_v8 }
 0x927   : > { %v3253_v46 = vpack.c.bf16 %v3221_v30, %v3221_v30  ;;  %v3249_v1 = vpack.c.bf16 %v3217_v18, %v3217_v18  ;;  %v3250_v38 = vpack.c.bf16 %v3218_v13, %v3218_v13  ;;  %v3254_v12 = vpack.c.bf16 %v3222_v57, %v3222_v57 }
 0x928   : > { %v3312_v41 = vunpack.c.l.b16 %v3244_v10  ;;  %v3251_v62 = vpack.c.bf16 %v3219_v63, %v3219_v63  ;;  %v3255_v28 = vpack.c.bf16 %v3223_v55, %v3223_v55  ;;  %v3256_v29 = vpack.c.bf16 %v3224_v52, %v3224_v52 }
 0x929   : > { %v3313_v50 = vunpack.c.l.b16 %v3245_v5  ;;  %v3257_v25 = vpack.c.bf16 %v3225_v47, %v3225_v47  ;;  %v3258_v39 = vpack.c.bf16 %v3226_v43, %v3226_v43  ;;  %v3314_v4 = vunpack.c.l.b16 %v3246_v44 }
 0x92a   : > { %v3320_v45 = vunpack.c.l.b16 %v3252_v53  ;;  %v3311_v11 = vunpack.c.l.b16 %v3243_v26  ;;  %v3315_v22 = vunpack.c.l.b16 %v3247_v2  ;;  %v3316_v35 = vunpack.c.l.b16 %v3248_v6  ;;  %v7184_v2 = vld [vmem:[#allocation20_spill] sm:$0xff] }
 0x92b   : > { %v3321_v31 = vunpack.c.l.b16 %v3253_v46  ;;  %v3317_v3 = vunpack.c.l.b16 %v3249_v1  ;;  %v3322_v15 = vunpack.c.l.b16 %v3254_v12  ;;  %v3355_v51 = vrot.slane %v3312_v41, 7  ;;  %v3406_v46 = vpop.permute.xlu1 %3405 }
 0x92c   : > { %v3357_v24 = vrot.slane %v3313_v50, 6  ;;  %v3318_v17 = vunpack.c.l.b16 %v3250_v38  ;;  %v3319_v16 = vunpack.c.l.b16 %v3251_v62  ;;  %v3323_v34 = vunpack.c.l.b16 %v3255_v28  ;;  %v3408_v38 = vpop.permute.xlu2 %3407  ;;  %v4324_v50 = vld [vmem:[%s6570_s3 + $0x98] sm:$0xff] }
 0x92d   : > { %v3324_v54 = vunpack.c.l.b16 %v3256_v29  ;;  %v3356_v37 = vsel %vm1479_vm9, %v3355_v51, %v3311_v11  ;;  %v3359_v8 = vrot.slane %v3314_v4, 5  ;;  %v3369_v42 = vrot.slane %v3320_v45, 7  ;;  %3584 = vmatpush.bf16.msrb.mxu1 %v4324_v50  ;;  %3607 = vrot.lane.b32.xlu1 %v4324_v50, %s4484_s19  ;;  %v4472_v4 = vld [vmem:[%s6570_s3 + $0x80] sm:$0xff]  ;;  %v3410_v11 = vpop.permute.xlu0 %3409 }
 0x92e   : > { %v3371_v59 = vrot.slane %v3321_v31, 6  ;;  %v3325_v20 = vunpack.c.l.b16 %v3257_v25  ;;  %v3326_v0 = vunpack.c.l.b16 %v3258_v39  ;;  %v3358_v33 = vsel %vm1482_vm10, %v3357_v24, %v3356_v37  ;;  %v4323_v25 = vld [vmem:[%s6570_s3 + $0x90] sm:$0xff]  ;;  %v4471_v39 = vld [vmem:[%s6570_s3 + $0x88] sm:$0xff] }
 0x92f   : > { %v3361_v18 = vrot.slane %v3315_v22, 4  ;;  %v3360_v56 = vsel %vm1485_vm11, %v3359_v8, %v3358_v33  ;;  %v3363_v30 = vrot.slane %v3316_v35, 3  ;;  %v3370_v49 = vsel %vm1479_vm9, %v3369_v42, %v3319_v16 }
 0x930   : > { %v3373_v40 = vrot.slane %v3322_v15, 5  ;;  %v3365_v60 = vrot.slane %v3317_v3, 2  ;;  %v3372_v57 = vsel %vm1482_vm10, %v3371_v59, %v3370_v49  ;;  %v3375_v10 = vrot.slane %v3323_v34, 4  ;;  %v7185_v34 = vld [vmem:[#allocation99_spill] sm:$0xff] }
 0x931   : > { %v3362_v13 = vsel %vm1488_vm12, %v3361_v18, %v3360_v56  ;;  %v3367_v61 = vrot.slane %v3318_v17, 1  ;;  %v3377_v9 = vrot.slane %v3324_v54, 3  ;;  %v3379_v19 = vrot.slane %v3325_v20, 2  ;;  %3585 = vmatpush.bf16.msrb.mxu1 %v4323_v25 }
 0x932   : > { %v3364_v63 = vsel %vm1491_vm13, %v3363_v30, %v3362_v13  ;;  %v3374_v55 = vsel %vm1485_vm11, %v3373_v40, %v3372_v57  ;;  %v3381_v43 = vrot.slane %v3326_v0, 1  ;;  %v3534_v54 = vmul.f32 %v7185_v34, %v6911_v27 }
 0x933   : > { %v3366_v52 = vsel %vm1494_vm14, %v3365_v60, %v3364_v63  ;;  %v3376_v5 = vsel %vm1488_vm12, %v3375_v10, %v3374_v55  ;;  %v3412_v35 = vpop.permute.xlu1 %3411  ;;  %v3535_v37 = vmul.f32 %v6315_v36, %v4792_v48  ;;  %v3536_v30 = vmul.f32 %v6322_v58, %v7068_v14 }
 0x934   : > { %v3368_v47 = vsel %vm1497_vm15, %v3367_v61, %v3366_v52  ;;  %v3378_v7 = vsel %vm1491_vm13, %v3377_v9, %v3376_v5 }
 0x935   : > { %v3380_v44 = vsel %vm1494_vm14, %v3379_v19, %v3378_v7  ;;  %3586 = vmatpush.bf16.msrb.mxu1 %v4471_v39  ;;  %v4326_v39 = vld [vmem:[%s6571_s4 + $0x8] sm:$0xff] }
 0x936   : > { %v3382_v53 = vsel %vm1497_vm15, %v3381_v43, %v3380_v44  ;;  %v7186_v44 = vld [vmem:[#allocation12_spill] sm:$0xff]  ;;  %3700 = vmatpush.bf16.msra.mxu0 %v4326_v39 }
 0x937   : > { %v3384_v26 = vpack.c.b16 %v3382_v53, %v3368_v47 }
 0x939   : > { %4266 = vmatmul.msk.bf16.gmra.mxu3 %vm395_vm8, %v3384_v26  ;;  %3587 = vmatpush.bf16.msrb.mxu1 %v4472_v4  ;;  %v4328_v4 = vld [vmem:[%s6572_s5 + $0x8] sm:$0xff] }
 0x93a   : > { %3785 = vmatpush.bf16.msrb.mxu3 %v4328_v4 }
 0x949   : > { %4270 = vmatmul.msk.bf16.vlgmr.msra.gmra.mxu3 %vm1612_vm7, %v7184_v2 }
 0x96a   : > { %v3432_v6 = vpop.f32.mrf.mxu3 }
 0x96b   : > { %v3433_v1 = vadd.f32 %v3432_v6, %v3406_v46  ;;  %v7187_v6 = vld [vmem:[#allocation108_spill] sm:$0xff] }
 0x96d   : > { %v3442_v62 = vmax.f32 %v3433_v1, 0.0  ;;  %v7188_v1 = vld [vmem:[#allocation66_spill] sm:$0xff] }
 0x972   : > { %v3434_v12 = vpop.f32.mrf.mxu3 }
 0x973   : > { %v3435_v41 = vadd.f32 %v3434_v12, %v3408_v38 }
 0x975   : > { %v3443_v28 = vmax.f32 %v3435_v41, 0.0  ;;  %v7189_v41 = vld [vmem:[#allocation89_spill] sm:$0xff] }
 0x977   : > { %v4456_v29 = vpack.i.bf16 %v3443_v28, %v3442_v62 }
 0x979   : > { %4457 = vrot.lane.b32.xlu2 %v4456_v29, %s4486_s25 }
 0x981   : > { %3605 = vrot.lane.b32.xlu2 %v4323_v25, %s4484_s19 }
 0x99f   : > { %v3608_v18 = vpop.permute.xlu1 %3607 }
 0x9a0   : > { %3623 = vmatpush.bf16.msrb.mxu2 %v3608_v18 }
 0x9bc   : > { %v3437_v45 = vpop.f32.mrf.mxu3 }
 0x9bd   : > { %v3438_v22 = vadd.f32 %v3437_v45, %v3410_v11  ;;  %v4325_v45 = vld [vmem:[%s6571_s4] sm:$0xff] }
 0x9be   : > { %v4327_v11 = vld [vmem:[%s6572_s5] sm:$0xff]  ;;  %3701 = vmatpush.bf16.msra.mxu0 %v4325_v45 }
 0x9bf   : > { %v3444_v15 = vmax.f32 %v3438_v22, 0.0  ;;  %3786 = vmatpush.bf16.msrb.mxu3 %v4327_v11 }
 0x9c4   : > { %v3439_v31 = vpop.f32.mrf.mxu3 }
 0x9c5   : > { %v3440_v3 = vadd.f32 %v3439_v31, %v3412_v35 }
 0x9c7   : > { %v3445_v51 = vmax.f32 %v3440_v3, 0.0 }
 0x9c9   : > { %v4461_v24 = vpack.i.bf16 %v3445_v51, %v3444_v15  ;;  %v7190_v51 = vld [vmem:[#allocation67_spill] sm:$0xff] }
 0x9cb   : > { %4462 = vrot.lane.b32.xlu0 %v4461_v24, %s4486_s25 }
 0x9cc   : > { %v3530_v17 = vpop.f32.mrf.mxu3 }
 0x9cd   : > { %v3537_v27 = vmul.f32 %v3530_v17, %v7179_v23 }
 0x9d3   : > { %v4458_v16 = vpop.permute.xlu2 %4457 }
 0x9d4   : > { %v4460_v8 = vunpack.i.h.bf16 %v4458_v16  ;;  %v4459_v42 = vunpack.i.l.bf16 %v4458_v16  ;;  %v3532_v59 = vpop.f32.mrf.mxu3  ;;  %v7191_v16 = vld [vmem:[#allocation10_spill] sm:$0xff] }
 0x9d6   : > { %v3555_v20 = vsel %vm395_vm8, %v3535_v37, %v4460_v8  ;;  %v3554_v0 = vsel %vm395_vm8, %v3534_v54, %v4459_v42 }
 0x9d7   : > { %v3558_v33 = vpack.c.bf16 %v3555_v20, %v3554_v0 }
 0x9d9   : > { %4279 = vmatmul.msk.bf16.vlgmr.msrb.gmra.mxu1 %vm1729_vm0, %v3558_v33 }
 0x9db   : > { %v3606_v60 = vpop.permute.xlu2 %3605 }
 0x9dc   : > { %3624 = vmatpush.bf16.msrb.mxu2 %v3606_v60 }
 0xa3d   : > { %v4463_v56 = vpop.permute.xlu0 %4462 }
 0xa3e   : > { %v4465_v49 = vunpack.i.h.bf16 %v4463_v56  ;;  %v4464_v48 = vunpack.i.l.bf16 %v4463_v56 }
 0xa40   : > { %v3556_v36 = vsel %vm395_vm8, %v3536_v30, %v4464_v48  ;;  %v3557_v40 = vsel %vm395_vm8, %v3537_v27, %v4465_v49 }
 0xa41   : > { %v3559_v13 = vpack.c.bf16 %v3557_v40, %v3556_v36 }
 0xa43   : > { %4280 = vmatmul.msk.bf16.gmra.mxu1 %vm1729_vm0, %v3559_v13 }
 0xa56   : > { %v3589_v57 = vpop.f32.mrf.mxu1 }
 0xa57   : > { %v3599_v63 = vmax.f32 %v3589_v57, 0.0 }
 0xa5e   : > { %v3591_v10 = vpop.f32.mrf.mxu1 }
 0xa5f   : > { %v3600_v61 = vmax.f32 %v3591_v10, 0.0 }
 0xa61   : > { %v3603_v55 = vpack.c.bf16 %v3600_v61, %v3599_v63 }
 0xa63   : > { %4281 = vmatmul.msk.bf16.vlgmr.msrb.gmra.mxu2 %vm395_vm8, %v3603_v55 }
 0xac0   : > { %v3594_v14 = vpop.f32.mrf.mxu1 }
 0xac1   : > { %v3601_v23 = vmax.f32 %v3594_v14, 0.0 }
 0xac8   : > { %v3596_v58 = vpop.f32.mrf.mxu1 }
 0xac9   : > { %v3602_v9 = vmax.f32 %v3596_v58, 0.0 }
 0xacb   : > { %v3604_v52 = vpack.c.bf16 %v3602_v9, %v3601_v23 }
 0xacd   : > { %4282 = vmatmul.msk.bf16.gmra.mxu2 %vm395_vm8, %v3604_v52 }
 0xae6   : > { %v3626_v5 = vpop.f32.mrf.mxu2 }
 0xae7   : > { %3640 = vrot.lane.b32.xlu0 %v3626_v5, %s4486_s25 }
 0xaee   : > { %v3628_v19 = vpop.f32.mrf.mxu2 }
 0xaef   : > { %3642 = vrot.lane.b32.xlu1 %v3628_v19, %s4486_s25 }
 0xb50   : > { %v3631_v47 = vpop.f32.mrf.mxu2 }
 0xb51   : > { %3644 = vrot.lane.b32.xlu2 %v3631_v47, %s4486_s25 }
 0xb58   : > { %v3633_v7 = vpop.f32.mrf.mxu2 }
 0xb59   : > { %3646 = vrot.lane.b32.xlu0 %v3633_v7, %s4486_s25  ;;  %v3641_v43 = vpop.permute.xlu0 %3640 }
 0xb5a   : > { %v3652_v53 = vadd.f32 %v3641_v43, %v7186_v44 }
 0xb5c   : > { %v3656_v26 = vmax.f32 %v3652_v53, 0.0 }
 0xb5e   : > { %v3660_v38 = vadd.f32 %v3656_v26, %v7188_v1 }
 0xb60   : > { %v3749_v28 = vmax.f32 %v3660_v38, 0.0 }
 0xb61   : > { %v3643_v2 = vpop.permute.xlu1 %3642 }
 0xb62   : > { %v3653_v46 = vadd.f32 %v3643_v2, %v7187_v6 }
 0xb64   : > { %v3657_v12 = vmax.f32 %v3653_v46, 0.0 }
 0xb66   : > { %v3661_v62 = vadd.f32 %v3657_v12, %v7189_v41 }
 0xb68   : > { %v3750_v29 = vmax.f32 %v3661_v62, 0.0  ;;  %v3664_v50 = vpack.c.bf16 %v3661_v62, %v3660_v38 }
 0xb6a   : > { %3672 = vrot.lane.b32.xlu1 %v3664_v50, %s4484_s19  ;;  %v3753_v25 = vpack.c.bf16 %v3750_v29, %v3749_v28 }
 0xb6c   : > { %3757 = vrot.lane.b32.xlu0 %v3753_v25, %s4484_s19 }
 0xb74   : > { %3822 = vrot.lane.b32.xlu0 %v4327_v11, %s4487_s17 }
 0xbab   : > { %v3645_v22 = vpop.permute.xlu2 %3644 }
 0xbac   : > { %v3654_v35 = vadd.f32 %v3645_v22, %v6243_v21 }
 0xbae   : > { %v3658_v31 = vmax.f32 %v3654_v35, 0.0 }
 0xbb0   : > { %v3662_v24 = vadd.f32 %v3658_v31, %v7190_v51 }
 0xbb2   : > { %v3751_v54 = vmax.f32 %v3662_v24, 0.0 }
 0xbcb   : > { %v3647_v3 = vpop.permute.xlu0 %3646 }
 0xbcc   : > { %v3655_v15 = vadd.f32 %v3647_v3, %v6279_v32 }
 0xbce   : > { %v3659_v17 = vmax.f32 %v3655_v15, 0.0 }
 0xbd0   : > { %v3663_v34 = vadd.f32 %v3659_v17, %v7191_v16 }
 0xbd2   : > { %v3752_v37 = vmax.f32 %v3663_v34, 0.0  ;;  %v3665_v8 = vpack.c.bf16 %v3663_v34, %v3662_v24 }
 0xbd4   : > { %3674 = vrot.lane.b32.xlu2 %v3665_v8, %s4484_s19  ;;  %v3754_v42 = vpack.c.bf16 %v3752_v37, %v3751_v54 }
 0xbd6   : > { %3759 = vrot.lane.b32.xlu1 %v3754_v42, %s4484_s19 }
 0xbdc   : > { %v3673_v21 = vpop.permute.xlu1 %3672  ;;  %3824 = vrot.lane.b32.xlu2 %v4328_v4, %s4487_s17 }
 0xbdd   : > { %4291 = vmatmul.msk.bf16.vlgmr.msra.gmra.mxu0 %vm395_vm8, %v3673_v21 }
 0xbde   : > { %v3758_v59 = vpop.permute.xlu0 %3757 }
 0xbdf   : > { %4301 = vmatmul.msk.bf16.vlgmr.msrb.gmra.mxu3 %vm395_vm8, %v3758_v59 }
 0xbe6   : > { %v3823_v10 = vpop.permute.xlu0 %3822 }
 0xc2e   : > { %v3675_v32 = vpop.permute.xlu2 %3674 }
 0xc2f   : > { %4292 = vmatmul.msk.bf16.gmra.mxu0 %vm395_vm8, %v3675_v32 }
 0xc36   : > { %v3825_v36 = vpop.permute.xlu2 %3824 }
 0xc37   : > { %3837 = vmatpush.bf16.msra.mxu1 %v3825_v36 }
 0xc3b   : > { %3838 = vmatpush.bf16.msra.mxu1 %v3823_v10 }
 0xc48   : > { %v3760_v20 = vpop.permute.xlu1 %3759 }
 0xc49   : > { %4302 = vmatmul.msk.bf16.gmra.mxu3 %vm395_vm8, %v3760_v20  ;;  %v4466_v20 = vld [vmem:[%s6573_s6] ss:$0 sm:$0xff] }
 0xc5a   : > { %v3703_v18 = vpop.f32.mrf.mxu0 }
 0xc5b   : > { %v3713_v27 = vsel %vm395_vm8, %v3703_v18, 0.0 }
 0xc5c   : > { %v3714_v48 = vrot.slane %v3713_v27, 4 }
 0xc5e   : > { %v3715_v13 = vadd.f32 %v3714_v48, %v3713_v27 }
 0xc60   : > { %v3716_v57 = vrot.slane %v3715_v13, 2 }
 0xc62   : > { %v6429_v0 = vpop.f32.mrf.mxu3  ;;  %v3705_v56 = vpop.f32.mrf.mxu0  ;;  %v3717_v14 = vadd.f32 %v3716_v57, %v3715_v13 }
 0xc63   : > { %3940 = vrot.lane.b32.xlu1 %v6429_v0, %s4488_s18  ;;  %v3720_v30 = vsel %vm395_vm8, %v3705_v56, 0.0  ;;  %v3848_v8 = vrot.slane %v6429_v0, 1  ;;  %v3849_v42 = vrot.slane %v6429_v0, 2  ;;  %v3850_v21 = vrot.slane %v6429_v0, 3 }
 0xc64   : > { %v3721_v49 = vrot.slane %v3720_v30, 4  ;;  %v3718_v52 = vrot.slane %v3717_v14, 1  ;;  %v3851_v59 = vrot.slane %v6429_v0, 4  ;;  %v3852_v32 = vrot.slane %v6429_v0, 5 }
 0xc65   : > { %v3853_v18 = vrot.slane %v6429_v0, 6  ;;  %v3854_v56 = vrot.slane %v6429_v0, 7  ;;  %v3876_v27 = vperm.slane %v6429_v0, 0  ;;  %v3878_v48 = vperm.slane %v3849_v42, 0 }
 0xc66   : > { %v3722_v40 = vadd.f32 %v3721_v49, %v3720_v30  ;;  %v3719_v44 = vadd.f32 %v3718_v52, %v3717_v14  ;;  %v3877_v49 = vperm.slane %v3848_v8, 0  ;;  %v3880_v13 = vperm.slane %v3851_v59, 0 }
 0xc68   : > { %v3723_v60 = vrot.slane %v3722_v40, 2  ;;  %v3741_v1 = vmul.f32 0.125, %v3719_v44 }
 0xc6a   : > { %v6433_v33 = vpop.f32.mrf.mxu3  ;;  %v3724_v63 = vadd.f32 %v3723_v60, %v3722_v40  ;;  %v3798_v29 = vmax.f32 %v3741_v1, 0.0  ;;  %v3879_v40 = vperm.slane %v3850_v21, 0  ;;  %v3881_v60 = vperm.slane %v3852_v32, 0 }
 0xc6b   : > { %3942 = vrot.lane.b32.xlu2 %v6433_v33, %s4488_s18  ;;  %v3855_v10 = vrot.slane %v6433_v33, 1  ;;  %v3857_v14 = vrot.slane %v6433_v33, 3 }
 0xc6c   : > { %v3725_v23 = vrot.slane %v3724_v63, 1  ;;  %v3802_v45 = vpack.c.bf16 %v3798_v29, %v3798_v29 }
 0xc6e   : > { %v3726_v19 = vadd.f32 %v3725_v23, %v3724_v63  ;;  %v3814_v3 = vunpack.c.l.b16 %v3802_v45  ;;  %v3856_v63 = vrot.slane %v6433_v33, 2 }
 0xc70   : > { %v3742_v2 = vmul.f32 0.125, %v3726_v19  ;;  %v3858_v19 = vrot.slane %v6433_v33, 4 }
 0xc72   : > { %v3799_v41 = vmax.f32 %v3742_v2, 0.0 }
 0xc74   : > { %v3803_v25 = vpack.c.bf16 %v3799_v41, %v3799_v41  ;;  %v3860_v41 = vrot.slane %v6433_v33, 6 }
 0xc76   : > { %v3815_v22 = vunpack.c.l.b16 %v3803_v25  ;;  %v3861_v25 = vrot.slane %v6433_v33, 7 }
 0xc78   : > { %v3818_v51 = vsel %vm1479_vm9, %v3815_v22, %v3814_v3  ;;  %v3888_v22 = vperm.slane %v3858_v19, 0  ;;  %v3891_v8 = vperm.slane %v3861_v25, 0 }
 0xcac   : > { %v3708_v61 = vpop.f32.mrf.mxu0 }
 0xcad   : > { %v3727_v55 = vsel %vm395_vm8, %v3708_v61, 0.0  ;;  %v3882_v61 = vperm.slane %v3853_v18, 0 }
 0xcae   : > { %v3728_v58 = vrot.slane %v3727_v55, 4 }
 0xcb0   : > { %v3729_v9 = vadd.f32 %v3728_v58, %v3727_v55  ;;  %v3883_v55 = vperm.slane %v3854_v56, 0 }
 0xcb2   : > { %v3730_v5 = vrot.slane %v3729_v9, 2 }
 0xcb4   : > { %v3731_v47 = vadd.f32 %v3730_v5, %v3729_v9  ;;  %v3710_v7 = vpop.f32.mrf.mxu0 }
 0xcb5   : > { %v3734_v43 = vsel %vm395_vm8, %v3710_v7, 0.0 }
 0xcb6   : > { %v3732_v53 = vrot.slane %v3731_v47, 1  ;;  %v3735_v26 = vrot.slane %v3734_v43, 4 }
 0xcb8   : > { %v3733_v6 = vadd.f32 %v3732_v53, %v3731_v47  ;;  %v3736_v46 = vadd.f32 %v3735_v26, %v3734_v43  ;;  %v3859_v47 = vrot.slane %v6433_v33, 5 }
 0xcba   : > { %v3743_v38 = vmul.f32 0.125, %v3733_v6  ;;  %v3737_v12 = vrot.slane %v3736_v46, 2  ;;  %v3889_v3 = vperm.slane %v3859_v47, 0 }
 0xcbc   : > { %v3738_v62 = vadd.f32 %v3737_v12, %v3736_v46  ;;  %v3800_v28 = vmax.f32 %v3743_v38, 0.0  ;;  %v3884_v46 = vperm.slane %v6433_v33, 0  ;;  %v3890_v33 = vperm.slane %v3860_v41, 0 }
 0xcbe   : > { %v3739_v50 = vrot.slane %v3738_v62, 1  ;;  %v3804_v4 = vpack.c.bf16 %v3800_v28, %v3800_v28 }
 0xcc0   : > { %v3740_v39 = vadd.f32 %v3739_v50, %v3738_v62  ;;  %v3816_v31 = vunpack.c.l.b16 %v3804_v4  ;;  %v3885_v62 = vperm.slane %v3855_v10, 0 }
 0xcc2   : > { %v3744_v11 = vmul.f32 0.125, %v3740_v39  ;;  %v3819_v17 = vsel %vm1482_vm10, %v3816_v31, %v3818_v51  ;;  %v3886_v39 = vperm.slane %v3856_v63, 0 }
 0xcc4   : > { %v3801_v35 = vmax.f32 %v3744_v11, 0.0  ;;  %v3887_v11 = vperm.slane %v3857_v14, 0 }
 0xcc5   : > { %v3943_v44 = vpop.permute.xlu2 %3942 }
 0xcc6   : > { %v3805_v15 = vpack.c.bf16 %v3801_v35, %v3801_v35  ;;  %v3960_v4 = vadd.f32 %v3943_v44, %v3884_v46  ;;  %v3961_v35 = vadd.f32 %v3943_v44, %v3885_v62  ;;  %v3964_v42 = vadd.f32 %v3943_v44, %v3888_v22 }
 0xcc7   : > { %v3965_v32 = vadd.f32 %v3943_v44, %v3889_v3 }
 0xcc8   : > { %v3817_v24 = vunpack.c.l.b16 %v3805_v15  ;;  %v3962_v15 = vadd.f32 %v3943_v44, %v3886_v39 }
 0xcca   : > { %v3820_v16 = vsel %vm1485_vm11, %v3817_v24, %v3819_v17  ;;  %v3963_v17 = vadd.f32 %v3943_v44, %v3887_v11 }
 0xccb   : > { %v3821_v34 = vpack.c.b16 %v3820_v16, %v3820_v16 }
 0xccc   : > { %v6444_v54 = vpop.f32.mrf.mxu3 }
 0xccd   : > { %3944 = vrot.lane.b32.xlu0 %v6444_v54, %s4488_s18  ;;  %4303 = vmatmul.msk.bf16.vlgmr.msra.gmra.mxu1 %vm395_vm8, %v3821_v34  ;;  %v3862_v16 = vrot.slane %v6444_v54, 1  ;;  %v3863_v21 = vrot.slane %v6444_v54, 2  ;;  %v3864_v18 = vrot.slane %v6444_v54, 3  ;;  %v3867_v63 = vrot.slane %v6444_v54, 6 }
 0xcd4   : > { %v6449_v37 = vpop.f32.mrf.mxu3 }
 0xcd5   : > { %3946 = vrot.lane.b32.xlu1 %v6449_v37, %s4488_s18  ;;  %v3941_v30 = vpop.permute.xlu1 %3940  ;;  %v3869_v46 = vrot.slane %v6449_v37, 1  ;;  %v3900_v25 = vperm.slane %v6449_v37, 0 }
 0xcd6   : > { %v3952_v58 = vadd.f32 %v3941_v30, %v3876_v27  ;;  %v3953_v9 = vadd.f32 %v3941_v30, %v3877_v49  ;;  %v3954_v52 = vadd.f32 %v3941_v30, %v3878_v48  ;;  %v3955_v5 = vadd.f32 %v3941_v30, %v3879_v40 }
 0xcd7   : > { %v3956_v7 = vadd.f32 %v3941_v30, %v3880_v13  ;;  %v3957_v53 = vadd.f32 %v3941_v30, %v3881_v60  ;;  %v3958_v1 = vadd.f32 %v3941_v30, %v3882_v61  ;;  %v3959_v28 = vadd.f32 %v3941_v30, %v3883_v55 }
 0xcd8   : > { %v3865_v27 = vrot.slane %v6444_v54, 4  ;;  %v3892_v49 = vperm.slane %v6444_v54, 0  ;;  %v3967_v40 = vadd.f32 %v3943_v44, %v3891_v8  ;;  %v3866_v13 = vrot.slane %v6444_v54, 5 }
 0xcd9   : > { %v3893_v60 = vperm.slane %v3862_v16, 0  ;;  %v3894_v61 = vperm.slane %v3863_v21, 0  ;;  %v3901_v11 = vperm.slane %v3869_v46, 0 }
 0xcda   : > { %v3897_v47 = vperm.slane %v3866_v13, 0 }
 0xd3f   : > { %v3945_v56 = vpop.permute.xlu0 %3944 }
 0xd40   : > { %v3968_v55 = vadd.f32 %v3945_v56, %v3892_v49 }
 0xd47   : > { %v3947_v62 = vpop.permute.xlu1 %3946 }
 0xd48   : > { %v3976_v3 = vadd.f32 %v3947_v62, %v3900_v25 }
 0xd4a   : > { %v3840_v36 = vpop.f32.mrf.mxu1 }
 0xd4b   : > { %v6465_v57 = vadd.f32 %v4466_v20, %v3840_v36  ;;  %v3966_v20 = vadd.f32 %v3943_v44, %v3890_v33  ;;  %v3898_v44 = vperm.slane %v3867_v63, 0 }
 0xd4d   : > { %v3985_v0 = vrot.slane %v6465_v57, 1  ;;  %v3988_v23 = vperm.slane %v6465_v57, 0  ;;  %v3986_v51 = vrot.slane %v6465_v57, 2 }
 0xd4f   : > { %v3996_v43 = vadd.f32 %v3988_v23, %v3952_v58  ;;  %v3997_v26 = vadd.f32 %v3988_v23, %v3953_v9  ;;  %v3998_v2 = vadd.f32 %v3988_v23, %v3954_v52  ;;  %v3999_v6 = vadd.f32 %v3988_v23, %v3955_v5 }
 0xd50   : > { %v3989_v38 = vperm.slane %v3985_v0, 0  ;;  %v4000_v12 = vadd.f32 %v3988_v23, %v3956_v7  ;;  %v4001_v29 = vadd.f32 %v3988_v23, %v3957_v53  ;;  %v4002_v45 = vadd.f32 %v3988_v23, %v3958_v1 }
 0xd51   : > { %4029 = vst.msk [vmem:[%s6475_s23] sm:$0xff] %vm4028_vm1, %v3996_v43  ;;  %v4003_v31 = vadd.f32 %v3988_v23, %v3959_v28  ;;  %v3990_v48 = vperm.slane %v3986_v51, 0  ;;  %v3868_v58 = vrot.slane %v6444_v54, 7  ;;  %v3895_v0 = vperm.slane %v3864_v18, 0 }
 0xd52   : > { %4030 = vst.msk [vmem:[%s6475_s23 + $0x8] sm:$0xff] %vm4028_vm1, %v3997_v26  ;;  %v3842_v50 = vpop.f32.mrf.mxu1  ;;  %v4004_v24 = vadd.f32 %v3989_v38, %v3960_v4  ;;  %v4005_v34 = vadd.f32 %v3989_v38, %v3961_v35  ;;  %v4006_v59 = vadd.f32 %v3989_v38, %v3962_v15  ;;  %v4007_v30 = vadd.f32 %v3989_v38, %v3963_v17 }
 0xd53   : > { %4031 = vst.msk [vmem:[%s6475_s23 + $0x10] sm:$0xff] %vm4028_vm1, %v3998_v2  ;;  %v4008_v36 = vadd.f32 %v3989_v38, %v3964_v42  ;;  %v4009_v10 = vadd.f32 %v3989_v38, %v3965_v32  ;;  %v4010_v14 = vadd.f32 %v3989_v38, %v3966_v20  ;;  %v3969_v23 = vadd.f32 %v3945_v56, %v3893_v60 }
 0xd54   : > { %4032 = vst.msk [vmem:[%s6475_s23 + $0x18] sm:$0xff] %vm4028_vm1, %v3999_v6  ;;  %v4011_v9 = vadd.f32 %v3989_v38, %v3967_v40  ;;  %v3896_v52 = vperm.slane %v3865_v27, 0  ;;  %v3970_v5 = vadd.f32 %v3945_v56, %v3894_v61  ;;  %v4012_v19 = vadd.f32 %v3990_v48, %v3968_v55 }
 0xd55   : > { %4033 = vst.msk [vmem:[%s6475_s23 + $0x20] sm:$0xff] %vm4028_vm1, %v4000_v12  ;;  %v3971_v7 = vadd.f32 %v3945_v56, %v3895_v0  ;;  %v4013_v43 = vadd.f32 %v3990_v48, %v3969_v23  ;;  %v3987_v53 = vrot.slane %v6465_v57, 3  ;;  %v3899_v2 = vperm.slane %v3868_v58, 0 }
 0xd56   : > { %4034 = vst.msk [vmem:[%s6475_s23 + $0x28] sm:$0xff] %vm4028_vm1, %v4001_v29  ;;  %v3972_v54 = vadd.f32 %v3945_v56, %v3896_v52  ;;  %v4014_v26 = vadd.f32 %v3990_v48, %v3970_v5  ;;  %v3973_v6 = vadd.f32 %v3945_v56, %v3897_v47  ;;  %v3974_v38 = vadd.f32 %v3945_v56, %v3898_v44 }
 0xd57   : > { %4035 = vst.msk [vmem:[%s6475_s23 + $0x30] sm:$0xff] %vm4028_vm1, %v4002_v45  ;;  %v4015_v1 = vadd.f32 %v3990_v48, %v3971_v7  ;;  %v3870_v12 = vrot.slane %v6449_v37, 2  ;;  %v3975_v57 = vadd.f32 %v3945_v56, %v3899_v2  ;;  %v3871_v28 = vrot.slane %v6449_v37, 3 }
 0xd58   : > { %4036 = vst.msk [vmem:[%s6475_s23 + $0x38] sm:$0xff] %vm4028_vm1, %v4003_v31  ;;  %v4016_v41 = vadd.f32 %v3990_v48, %v3972_v54  ;;  %v4017_v29 = vadd.f32 %v3990_v48, %v3973_v6  ;;  %v3872_v50 = vrot.slane %v6449_v37, 4  ;;  %v3991_v39 = vperm.slane %v3987_v53, 0 }
 0xd59   : > { %4037 = vst.msk [vmem:[%s6475_s23 + $0x40] sm:$0xff] %vm4028_vm1, %v4004_v24  ;;  %v4018_v4 = vadd.f32 %v3990_v48, %v3974_v38  ;;  %v3873_v45 = vrot.slane %v6449_v37, 5  ;;  %v4019_v22 = vadd.f32 %v3990_v48, %v3975_v57  ;;  %v3874_v35 = vrot.slane %v6449_v37, 6 }
 0xd5a   : > { %4038 = vst.msk [vmem:[%s6475_s23 + $0x48] sm:$0xff] %vm4028_vm1, %v4005_v34  ;;  %v3902_v31 = vperm.slane %v3870_v12, 0  ;;  %v3875_v15 = vrot.slane %v6449_v37, 7  ;;  %v3903_v51 = vperm.slane %v3871_v28, 0  ;;  %v3977_v24 = vadd.f32 %v3947_v62, %v3901_v11 }
 0xd5b   : > { %4039 = vst.msk [vmem:[%s6475_s23 + $0x50] sm:$0xff] %vm4028_vm1, %v4006_v59  ;;  %v3904_v33 = vperm.slane %v3872_v50, 0  ;;  %v4020_v16 = vadd.f32 %v3991_v39, %v3976_v3  ;;  %v3905_v34 = vperm.slane %v3873_v45, 0  ;;  %v3906_v21 = vperm.slane %v3874_v35, 0 }
 0xd5c   : > { %4040 = vst.msk [vmem:[%s6475_s23 + $0x58] sm:$0xff] %vm4028_vm1, %v4007_v30  ;;  %v3978_v17 = vadd.f32 %v3947_v62, %v3902_v31  ;;  %v3979_v8 = vadd.f32 %v3947_v62, %v3903_v51  ;;  %v4021_v42 = vadd.f32 %v3991_v39, %v3977_v24  ;;  %v3907_v32 = vperm.slane %v3875_v15, 0 }
 0xd5d   : > { %4041 = vst.msk [vmem:[%s6475_s23 + $0x60] sm:$0xff] %vm4028_vm1, %v4008_v36  ;;  %v3980_v37 = vadd.f32 %v3947_v62, %v3904_v33  ;;  %v3981_v20 = vadd.f32 %v3947_v62, %v3905_v34  ;;  %v3982_v56 = vadd.f32 %v3947_v62, %v3906_v21 }
 0xd5e   : > { %4042 = vst.msk [vmem:[%s6475_s23 + $0x68] sm:$0xff] %vm4028_vm1, %v4009_v10  ;;  %v4022_v59 = vadd.f32 %v3991_v39, %v3978_v17  ;;  %v4023_v18 = vadd.f32 %v3991_v39, %v3979_v8  ;;  %v3983_v27 = vadd.f32 %v3947_v62, %v3907_v32 }
 0xd5f   : > { %4043 = vst.msk [vmem:[%s6475_s23 + $0x70] sm:$0xff] %vm4028_vm1, %v4010_v14  ;;  %v4024_v30 = vadd.f32 %v3991_v39, %v3980_v37  ;;  %v4025_v49 = vadd.f32 %v3991_v39, %v3981_v20  ;;  %v4026_v48 = vadd.f32 %v3991_v39, %v3982_v56 }
 0xd60   : > { %4044 = vst.msk [vmem:[%s6475_s23 + $0x78] sm:$0xff] %vm4028_vm1, %v4011_v9  ;;  %v4027_v36 = vadd.f32 %v3991_v39, %v3983_v27 }
 0xd61   : > { %4045 = vst.msk [vmem:[%s6475_s23 + $0x80] sm:$0xff] %vm4028_vm1, %v4012_v19 }
 0xd62   : > { %4046 = vst.msk [vmem:[%s6475_s23 + $0x88] sm:$0xff] %vm4028_vm1, %v4013_v43 }
 0xd63   : > { %4047 = vst.msk [vmem:[%s6475_s23 + $0x90] sm:$0xff] %vm4028_vm1, %v4014_v26 }
 0xd64   : > { %4048 = vst.msk [vmem:[%s6475_s23 + $0x98] sm:$0xff] %vm4028_vm1, %v4015_v1 }
 0xd65   : > { %4049 = vst.msk [vmem:[%s6475_s23 + $0xa0] sm:$0xff] %vm4028_vm1, %v4016_v41 }
 0xd66   : > { %4050 = vst.msk [vmem:[%s6475_s23 + $0xa8] sm:$0xff] %vm4028_vm1, %v4017_v29 }
 0xd67   : > { %4051 = vst.msk [vmem:[%s6475_s23 + $0xb0] sm:$0xff] %vm4028_vm1, %v4018_v4 }
 0xd68   : > { %4052 = vst.msk [vmem:[%s6475_s23 + $0xb8] sm:$0xff] %vm4028_vm1, %v4019_v22 }
 0xd69   : > { %4053 = vst.msk [vmem:[%s6475_s23 + $0xc0] sm:$0xff] %vm4028_vm1, %v4020_v16 }
 0xd6a   : > { %4054 = vst.msk [vmem:[%s6475_s23 + $0xc8] sm:$0xff] %vm4028_vm1, %v4021_v42 }
 0xd6b   : > { %4055 = vst.msk [vmem:[%s6475_s23 + $0xd0] sm:$0xff] %vm4028_vm1, %v4022_v59 }
 0xd6c   : > { %4056 = vst.msk [vmem:[%s6475_s23 + $0xd8] sm:$0xff] %vm4028_vm1, %v4023_v18 }
 0xd6d   : > { %4057 = vst.msk [vmem:[%s6475_s23 + $0xe0] sm:$0xff] %vm4028_vm1, %v4024_v30 }
 0xd6e   : > { %4058 = vst.msk [vmem:[%s6475_s23 + $0xe8] sm:$0xff] %vm4028_vm1, %v4025_v49 }
 0xd6f   : > { %4059 = vst.msk [vmem:[%s6475_s23 + $0xf0] sm:$0xff] %vm4028_vm1, %v4026_v48 }
 0xd70   : > { %4060 = vst.msk [vmem:[%s6475_s23 + $0xf8] sm:$0xff] %vm4028_vm1, %v4027_v36 }
 0xd71 PF: > { %s17_s24 = sadd.s32 1, %s4479_s24  }
 0xd72   : > { %p14_p4 = scmp.ge.s32.totalorder %s17_s24, 4  }
 0xd74   :  { %16 = sbr.rel (!%p14_p4) target bundleno = 1 (0x1), region = 83 }

</bundles_post_ra>
